<compile_context>
chip_gen: v7x
topology: tpu7x:2x2x1
jax: 0.10.0
libtpu: 0.0.40
codegen_flags: <defaults>
</compile_context>

<pallas_src>
from functools import partial

import jax
import jax.numpy as jnp
from jax import lax
from jax.experimental import pallas as pl
from jax.experimental.pallas import tpu as pltpu

F_IN = 15      # LSTM input feature size   (input_size=15)
H = 100        # LSTM hidden size          (hidden_size=100)
OUT2 = 2       # final projection size     (fc2_DE out_features=2)

F_PAD = 128    # feature dim padded to one lane tile
H_PAD = 128    # hidden dim padded to one lane tile (lane-aligned gate slices)
G = 4 * H_PAD  # padded gate width (512)
OUT_PAD = 128  # fc2 output padded to one lane tile (unmasked output store)


# ---------------------------------------------------------------------------
# Kernel
# ---------------------------------------------------------------------------
def _gates_to_hc(gates, c):
    """PyTorch LSTM gate math on lane-padded gates. Gate order: i, f, g, o."""
    i = jax.nn.sigmoid(gates[:, 0 * H_PAD:1 * H_PAD])
    f = jax.nn.sigmoid(gates[:, 1 * H_PAD:2 * H_PAD])
    g = jnp.tanh(gates[:, 2 * H_PAD:3 * H_PAD])
    o = jax.nn.sigmoid(gates[:, 3 * H_PAD:4 * H_PAD])
    c_new = f * c + i * g
    h_new = o * jnp.tanh(c_new)
    return h_new, c_new


def _glob_lstm_de_kernel(seq_len, batch, out_steps,
                         pose_ref,                       # (S*B, F_PAD) time-major
                         w_ih_enc_ref, w_hh_enc_ref, b_enc_ref,
                         w_dec_ref, b_dec_ref,           # fused decoder weights
                         w_fc_ref, b_fc_ref, w_fc2_ref, b_fc2_ref,
                         out_ref,                        # (T*B, OUT_PAD)
                         proj_ref,                       # (S*B, G)     scratch
                         deout_ref):                     # (T*B, F_PAD) scratch
    B = batch

    # --- Encoder input projection hoisted out of the recurrence: one matmul
    #     over the whole sequence, bias folded in (never re-added per step).
    proj_ref[...] = (
        jnp.dot(pose_ref[...], w_ih_enc_ref[...],
                preferred_element_type=jnp.float32)
        + b_enc_ref[...])

    w_hh_enc = w_hh_enc_ref[...]

    # --- Encoder recurrence: per step only h @ W_hh remains on the chain.
    def enc_body(t, carry):
        h, c = carry
        gates = (proj_ref[pl.ds(t * B, B), :]
                 + jnp.dot(h, w_hh_enc, preferred_element_type=jnp.float32))
        return _gates_to_hc(gates, c)

    h0 = jnp.zeros((B, H_PAD), jnp.float32)
    c0 = jnp.zeros((B, H_PAD), jnp.float32)
    h, c = lax.fori_loop(0, seq_len, enc_body, (h0, c0), unroll=True)

    # --- Decoder (nn.LSTMCell + fc_DE), autoregressive on fc_DE output.
    #     One fused [x, h] @ [W_ih; W_hh] matmul per step; fc2_DE deferred.
    w_dec = w_dec_ref[...]
    b_dec = b_dec_ref[...]
    w_fc = w_fc_ref[...]
    b_fc = b_fc_ref[...]

    inp0 = pose_ref[pl.ds((seq_len - 1) * B, B), :]   # last observed frame (padded)

    def dec_body(t, carry):
        inp, h, c = carry
        xh = jnp.concatenate([inp, h], axis=-1)       # (B, 256), lane-aligned
        gates = jnp.dot(xh, w_dec, preferred_element_type=jnp.float32) + b_dec
        h_new, c_new = _gates_to_hc(gates, c)
        de_out_t = (jnp.dot(h_new, w_fc, preferred_element_type=jnp.float32)
                    + b_fc)                           # (B, F_PAD), lanes >=15 are 0
        deout_ref[pl.ds(t * B, B), :] = de_out_t
        return de_out_t, h_new, c_new                 # detach() is a no-op in fwd

    lax.fori_loop(0, out_steps, dec_body, (inp0, h, c), unroll=True)

    # --- fc2_DE once over all decoder steps (off the recurrent chain).
    #     Output lane-padded to 128 -> single unmasked store.
    out_ref[...] = (
        jnp.dot(deout_ref[...], w_fc2_ref[...],
                preferred_element_type=jnp.float32)
        + b_fc2_ref[...])


# ---------------------------------------------------------------------------
# Wrapper: padding + pallas_call
# ---------------------------------------------------------------------------
def _pad_gate_matrix(w, rows_out):
    """(in, 4*H) -> (rows_out, 4*H_PAD); each 100-wide gate in its own 128 block."""
    out = jnp.zeros((rows_out, G), jnp.float32)
    for k in range(4):
        out = out.at[:w.shape[0], k * H_PAD:k * H_PAD + H].set(
            w[:, k * H:(k + 1) * H])
    return out


def _pad_gate_bias(b):
    out = jnp.zeros((1, G), jnp.float32)
    for k in range(4):
        out = out.at[:, k * H_PAD:k * H_PAD + H].set(b[:, k * H:(k + 1) * H])
    return out


def _pad_params(params):
    w_ih_enc = _pad_gate_matrix(params["w_ih_enc"], F_PAD)
    w_hh_enc = _pad_gate_matrix(params["w_hh_enc"], H_PAD)
    b_enc = _pad_gate_bias(params["b_enc"])
    # Fused decoder weight: rows [0:128) = padded W_ih, rows [128:256) = padded W_hh.
    w_dec = jnp.concatenate(
        [_pad_gate_matrix(params["w_ih_dec"], F_PAD),
         _pad_gate_matrix(params["w_hh_dec"], H_PAD)], axis=0)
    b_dec = _pad_gate_bias(params["b_dec"])
    w_fc = jnp.zeros((H_PAD, F_PAD), jnp.float32).at[:H, :F_IN].set(params["w_fc"])
    b_fc = jnp.zeros((1, F_PAD), jnp.float32).at[:, :F_IN].set(params["b_fc"])
    w_fc2 = jnp.zeros((F_PAD, OUT_PAD), jnp.float32).at[:F_IN, :OUT2].set(
        params["w_fc2"])
    b_fc2 = jnp.zeros((1, OUT_PAD), jnp.float32).at[:, :OUT2].set(params["b_fc2"])
    return (w_ih_enc, w_hh_enc, b_enc, w_dec, b_dec, w_fc, b_fc, w_fc2, b_fc2)


@partial(jax.jit, static_argnames=("out_steps",))
def glob_lstm_de_forward(pose, params, out_steps):
    """pose: (B, S, 15) float32  ->  (B, out_steps, 2) float32."""
    B, S, F = pose.shape
    assert F == F_IN
    pose_seq = jnp.transpose(pose, (1, 0, 2))                            # (S, B, F)
    pose_pad = jnp.zeros((S, B, F_PAD), jnp.float32).at[:, :, :F_IN].set(pose_seq)
    pose_2d = pose_pad.reshape(S * B, F_PAD)                             # time-major

    padded = _pad_params(params)

    kernel = partial(_glob_lstm_de_kernel, S, B, out_steps)
    vmem = pl.BlockSpec(memory_space=pltpu.MemorySpace.VMEM)
    out_pad = pl.pallas_call(
        kernel,
        out_shape=jax.ShapeDtypeStruct((out_steps * B, OUT_PAD), jnp.float32),
        in_specs=[vmem] * 10,
        out_specs=vmem,
        scratch_shapes=[
            pltpu.VMEM((S * B, G), jnp.float32),             # hoisted encoder proj
            pltpu.VMEM((out_steps * B, F_PAD), jnp.float32), # fc_DE outputs
        ],
        compiler_params=pltpu.CompilerParams(vmem_limit_bytes=32 << 20),
    )(pose_2d, *padded)
    out = out_pad[:, :OUT2]                                              # drop pad lanes
    return jnp.transpose(out.reshape(out_steps, B, OUT2), (1, 0, 2))     # (B, T, 2)


# ---------------------------------------------------------------------------
# Pure-JAX reference of the PyTorch forward semantics (unpadded math)
# ---------------------------------------------------------------------------
def _lstm_step(x, h, c, w_ih, w_hh, b):
    """One PyTorch-semantics LSTM(Cell) step.  Gate order: i, f, g, o."""
    gates = jnp.dot(x, w_ih) + jnp.dot(h, w_hh) + b
    i = jax.nn.sigmoid(gates[:, 0 * H:1 * H])
    f = jax.nn.sigmoid(gates[:, 1 * H:2 * H])
    g = jnp.tanh(gates[:, 2 * H:3 * H])
    o = jax.nn.sigmoid(gates[:, 3 * H:4 * H])
    c_new = f * c + i * g
    h_new = o * jnp.tanh(c_new)
    return h_new, c_new


def reference_forward(pose, params, out_steps):
    B, S, _ = pose.shape
    h = jnp.zeros((B, H), jnp.float32)
    c = jnp.zeros((B, H), jnp.float32)
    for t in range(S):
        h, c = _lstm_step(pose[:, t, :], h, c,
                          params["w_ih_enc"], params["w_hh_enc"], params["b_enc"])
    inp = pose[:, -1, :]
    outs = []
    for _ in range(out_steps):
        h, c = _lstm_step(inp, h, c,
                          params["w_ih_dec"], params["w_hh_dec"], params["b_dec"])
        de_out_t = inp = jnp.dot(h, params["w_fc"]) + params["b_fc"]
        de_out = jnp.dot(de_out_t, params["w_fc2"]) + params["b_fc2"]
        outs.append(de_out[:, None, :])
    return jnp.concatenate(outs, axis=1)


def init_params(key):
    """Deterministic PyTorch-like uniform init (synthetic weights)."""
    def uni(k, shape, bound):
        return jax.random.uniform(k, shape, jnp.float32, -bound, bound)

    ks = jax.random.split(key, 16)
    kH = 1.0 / (H ** 0.5)
    kF = 1.0 / (F_IN ** 0.5)
    return {
        # nn.LSTM(15, 100): weights transposed to (in, 4H); biases b_ih + b_hh folded.
        "w_ih_enc": uni(ks[0], (F_IN, 4 * H), kH),
        "w_hh_enc": uni(ks[1], (H, 4 * H), kH),
        "b_enc":    uni(ks[2], (1, 4 * H), kH) + uni(ks[3], (1, 4 * H), kH),
        # nn.LSTMCell(15, 100)
        "w_ih_dec": uni(ks[4], (F_IN, 4 * H), kH),
        "w_hh_dec": uni(ks[5], (H, 4 * H), kH),
        "b_dec":    uni(ks[6], (1, 4 * H), kH) + uni(ks[7], (1, 4 * H), kH),
        # nn.Linear(100, 15)
        "w_fc":  uni(ks[8], (H, F_IN), kH),
        "b_fc":  uni(ks[9], (1, F_IN), kH),
        # nn.Linear(15, 2)
        "w_fc2": uni(ks[10], (F_IN, OUT2), kF),
        "b_fc2": uni(ks[11], (1, OUT2), kF),
    }


if __name__ == "__main__":
    key = jax.random.PRNGKey(0)
    k_params, k_pose = jax.random.split(key)

    B, S, T = 2, 8, 8          # batch, encoder seq len, decoder steps (output // skip)
    params = init_params(k_params)
    pose = jax.random.normal(k_pose, (B, S, F_IN), jnp.float32)

    out = glob_lstm_de_forward(pose, params, T)
    out = jax.block_until_ready(out)

    ref = reference_forward(pose, params, T)
    assert out.shape == (B, T, OUT2), out.shape
    err = float(jnp.max(jnp.abs(out - ref)))
    assert err < 1e-3, err

    print("KERNEL_OK")
</pallas_src>

<mosaic_0001>
module attributes {stable_mosaic.version = 11 : i64} {
  func.func @_glob_lstm_de_kernel(%arg0: memref<16x128xf32, #tpu.memory_space<vmem>>, %arg1: memref<128x512xf32, #tpu.memory_space<vmem>>, %arg2: memref<128x512xf32, #tpu.memory_space<vmem>>, %arg3: memref<1x512xf32, #tpu.memory_space<vmem>>, %arg4: memref<256x512xf32, #tpu.memory_space<vmem>>, %arg5: memref<1x512xf32, #tpu.memory_space<vmem>>, %arg6: memref<128x128xf32, #tpu.memory_space<vmem>>, %arg7: memref<1x128xf32, #tpu.memory_space<vmem>>, %arg8: memref<128x128xf32, #tpu.memory_space<vmem>>, %arg9: memref<1x128xf32, #tpu.memory_space<vmem>>, %arg10: memref<16x128xf32, #tpu.memory_space<vmem>>, %arg11: memref<16x512xf32, #tpu.memory_space<vmem>>, %arg12: memref<16x128xf32, #tpu.memory_space<vmem>>) attributes {dimension_semantics = [], scalar_prefetch = 0 : i64, scratch_operands = 2 : i64, tpu.core_type = #tpu.core_type<tc>} {
    %c0 = arith.constant 0 : index
    %c0_0 = arith.constant 0 : index
    %0 = vector.load %arg0[%c0, %c0_0] : memref<16x128xf32, #tpu.memory_space<vmem>>, vector<16x128xf32>
    %c0_1 = arith.constant 0 : index
    %c0_2 = arith.constant 0 : index
    %1 = vector.load %arg1[%c0_1, %c0_2] : memref<128x512xf32, #tpu.memory_space<vmem>>, vector<128x512xf32>
    %cst = arith.constant dense<0.000000e+00> : vector<16x512xf32>
    %2 = tpu.matmul %0, %1, %cst {dimension_numbers = #tpu.dot_dimension_numbers<[1], [0], [0], [1], [0, 0, 1, 1], [], []>} : vector<16x128xf32>, vector<128x512xf32>, vector<16x512xf32> -> vector<16x512xf32>
    %c0_3 = arith.constant 0 : index
    %c0_4 = arith.constant 0 : index
    %3 = vector.load %arg3[%c0_3, %c0_4] : memref<1x512xf32, #tpu.memory_space<vmem>>, vector<1x512xf32>
    %4 = vector.broadcast %3 : vector<1x512xf32> to vector<16x512xf32>
    %5 = arith.addf %2, %4 : vector<16x512xf32>
    %c0_5 = arith.constant 0 : index
    %c0_6 = arith.constant 0 : index
    %6 = vector.load %arg11[%c0_5, %c0_6] : memref<16x512xf32, #tpu.memory_space<vmem>>, vector<16x512xf32>
    tpu.vector_store %arg11[%c0_5, %c0_6], %5 {strides = array<i32>} : memref<16x512xf32, #tpu.memory_space<vmem>>, vector<16x512xf32>,
    %c0_7 = arith.constant 0 : index
    %c0_8 = arith.constant 0 : index
    %7 = vector.load %arg2[%c0_7, %c0_8] : memref<128x512xf32, #tpu.memory_space<vmem>>, vector<128x512xf32>
    %cst_9 = arith.constant 0.000000e+00 : f32
    %8 = vector.broadcast %cst_9 : f32 to vector<2x128xf32>
    %cst_10 = arith.constant 0.000000e+00 : f32
    %9 = vector.broadcast %cst_10 : f32 to vector<2x128xf32>
    %c0_i32 = arith.constant 0 : i32
    %c2_i32 = arith.constant 2 : i32
    %10 = arith.muli %c0_i32, %c2_i32 : i32
    %11 = arith.index_cast %10 : i32 to index
    %c0_11 = arith.constant 0 : index
    %12 = vector.load %arg11[%11, %c0_11] : memref<16x512xf32, #tpu.memory_space<vmem>>, vector<2x512xf32>
    %cst_12 = arith.constant dense<0.000000e+00> : vector<2x512xf32>
    %13 = tpu.matmul %8, %7, %cst_12 {dimension_numbers = #tpu.dot_dimension_numbers<[1], [0], [0], [1], [0, 0, 1, 1], [], []>} : vector<2x128xf32>, vector<128x512xf32>, vector<2x512xf32> -> vector<2x512xf32>
    %14 = arith.addf %12, %13 : vector<2x512xf32>
    %15 = vector.extract_strided_slice %14 {offsets = [0, 0], sizes = [2, 128], strides = [1, 1]} : vector<2x512xf32> to vector<2x128xf32>
    %16 = arith.negf %15 : vector<2x128xf32>
    %17 = math.exp %16 : vector<2x128xf32>
    %cst_13 = arith.constant 1.000000e+00 : f32
    %18 = vector.broadcast %cst_13 : f32 to vector<2x128xf32>
    %19 = arith.addf %18, %17 : vector<2x128xf32>
    %20 = arith.divf %18, %19 : vector<2x128xf32>
    %21 = vector.extract_strided_slice %14 {offsets = [0, 128], sizes = [2, 128], strides = [1, 1]} : vector<2x512xf32> to vector<2x128xf32>
    %22 = arith.negf %21 : vector<2x128xf32>
    %23 = math.exp %22 : vector<2x128xf32>
    %cst_14 = arith.constant 1.000000e+00 : f32
    %24 = vector.broadcast %cst_14 : f32 to vector<2x128xf32>
    %25 = arith.addf %24, %23 : vector<2x128xf32>
    %26 = arith.divf %24, %25 : vector<2x128xf32>
    %27 = vector.extract_strided_slice %14 {offsets = [0, 256], sizes = [2, 128], strides = [1, 1]} : vector<2x512xf32> to vector<2x128xf32>
    %28 = math.tanh %27 : vector<2x128xf32>
    %29 = vector.extract_strided_slice %14 {offsets = [0, 384], sizes = [2, 128], strides = [1, 1]} : vector<2x512xf32> to vector<2x128xf32>
    %30 = arith.negf %29 : vector<2x128xf32>
    %31 = math.exp %30 : vector<2x128xf32>
    %cst_15 = arith.constant 1.000000e+00 : f32
    %32 = vector.broadcast %cst_15 : f32 to vector<2x128xf32>
    %33 = arith.addf %32, %31 : vector<2x128xf32>
    %34 = arith.divf %32, %33 : vector<2x128xf32>
    %35 = arith.mulf %26, %9 : vector<2x128xf32>
    %36 = arith.mulf %20, %28 : vector<2x128xf32>
    %37 = arith.addf %35, %36 : vector<2x128xf32>
    %38 = math.tanh %37 : vector<2x128xf32>
    %39 = arith.mulf %34, %38 : vector<2x128xf32>
    %c1_i32 = arith.constant 1 : i32
    %c2_i32_16 = arith.constant 2 : i32
    %40 = arith.muli %c1_i32, %c2_i32_16 : i32
    %41 = arith.index_cast %40 : i32 to index
    %c0_17 = arith.constant 0 : index
    %42 = vector.load %arg11[%41, %c0_17] : memref<16x512xf32, #tpu.memory_space<vmem>>, vector<2x512xf32>
    %cst_18 = arith.constant dense<0.000000e+00> : vector<2x512xf32>
    %43 = tpu.matmul %39, %7, %cst_18 {dimension_numbers = #tpu.dot_dimension_numbers<[1], [0], [0], [1], [0, 0, 1, 1], [], []>} : vector<2x128xf32>, vector<128x512xf32>, vector<2x512xf32> -> vector<2x512xf32>
    %44 = arith.addf %42, %43 : vector<2x512xf32>
    %45 = vector.extract_strided_slice %44 {offsets = [0, 0], sizes = [2, 128], strides = [1, 1]} : vector<2x512xf32> to vector<2x128xf32>
    %46 = arith.negf %45 : vector<2x128xf32>
    %47 = math.exp %46 : vector<2x128xf32>
    %cst_19 = arith.constant 1.000000e+00 : f32
    %48 = vector.broadcast %cst_19 : f32 to vector<2x128xf32>
    %49 = arith.addf %48, %47 : vector<2x128xf32>
    %50 = arith.divf %48, %49 : vector<2x128xf32>
    %51 = vector.extract_strided_slice %44 {offsets = [0, 128], sizes = [2, 128], strides = [1, 1]} : vector<2x512xf32> to vector<2x128xf32>
    %52 = arith.negf %51 : vector<2x128xf32>
    %53 = math.exp %52 : vector<2x128xf32>
    %cst_20 = arith.constant 1.000000e+00 : f32
    %54 = vector.broadcast %cst_20 : f32 to vector<2x128xf32>
    %55 = arith.addf %54, %53 : vector<2x128xf32>
    %56 = arith.divf %54, %55 : vector<2x128xf32>
    %57 = vector.extract_strided_slice %44 {offsets = [0, 256], sizes = [2, 128], strides = [1, 1]} : vector<2x512xf32> to vector<2x128xf32>
    %58 = math.tanh %57 : vector<2x128xf32>
    %59 = vector.extract_strided_slice %44 {offsets = [0, 384], sizes = [2, 128], strides = [1, 1]} : vector<2x512xf32> to vector<2x128xf32>
    %60 = arith.negf %59 : vector<2x128xf32>
    %61 = math.exp %60 : vector<2x128xf32>
    %cst_21 = arith.constant 1.000000e+00 : f32
    %62 = vector.broadcast %cst_21 : f32 to vector<2x128xf32>
    %63 = arith.addf %62, %61 : vector<2x128xf32>
    %64 = arith.divf %62, %63 : vector<2x128xf32>
    %65 = arith.mulf %56, %37 : vector<2x128xf32>
    %66 = arith.mulf %50, %58 : vector<2x128xf32>
    %67 = arith.addf %65, %66 : vector<2x128xf32>
    %68 = math.tanh %67 : vector<2x128xf32>
    %69 = arith.mulf %64, %68 : vector<2x128xf32>
    %c2_i32_22 = arith.constant 2 : i32
    %c2_i32_23 = arith.constant 2 : i32
    %70 = arith.muli %c2_i32_22, %c2_i32_23 : i32
    %71 = arith.index_cast %70 : i32 to index
    %c0_24 = arith.constant 0 : index
    %72 = vector.load %arg11[%71, %c0_24] : memref<16x512xf32, #tpu.memory_space<vmem>>, vector<2x512xf32>
    %cst_25 = arith.constant dense<0.000000e+00> : vector<2x512xf32>
    %73 = tpu.matmul %69, %7, %cst_25 {dimension_numbers = #tpu.dot_dimension_numbers<[1], [0], [0], [1], [0, 0, 1, 1], [], []>} : vector<2x128xf32>, vector<128x512xf32>, vector<2x512xf32> -> vector<2x512xf32>
    %74 = arith.addf %72, %73 : vector<2x512xf32>
    %75 = vector.extract_strided_slice %74 {offsets = [0, 0], sizes = [2, 128], strides = [1, 1]} : vector<2x512xf32> to vector<2x128xf32>
    %76 = arith.negf %75 : vector<2x128xf32>
    %77 = math.exp %76 : vector<2x128xf32>
    %cst_26 = arith.constant 1.000000e+00 : f32
    %78 = vector.broadcast %cst_26 : f32 to vector<2x128xf32>
    %79 = arith.addf %78, %77 : vector<2x128xf32>
    %80 = arith.divf %78, %79 : vector<2x128xf32>
    %81 = vector.extract_strided_slice %74 {offsets = [0, 128], sizes = [2, 128], strides = [1, 1]} : vector<2x512xf32> to vector<2x128xf32>
    %82 = arith.negf %81 : vector<2x128xf32>
    %83 = math.exp %82 : vector<2x128xf32>
    %cst_27 = arith.constant 1.000000e+00 : f32
    %84 = vector.broadcast %cst_27 : f32 to vector<2x128xf32>
    %85 = arith.addf %84, %83 : vector<2x128xf32>
    %86 = arith.divf %84, %85 : vector<2x128xf32>
    %87 = vector.extract_strided_slice %74 {offsets = [0, 256], sizes = [2, 128], strides = [1, 1]} : vector<2x512xf32> to vector<2x128xf32>
    %88 = math.tanh %87 : vector<2x128xf32>
    %89 = vector.extract_strided_slice %74 {offsets = [0, 384], sizes = [2, 128], strides = [1, 1]} : vector<2x512xf32> to vector<2x128xf32>
    %90 = arith.negf %89 : vector<2x128xf32>
    %91 = math.exp %90 : vector<2x128xf32>
    %cst_28 = arith.constant 1.000000e+00 : f32
    %92 = vector.broadcast %cst_28 : f32 to vector<2x128xf32>
    %93 = arith.addf %92, %91 : vector<2x128xf32>
    %94 = arith.divf %92, %93 : vector<2x128xf32>
    %95 = arith.mulf %86, %67 : vector<2x128xf32>
    %96 = arith.mulf %80, %88 : vector<2x128xf32>
    %97 = arith.addf %95, %96 : vector<2x128xf32>
    %98 = math.tanh %97 : vector<2x128xf32>
    %99 = arith.mulf %94, %98 : vector<2x128xf32>
    %c3_i32 = arith.constant 3 : i32
    %c2_i32_29 = arith.constant 2 : i32
    %100 = arith.muli %c3_i32, %c2_i32_29 : i32
    %101 = arith.index_cast %100 : i32 to index
    %c0_30 = arith.constant 0 : index
    %102 = vector.load %arg11[%101, %c0_30] : memref<16x512xf32, #tpu.memory_space<vmem>>, vector<2x512xf32>
    %cst_31 = arith.constant dense<0.000000e+00> : vector<2x512xf32>
    %103 = tpu.matmul %99, %7, %cst_31 {dimension_numbers = #tpu.dot_dimension_numbers<[1], [0], [0], [1], [0, 0, 1, 1], [], []>} : vector<2x128xf32>, vector<128x512xf32>, vector<2x512xf32> -> vector<2x512xf32>
    %104 = arith.addf %102, %103 : vector<2x512xf32>
    %105 = vector.extract_strided_slice %104 {offsets = [0, 0], sizes = [2, 128], strides = [1, 1]} : vector<2x512xf32> to vector<2x128xf32>
    %106 = arith.negf %105 : vector<2x128xf32>
    %107 = math.exp %106 : vector<2x128xf32>
    %cst_32 = arith.constant 1.000000e+00 : f32
    %108 = vector.broadcast %cst_32 : f32 to vector<2x128xf32>
    %109 = arith.addf %108, %107 : vector<2x128xf32>
    %110 = arith.divf %108, %109 : vector<2x128xf32>
    %111 = vector.extract_strided_slice %104 {offsets = [0, 128], sizes = [2, 128], strides = [1, 1]} : vector<2x512xf32> to vector<2x128xf32>
    %112 = arith.negf %111 : vector<2x128xf32>
    %113 = math.exp %112 : vector<2x128xf32>
    %cst_33 = arith.constant 1.000000e+00 : f32
    %114 = vector.broadcast %cst_33 : f32 to vector<2x128xf32>
    %115 = arith.addf %114, %113 : vector<2x128xf32>
    %116 = arith.divf %114, %115 : vector<2x128xf32>
    %117 = vector.extract_strided_slice %104 {offsets = [0, 256], sizes = [2, 128], strides = [1, 1]} : vector<2x512xf32> to vector<2x128xf32>
    %118 = math.tanh %117 : vector<2x128xf32>
    %119 = vector.extract_strided_slice %104 {offsets = [0, 384], sizes = [2, 128], strides = [1, 1]} : vector<2x512xf32> to vector<2x128xf32>
    %120 = arith.negf %119 : vector<2x128xf32>
    %121 = math.exp %120 : vector<2x128xf32>
    %cst_34 = arith.constant 1.000000e+00 : f32
    %122 = vector.broadcast %cst_34 : f32 to vector<2x128xf32>
    %123 = arith.addf %122, %121 : vector<2x128xf32>
    %124 = arith.divf %122, %123 : vector<2x128xf32>
    %125 = arith.mulf %116, %97 : vector<2x128xf32>
    %126 = arith.mulf %110, %118 : vector<2x128xf32>
    %127 = arith.addf %125, %126 : vector<2x128xf32>
    %128 = math.tanh %127 : vector<2x128xf32>
    %129 = arith.mulf %124, %128 : vector<2x128xf32>
    %c4_i32 = arith.constant 4 : i32
    %c2_i32_35 = arith.constant 2 : i32
    %130 = arith.muli %c4_i32, %c2_i32_35 : i32
    %131 = arith.index_cast %130 : i32 to index
    %c0_36 = arith.constant 0 : index
    %132 = vector.load %arg11[%131, %c0_36] : memref<16x512xf32, #tpu.memory_space<vmem>>, vector<2x512xf32>
    %cst_37 = arith.constant dense<0.000000e+00> : vector<2x512xf32>
    %133 = tpu.matmul %129, %7, %cst_37 {dimension_numbers = #tpu.dot_dimension_numbers<[1], [0], [0], [1], [0, 0, 1, 1], [], []>} : vector<2x128xf32>, vector<128x512xf32>, vector<2x512xf32> -> vector<2x512xf32>
    %134 = arith.addf %132, %133 : vector<2x512xf32>
    %135 = vector.extract_strided_slice %134 {offsets = [0, 0], sizes = [2, 128], strides = [1, 1]} : vector<2x512xf32> to vector<2x128xf32>
    %136 = arith.negf %135 : vector<2x128xf32>
    %137 = math.exp %136 : vector<2x128xf32>
    %cst_38 = arith.constant 1.000000e+00 : f32
    %138 = vector.broadcast %cst_38 : f32 to vector<2x128xf32>
    %139 = arith.addf %138, %137 : vector<2x128xf32>
    %140 = arith.divf %138, %139 : vector<2x128xf32>
    %141 = vector.extract_strided_slice %134 {offsets = [0, 128], sizes = [2, 128], strides = [1, 1]} : vector<2x512xf32> to vector<2x128xf32>
    %142 = arith.negf %141 : vector<2x128xf32>
    %143 = math.exp %142 : vector<2x128xf32>
    %cst_39 = arith.constant 1.000000e+00 : f32
    %144 = vector.broadcast %cst_39 : f32 to vector<2x128xf32>
    %145 = arith.addf %144, %143 : vector<2x128xf32>
    %146 = arith.divf %144, %145 : vector<2x128xf32>
    %147 = vector.extract_strided_slice %134 {offsets = [0, 256], sizes = [2, 128], strides = [1, 1]} : vector<2x512xf32> to vector<2x128xf32>
    %148 = math.tanh %147 : vector<2x128xf32>
    %149 = vector.extract_strided_slice %134 {offsets = [0, 384], sizes = [2, 128], strides = [1, 1]} : vector<2x512xf32> to vector<2x128xf32>
    %150 = arith.negf %149 : vector<2x128xf32>
    %151 = math.exp %150 : vector<2x128xf32>
    %cst_40 = arith.constant 1.000000e+00 : f32
    %152 = vector.broadcast %cst_40 : f32 to vector<2x128xf32>
    %153 = arith.addf %152, %151 : vector<2x128xf32>
    %154 = arith.divf %152, %153 : vector<2x128xf32>
    %155 = arith.mulf %146, %127 : vector<2x128xf32>
    %156 = arith.mulf %140, %148 : vector<2x128xf32>
    %157 = arith.addf %155, %156 : vector<2x128xf32>
    %158 = math.tanh %157 : vector<2x128xf32>
    %159 = arith.mulf %154, %158 : vector<2x128xf32>
    %c5_i32 = arith.constant 5 : i32
    %c2_i32_41 = arith.constant 2 : i32
    %160 = arith.muli %c5_i32, %c2_i32_41 : i32
    %161 = arith.index_cast %160 : i32 to index
    %c0_42 = arith.constant 0 : index
    %162 = vector.load %arg11[%161, %c0_42] : memref<16x512xf32, #tpu.memory_space<vmem>>, vector<2x512xf32>
    %cst_43 = arith.constant dense<0.000000e+00> : vector<2x512xf32>
    %163 = tpu.matmul %159, %7, %cst_43 {dimension_numbers = #tpu.dot_dimension_numbers<[1], [0], [0], [1], [0, 0, 1, 1], [], []>} : vector<2x128xf32>, vector<128x512xf32>, vector<2x512xf32> -> vector<2x512xf32>
    %164 = arith.addf %162, %163 : vector<2x512xf32>
    %165 = vector.extract_strided_slice %164 {offsets = [0, 0], sizes = [2, 128], strides = [1, 1]} : vector<2x512xf32> to vector<2x128xf32>
    %166 = arith.negf %165 : vector<2x128xf32>
    %167 = math.exp %166 : vector<2x128xf32>
    %cst_44 = arith.constant 1.000000e+00 : f32
    %168 = vector.broadcast %cst_44 : f32 to vector<2x128xf32>
    %169 = arith.addf %168, %167 : vector<2x128xf32>
    %170 = arith.divf %168, %169 : vector<2x128xf32>
    %171 = vector.extract_strided_slice %164 {offsets = [0, 128], sizes = [2, 128], strides = [1, 1]} : vector<2x512xf32> to vector<2x128xf32>
    %172 = arith.negf %171 : vector<2x128xf32>
    %173 = math.exp %172 : vector<2x128xf32>
    %cst_45 = arith.constant 1.000000e+00 : f32
    %174 = vector.broadcast %cst_45 : f32 to vector<2x128xf32>
    %175 = arith.addf %174, %173 : vector<2x128xf32>
    %176 = arith.divf %174, %175 : vector<2x128xf32>
    %177 = vector.extract_strided_slice %164 {offsets = [0, 256], sizes = [2, 128], strides = [1, 1]} : vector<2x512xf32> to vector<2x128xf32>
    %178 = math.tanh %177 : vector<2x128xf32>
    %179 = vector.extract_strided_slice %164 {offsets = [0, 384], sizes = [2, 128], strides = [1, 1]} : vector<2x512xf32> to vector<2x128xf32>
    %180 = arith.negf %179 : vector<2x128xf32>
    %181 = math.exp %180 : vector<2x128xf32>
    %cst_46 = arith.constant 1.000000e+00 : f32
    %182 = vector.broadcast %cst_46 : f32 to vector<2x128xf32>
    %183 = arith.addf %182, %181 : vector<2x128xf32>
    %184 = arith.divf %182, %183 : vector<2x128xf32>
    %185 = arith.mulf %176, %157 : vector<2x128xf32>
    %186 = arith.mulf %170, %178 : vector<2x128xf32>
    %187 = arith.addf %185, %186 : vector<2x128xf32>
    %188 = math.tanh %187 : vector<2x128xf32>
    %189 = arith.mulf %184, %188 : vector<2x128xf32>
    %c6_i32 = arith.constant 6 : i32
    %c2_i32_47 = arith.constant 2 : i32
    %190 = arith.muli %c6_i32, %c2_i32_47 : i32
    %191 = arith.index_cast %190 : i32 to index
    %c0_48 = arith.constant 0 : index
    %192 = vector.load %arg11[%191, %c0_48] : memref<16x512xf32, #tpu.memory_space<vmem>>, vector<2x512xf32>
    %cst_49 = arith.constant dense<0.000000e+00> : vector<2x512xf32>
    %193 = tpu.matmul %189, %7, %cst_49 {dimension_numbers = #tpu.dot_dimension_numbers<[1], [0], [0], [1], [0, 0, 1, 1], [], []>} : vector<2x128xf32>, vector<128x512xf32>, vector<2x512xf32> -> vector<2x512xf32>
    %194 = arith.addf %192, %193 : vector<2x512xf32>
    %195 = vector.extract_strided_slice %194 {offsets = [0, 0], sizes = [2, 128], strides = [1, 1]} : vector<2x512xf32> to vector<2x128xf32>
    %196 = arith.negf %195 : vector<2x128xf32>
    %197 = math.exp %196 : vector<2x128xf32>
    %cst_50 = arith.constant 1.000000e+00 : f32
    %198 = vector.broadcast %cst_50 : f32 to vector<2x128xf32>
    %199 = arith.addf %198, %197 : vector<2x128xf32>
    %200 = arith.divf %198, %199 : vector<2x128xf32>
    %201 = vector.extract_strided_slice %194 {offsets = [0, 128], sizes = [2, 128], strides = [1, 1]} : vector<2x512xf32> to vector<2x128xf32>
    %202 = arith.negf %201 : vector<2x128xf32>
    %203 = math.exp %202 : vector<2x128xf32>
    %cst_51 = arith.constant 1.000000e+00 : f32
    %204 = vector.broadcast %cst_51 : f32 to vector<2x128xf32>
    %205 = arith.addf %204, %203 : vector<2x128xf32>
    %206 = arith.divf %204, %205 : vector<2x128xf32>
    %207 = vector.extract_strided_slice %194 {offsets = [0, 256], sizes = [2, 128], strides = [1, 1]} : vector<2x512xf32> to vector<2x128xf32>
    %208 = math.tanh %207 : vector<2x128xf32>
    %209 = vector.extract_strided_slice %194 {offsets = [0, 384], sizes = [2, 128], strides = [1, 1]} : vector<2x512xf32> to vector<2x128xf32>
    %210 = arith.negf %209 : vector<2x128xf32>
    %211 = math.exp %210 : vector<2x128xf32>
    %cst_52 = arith.constant 1.000000e+00 : f32
    %212 = vector.broadcast %cst_52 : f32 to vector<2x128xf32>
    %213 = arith.addf %212, %211 : vector<2x128xf32>
    %214 = arith.divf %212, %213 : vector<2x128xf32>
    %215 = arith.mulf %206, %187 : vector<2x128xf32>
    %216 = arith.mulf %200, %208 : vector<2x128xf32>
    %217 = arith.addf %215, %216 : vector<2x128xf32>
    %218 = math.tanh %217 : vector<2x128xf32>
    %219 = arith.mulf %214, %218 : vector<2x128xf32>
    %c7_i32 = arith.constant 7 : i32
    %c2_i32_53 = arith.constant 2 : i32
    %220 = arith.muli %c7_i32, %c2_i32_53 : i32
    %221 = arith.index_cast %220 : i32 to index
    %c0_54 = arith.constant 0 : index
    %222 = vector.load %arg11[%221, %c0_54] : memref<16x512xf32, #tpu.memory_space<vmem>>, vector<2x512xf32>
    %cst_55 = arith.constant dense<0.000000e+00> : vector<2x512xf32>
    %223 = tpu.matmul %219, %7, %cst_55 {dimension_numbers = #tpu.dot_dimension_numbers<[1], [0], [0], [1], [0, 0, 1, 1], [], []>} : vector<2x128xf32>, vector<128x512xf32>, vector<2x512xf32> -> vector<2x512xf32>
    %224 = arith.addf %222, %223 : vector<2x512xf32>
    %225 = vector.extract_strided_slice %224 {offsets = [0, 0], sizes = [2, 128], strides = [1, 1]} : vector<2x512xf32> to vector<2x128xf32>
    %226 = arith.negf %225 : vector<2x128xf32>
    %227 = math.exp %226 : vector<2x128xf32>
    %cst_56 = arith.constant 1.000000e+00 : f32
    %228 = vector.broadcast %cst_56 : f32 to vector<2x128xf32>
    %229 = arith.addf %228, %227 : vector<2x128xf32>
    %230 = arith.divf %228, %229 : vector<2x128xf32>
    %231 = vector.extract_strided_slice %224 {offsets = [0, 128], sizes = [2, 128], strides = [1, 1]} : vector<2x512xf32> to vector<2x128xf32>
    %232 = arith.negf %231 : vector<2x128xf32>
    %233 = math.exp %232 : vector<2x128xf32>
    %cst_57 = arith.constant 1.000000e+00 : f32
    %234 = vector.broadcast %cst_57 : f32 to vector<2x128xf32>
    %235 = arith.addf %234, %233 : vector<2x128xf32>
    %236 = arith.divf %234, %235 : vector<2x128xf32>
    %237 = vector.extract_strided_slice %224 {offsets = [0, 256], sizes = [2, 128], strides = [1, 1]} : vector<2x512xf32> to vector<2x128xf32>
    %238 = math.tanh %237 : vector<2x128xf32>
    %239 = vector.extract_strided_slice %224 {offsets = [0, 384], sizes = [2, 128], strides = [1, 1]} : vector<2x512xf32> to vector<2x128xf32>
    %240 = arith.negf %239 : vector<2x128xf32>
    %241 = math.exp %240 : vector<2x128xf32>
    %cst_58 = arith.constant 1.000000e+00 : f32
    %242 = vector.broadcast %cst_58 : f32 to vector<2x128xf32>
    %243 = arith.addf %242, %241 : vector<2x128xf32>
    %244 = arith.divf %242, %243 : vector<2x128xf32>
    %245 = arith.mulf %236, %217 : vector<2x128xf32>
    %246 = arith.mulf %230, %238 : vector<2x128xf32>
    %247 = arith.addf %245, %246 : vector<2x128xf32>
    %248 = math.tanh %247 : vector<2x128xf32>
    %249 = arith.mulf %244, %248 : vector<2x128xf32>
    %c8_i32 = arith.constant 8 : i32
    %c0_59 = arith.constant 0 : index
    %c0_60 = arith.constant 0 : index
    %250 = vector.load %arg4[%c0_59, %c0_60] : memref<256x512xf32, #tpu.memory_space<vmem>>, vector<256x512xf32>
    %c0_61 = arith.constant 0 : index
    %c0_62 = arith.constant 0 : index
    %251 = vector.load %arg5[%c0_61, %c0_62] : memref<1x512xf32, #tpu.memory_space<vmem>>, vector<1x512xf32>
    %c0_63 = arith.constant 0 : index
    %c0_64 = arith.constant 0 : index
    %252 = vector.load %arg6[%c0_63, %c0_64] : memref<128x128xf32, #tpu.memory_space<vmem>>, vector<128x128xf32>
    %c0_65 = arith.constant 0 : index
    %c0_66 = arith.constant 0 : index
    %253 = vector.load %arg7[%c0_65, %c0_66] : memref<1x128xf32, #tpu.memory_space<vmem>>, vector<1x128xf32>
    %c14 = arith.constant 14 : index
    %c0_67 = arith.constant 0 : index
    %254 = vector.load %arg0[%c14, %c0_67] : memref<16x128xf32, #tpu.memory_space<vmem>>, vector<2x128xf32>
    %c0_i32_68 = arith.constant 0 : i32
    %255 = tpu.concatenate %254, %249 in 1 : vector<2x128xf32>, vector<2x128xf32> -> vector<2x256xf32>
    %cst_69 = arith.constant dense<0.000000e+00> : vector<2x512xf32>
    %256 = tpu.matmul %255, %250, %cst_69 {dimension_numbers = #tpu.dot_dimension_numbers<[1], [0], [0], [1], [0, 0, 1, 1], [], []>} : vector<2x256xf32>, vector<256x512xf32>, vector<2x512xf32> -> vector<2x512xf32>
    %257 = vector.broadcast %251 : vector<1x512xf32> to vector<2x512xf32>
    %258 = arith.addf %256, %257 : vector<2x512xf32>
    %259 = vector.extract_strided_slice %258 {offsets = [0, 0], sizes = [2, 128], strides = [1, 1]} : vector<2x512xf32> to vector<2x128xf32>
    %260 = arith.negf %259 : vector<2x128xf32>
    %261 = math.exp %260 : vector<2x128xf32>
    %cst_70 = arith.constant 1.000000e+00 : f32
    %262 = vector.broadcast %cst_70 : f32 to vector<2x128xf32>
    %263 = arith.addf %262, %261 : vector<2x128xf32>
    %264 = arith.divf %262, %263 : vector<2x128xf32>
    %265 = vector.extract_strided_slice %258 {offsets = [0, 128], sizes = [2, 128], strides = [1, 1]} : vector<2x512xf32> to vector<2x128xf32>
    %266 = arith.negf %265 : vector<2x128xf32>
    %267 = math.exp %266 : vector<2x128xf32>
    %cst_71 = arith.constant 1.000000e+00 : f32
    %268 = vector.broadcast %cst_71 : f32 to vector<2x128xf32>
    %269 = arith.addf %268, %267 : vector<2x128xf32>
    %270 = arith.divf %268, %269 : vector<2x128xf32>
    %271 = vector.extract_strided_slice %258 {offsets = [0, 256], sizes = [2, 128], strides = [1, 1]} : vector<2x512xf32> to vector<2x128xf32>
    %272 = math.tanh %271 : vector<2x128xf32>
    %273 = vector.extract_strided_slice %258 {offsets = [0, 384], sizes = [2, 128], strides = [1, 1]} : vector<2x512xf32> to vector<2x128xf32>
    %274 = arith.negf %273 : vector<2x128xf32>
    %275 = math.exp %274 : vector<2x128xf32>
    %cst_72 = arith.constant 1.000000e+00 : f32
    %276 = vector.broadcast %cst_72 : f32 to vector<2x128xf32>
    %277 = arith.addf %276, %275 : vector<2x128xf32>
    %278 = arith.divf %276, %277 : vector<2x128xf32>
    %279 = arith.mulf %270, %247 : vector<2x128xf32>
    %280 = arith.mulf %264, %272 : vector<2x128xf32>
    %281 = arith.addf %279, %280 : vector<2x128xf32>
    %282 = math.tanh %281 : vector<2x128xf32>
    %283 = arith.mulf %278, %282 : vector<2x128xf32>
    %cst_73 = arith.constant dense<0.000000e+00> : vector<2x128xf32>
    %284 = tpu.matmul %283, %252, %cst_73 {dimension_numbers = #tpu.dot_dimension_numbers<[1], [0], [0], [1], [0, 0, 1, 1], [], []>} : vector<2x128xf32>, vector<128x128xf32>, vector<2x128xf32> -> vector<2x128xf32>
    %285 = vector.broadcast %253 : vector<1x128xf32> to vector<2x128xf32>
    %286 = arith.addf %284, %285 : vector<2x128xf32>
    %c2_i32_74 = arith.constant 2 : i32
    %287 = arith.muli %c0_i32_68, %c2_i32_74 : i32
    %288 = arith.index_cast %287 : i32 to index
    %c0_75 = arith.constant 0 : index
    %289 = vector.load %arg12[%288, %c0_75] : memref<16x128xf32, #tpu.memory_space<vmem>>, vector<2x128xf32>
    tpu.vector_store %arg12[%288, %c0_75], %286 {strides = array<i32>} : memref<16x128xf32, #tpu.memory_space<vmem>>, vector<2x128xf32>,
    %c1_i32_76 = arith.constant 1 : i32
    %290 = tpu.concatenate %286, %283 in 1 : vector<2x128xf32>, vector<2x128xf32> -> vector<2x256xf32>
    %cst_77 = arith.constant dense<0.000000e+00> : vector<2x512xf32>
    %291 = tpu.matmul %290, %250, %cst_77 {dimension_numbers = #tpu.dot_dimension_numbers<[1], [0], [0], [1], [0, 0, 1, 1], [], []>} : vector<2x256xf32>, vector<256x512xf32>, vector<2x512xf32> -> vector<2x512xf32>
    %292 = vector.broadcast %251 : vector<1x512xf32> to vector<2x512xf32>
    %293 = arith.addf %291, %292 : vector<2x512xf32>
    %294 = vector.extract_strided_slice %293 {offsets = [0, 0], sizes = [2, 128], strides = [1, 1]} : vector<2x512xf32> to vector<2x128xf32>
    %295 = arith.negf %294 : vector<2x128xf32>
    %296 = math.exp %295 : vector<2x128xf32>
    %cst_78 = arith.constant 1.000000e+00 : f32
    %297 = vector.broadcast %cst_78 : f32 to vector<2x128xf32>
    %298 = arith.addf %297, %296 : vector<2x128xf32>
    %299 = arith.divf %297, %298 : vector<2x128xf32>
    %300 = vector.extract_strided_slice %293 {offsets = [0, 128], sizes = [2, 128], strides = [1, 1]} : vector<2x512xf32> to vector<2x128xf32>
    %301 = arith.negf %300 : vector<2x128xf32>
    %302 = math.exp %301 : vector<2x128xf32>
    %cst_79 = arith.constant 1.000000e+00 : f32
    %303 = vector.broadcast %cst_79 : f32 to vector<2x128xf32>
    %304 = arith.addf %303, %302 : vector<2x128xf32>
    %305 = arith.divf %303, %304 : vector<2x128xf32>
    %306 = vector.extract_strided_slice %293 {offsets = [0, 256], sizes = [2, 128], strides = [1, 1]} : vector<2x512xf32> to vector<2x128xf32>
    %307 = math.tanh %306 : vector<2x128xf32>
    %308 = vector.extract_strided_slice %293 {offsets = [0, 384], sizes = [2, 128], strides = [1, 1]} : vector<2x512xf32> to vector<2x128xf32>
    %309 = arith.negf %308 : vector<2x128xf32>
    %310 = math.exp %309 : vector<2x128xf32>
    %cst_80 = arith.constant 1.000000e+00 : f32
    %311 = vector.broadcast %cst_80 : f32 to vector<2x128xf32>
    %312 = arith.addf %311, %310 : vector<2x128xf32>
    %313 = arith.divf %311, %312 : vector<2x128xf32>
    %314 = arith.mulf %305, %281 : vector<2x128xf32>
    %315 = arith.mulf %299, %307 : vector<2x128xf32>
    %316 = arith.addf %314, %315 : vector<2x128xf32>
    %317 = math.tanh %316 : vector<2x128xf32>
    %318 = arith.mulf %313, %317 : vector<2x128xf32>
    %cst_81 = arith.constant dense<0.000000e+00> : vector<2x128xf32>
    %319 = tpu.matmul %318, %252, %cst_81 {dimension_numbers = #tpu.dot_dimension_numbers<[1], [0], [0], [1], [0, 0, 1, 1], [], []>} : vector<2x128xf32>, vector<128x128xf32>, vector<2x128xf32> -> vector<2x128xf32>
    %320 = vector.broadcast %253 : vector<1x128xf32> to vector<2x128xf32>
    %321 = arith.addf %319, %320 : vector<2x128xf32>
    %c2_i32_82 = arith.constant 2 : i32
    %322 = arith.muli %c1_i32_76, %c2_i32_82 : i32
    %323 = arith.index_cast %322 : i32 to index
    %c0_83 = arith.constant 0 : index
    %324 = vector.load %arg12[%323, %c0_83] : memref<16x128xf32, #tpu.memory_space<vmem>>, vector<2x128xf32>
    tpu.vector_store %arg12[%323, %c0_83], %321 {strides = array<i32>} : memref<16x128xf32, #tpu.memory_space<vmem>>, vector<2x128xf32>,
    %c2_i32_84 = arith.constant 2 : i32
    %325 = tpu.concatenate %321, %318 in 1 : vector<2x128xf32>, vector<2x128xf32> -> vector<2x256xf32>
    %cst_85 = arith.constant dense<0.000000e+00> : vector<2x512xf32>
    %326 = tpu.matmul %325, %250, %cst_85 {dimension_numbers = #tpu.dot_dimension_numbers<[1], [0], [0], [1], [0, 0, 1, 1], [], []>} : vector<2x256xf32>, vector<256x512xf32>, vector<2x512xf32> -> vector<2x512xf32>
    %327 = vector.broadcast %251 : vector<1x512xf32> to vector<2x512xf32>
    %328 = arith.addf %326, %327 : vector<2x512xf32>
    %329 = vector.extract_strided_slice %328 {offsets = [0, 0], sizes = [2, 128], strides = [1, 1]} : vector<2x512xf32> to vector<2x128xf32>
    %330 = arith.negf %329 : vector<2x128xf32>
    %331 = math.exp %330 : vector<2x128xf32>
    %cst_86 = arith.constant 1.000000e+00 : f32
    %332 = vector.broadcast %cst_86 : f32 to vector<2x128xf32>
    %333 = arith.addf %332, %331 : vector<2x128xf32>
    %334 = arith.divf %332, %333 : vector<2x128xf32>
    %335 = vector.extract_strided_slice %328 {offsets = [0, 128], sizes = [2, 128], strides = [1, 1]} : vector<2x512xf32> to vector<2x128xf32>
    %336 = arith.negf %335 : vector<2x128xf32>
    %337 = math.exp %336 : vector<2x128xf32>
    %cst_87 = arith.constant 1.000000e+00 : f32
    %338 = vector.broadcast %cst_87 : f32 to vector<2x128xf32>
    %339 = arith.addf %338, %337 : vector<2x128xf32>
    %340 = arith.divf %338, %339 : vector<2x128xf32>
    %341 = vector.extract_strided_slice %328 {offsets = [0, 256], sizes = [2, 128], strides = [1, 1]} : vector<2x512xf32> to vector<2x128xf32>
    %342 = math.tanh %341 : vector<2x128xf32>
    %343 = vector.extract_strided_slice %328 {offsets = [0, 384], sizes = [2, 128], strides = [1, 1]} : vector<2x512xf32> to vector<2x128xf32>
    %344 = arith.negf %343 : vector<2x128xf32>
    %345 = math.exp %344 : vector<2x128xf32>
    %cst_88 = arith.constant 1.000000e+00 : f32
    %346 = vector.broadcast %cst_88 : f32 to vector<2x128xf32>
    %347 = arith.addf %346, %345 : vector<2x128xf32>
    %348 = arith.divf %346, %347 : vector<2x128xf32>
    %349 = arith.mulf %340, %316 : vector<2x128xf32>
    %350 = arith.mulf %334, %342 : vector<2x128xf32>
    %351 = arith.addf %349, %350 : vector<2x128xf32>
    %352 = math.tanh %351 : vector<2x128xf32>
    %353 = arith.mulf %348, %352 : vector<2x128xf32>
    %cst_89 = arith.constant dense<0.000000e+00> : vector<2x128xf32>
    %354 = tpu.matmul %353, %252, %cst_89 {dimension_numbers = #tpu.dot_dimension_numbers<[1], [0], [0], [1], [0, 0, 1, 1], [], []>} : vector<2x128xf32>, vector<128x128xf32>, vector<2x128xf32> -> vector<2x128xf32>
    %355 = vector.broadcast %253 : vector<1x128xf32> to vector<2x128xf32>
    %356 = arith.addf %354, %355 : vector<2x128xf32>
    %c2_i32_90 = arith.constant 2 : i32
    %357 = arith.muli %c2_i32_84, %c2_i32_90 : i32
    %358 = arith.index_cast %357 : i32 to index
    %c0_91 = arith.constant 0 : index
    %359 = vector.load %arg12[%358, %c0_91] : memref<16x128xf32, #tpu.memory_space<vmem>>, vector<2x128xf32>
    tpu.vector_store %arg12[%358, %c0_91], %356 {strides = array<i32>} : memref<16x128xf32, #tpu.memory_space<vmem>>, vector<2x128xf32>,
    %c3_i32_92 = arith.constant 3 : i32
    %360 = tpu.concatenate %356, %353 in 1 : vector<2x128xf32>, vector<2x128xf32> -> vector<2x256xf32>
    %cst_93 = arith.constant dense<0.000000e+00> : vector<2x512xf32>
    %361 = tpu.matmul %360, %250, %cst_93 {dimension_numbers = #tpu.dot_dimension_numbers<[1], [0], [0], [1], [0, 0, 1, 1], [], []>} : vector<2x256xf32>, vector<256x512xf32>, vector<2x512xf32> -> vector<2x512xf32>
    %362 = vector.broadcast %251 : vector<1x512xf32> to vector<2x512xf32>
    %363 = arith.addf %361, %362 : vector<2x512xf32>
    %364 = vector.extract_strided_slice %363 {offsets = [0, 0], sizes = [2, 128], strides = [1, 1]} : vector<2x512xf32> to vector<2x128xf32>
    %365 = arith.negf %364 : vector<2x128xf32>
    %366 = math.exp %365 : vector<2x128xf32>
    %cst_94 = arith.constant 1.000000e+00 : f32
    %367 = vector.broadcast %cst_94 : f32 to vector<2x128xf32>
    %368 = arith.addf %367, %366 : vector<2x128xf32>
    %369 = arith.divf %367, %368 : vector<2x128xf32>
    %370 = vector.extract_strided_slice %363 {offsets = [0, 128], sizes = [2, 128], strides = [1, 1]} : vector<2x512xf32> to vector<2x128xf32>
    %371 = arith.negf %370 : vector<2x128xf32>
    %372 = math.exp %371 : vector<2x128xf32>
    %cst_95 = arith.constant 1.000000e+00 : f32
    %373 = vector.broadcast %cst_95 : f32 to vector<2x128xf32>
    %374 = arith.addf %373, %372 : vector<2x128xf32>
    %375 = arith.divf %373, %374 : vector<2x128xf32>
    %376 = vector.extract_strided_slice %363 {offsets = [0, 256], sizes = [2, 128], strides = [1, 1]} : vector<2x512xf32> to vector<2x128xf32>
    %377 = math.tanh %376 : vector<2x128xf32>
    %378 = vector.extract_strided_slice %363 {offsets = [0, 384], sizes = [2, 128], strides = [1, 1]} : vector<2x512xf32> to vector<2x128xf32>
    %379 = arith.negf %378 : vector<2x128xf32>
    %380 = math.exp %379 : vector<2x128xf32>
    %cst_96 = arith.constant 1.000000e+00 : f32
    %381 = vector.broadcast %cst_96 : f32 to vector<2x128xf32>
    %382 = arith.addf %381, %380 : vector<2x128xf32>
    %383 = arith.divf %381, %382 : vector<2x128xf32>
    %384 = arith.mulf %375, %351 : vector<2x128xf32>
    %385 = arith.mulf %369, %377 : vector<2x128xf32>
    %386 = arith.addf %384, %385 : vector<2x128xf32>
    %387 = math.tanh %386 : vector<2x128xf32>
    %388 = arith.mulf %383, %387 : vector<2x128xf32>
    %cst_97 = arith.constant dense<0.000000e+00> : vector<2x128xf32>
    %389 = tpu.matmul %388, %252, %cst_97 {dimension_numbers = #tpu.dot_dimension_numbers<[1], [0], [0], [1], [0, 0, 1, 1], [], []>} : vector<2x128xf32>, vector<128x128xf32>, vector<2x128xf32> -> vector<2x128xf32>
    %390 = vector.broadcast %253 : vector<1x128xf32> to vector<2x128xf32>
    %391 = arith.addf %389, %390 : vector<2x128xf32>
    %c2_i32_98 = arith.constant 2 : i32
    %392 = arith.muli %c3_i32_92, %c2_i32_98 : i32
    %393 = arith.index_cast %392 : i32 to index
    %c0_99 = arith.constant 0 : index
    %394 = vector.load %arg12[%393, %c0_99] : memref<16x128xf32, #tpu.memory_space<vmem>>, vector<2x128xf32>
    tpu.vector_store %arg12[%393, %c0_99], %391 {strides = array<i32>} : memref<16x128xf32, #tpu.memory_space<vmem>>, vector<2x128xf32>,
    %c4_i32_100 = arith.constant 4 : i32
    %395 = tpu.concatenate %391, %388 in 1 : vector<2x128xf32>, vector<2x128xf32> -> vector<2x256xf32>
    %cst_101 = arith.constant dense<0.000000e+00> : vector<2x512xf32>
    %396 = tpu.matmul %395, %250, %cst_101 {dimension_numbers = #tpu.dot_dimension_numbers<[1], [0], [0], [1], [0, 0, 1, 1], [], []>} : vector<2x256xf32>, vector<256x512xf32>, vector<2x512xf32> -> vector<2x512xf32>
    %397 = vector.broadcast %251 : vector<1x512xf32> to vector<2x512xf32>
    %398 = arith.addf %396, %397 : vector<2x512xf32>
    %399 = vector.extract_strided_slice %398 {offsets = [0, 0], sizes = [2, 128], strides = [1, 1]} : vector<2x512xf32> to vector<2x128xf32>
    %400 = arith.negf %399 : vector<2x128xf32>
    %401 = math.exp %400 : vector<2x128xf32>
    %cst_102 = arith.constant 1.000000e+00 : f32
    %402 = vector.broadcast %cst_102 : f32 to vector<2x128xf32>
    %403 = arith.addf %402, %401 : vector<2x128xf32>
    %404 = arith.divf %402, %403 : vector<2x128xf32>
    %405 = vector.extract_strided_slice %398 {offsets = [0, 128], sizes = [2, 128], strides = [1, 1]} : vector<2x512xf32> to vector<2x128xf32>
    %406 = arith.negf %405 : vector<2x128xf32>
    %407 = math.exp %406 : vector<2x128xf32>
    %cst_103 = arith.constant 1.000000e+00 : f32
    %408 = vector.broadcast %cst_103 : f32 to vector<2x128xf32>
    %409 = arith.addf %408, %407 : vector<2x128xf32>
    %410 = arith.divf %408, %409 : vector<2x128xf32>
    %411 = vector.extract_strided_slice %398 {offsets = [0, 256], sizes = [2, 128], strides = [1, 1]} : vector<2x512xf32> to vector<2x128xf32>
    %412 = math.tanh %411 : vector<2x128xf32>
    %413 = vector.extract_strided_slice %398 {offsets = [0, 384], sizes = [2, 128], strides = [1, 1]} : vector<2x512xf32> to vector<2x128xf32>
    %414 = arith.negf %413 : vector<2x128xf32>
    %415 = math.exp %414 : vector<2x128xf32>
    %cst_104 = arith.constant 1.000000e+00 : f32
    %416 = vector.broadcast %cst_104 : f32 to vector<2x128xf32>
    %417 = arith.addf %416, %415 : vector<2x128xf32>
    %418 = arith.divf %416, %417 : vector<2x128xf32>
    %419 = arith.mulf %410, %386 : vector<2x128xf32>
    %420 = arith.mulf %404, %412 : vector<2x128xf32>
    %421 = arith.addf %419, %420 : vector<2x128xf32>
    %422 = math.tanh %421 : vector<2x128xf32>
    %423 = arith.mulf %418, %422 : vector<2x128xf32>
    %cst_105 = arith.constant dense<0.000000e+00> : vector<2x128xf32>
    %424 = tpu.matmul %423, %252, %cst_105 {dimension_numbers = #tpu.dot_dimension_numbers<[1], [0], [0], [1], [0, 0, 1, 1], [], []>} : vector<2x128xf32>, vector<128x128xf32>, vector<2x128xf32> -> vector<2x128xf32>
    %425 = vector.broadcast %253 : vector<1x128xf32> to vector<2x128xf32>
    %426 = arith.addf %424, %425 : vector<2x128xf32>
    %c2_i32_106 = arith.constant 2 : i32
    %427 = arith.muli %c4_i32_100, %c2_i32_106 : i32
    %428 = arith.index_cast %427 : i32 to index
    %c0_107 = arith.constant 0 : index
    %429 = vector.load %arg12[%428, %c0_107] : memref<16x128xf32, #tpu.memory_space<vmem>>, vector<2x128xf32>
    tpu.vector_store %arg12[%428, %c0_107], %426 {strides = array<i32>} : memref<16x128xf32, #tpu.memory_space<vmem>>, vector<2x128xf32>,
    %c5_i32_108 = arith.constant 5 : i32
    %430 = tpu.concatenate %426, %423 in 1 : vector<2x128xf32>, vector<2x128xf32> -> vector<2x256xf32>
    %cst_109 = arith.constant dense<0.000000e+00> : vector<2x512xf32>
    %431 = tpu.matmul %430, %250, %cst_109 {dimension_numbers = #tpu.dot_dimension_numbers<[1], [0], [0], [1], [0, 0, 1, 1], [], []>} : vector<2x256xf32>, vector<256x512xf32>, vector<2x512xf32> -> vector<2x512xf32>
    %432 = vector.broadcast %251 : vector<1x512xf32> to vector<2x512xf32>
    %433 = arith.addf %431, %432 : vector<2x512xf32>
    %434 = vector.extract_strided_slice %433 {offsets = [0, 0], sizes = [2, 128], strides = [1, 1]} : vector<2x512xf32> to vector<2x128xf32>
    %435 = arith.negf %434 : vector<2x128xf32>
    %436 = math.exp %435 : vector<2x128xf32>
    %cst_110 = arith.constant 1.000000e+00 : f32
    %437 = vector.broadcast %cst_110 : f32 to vector<2x128xf32>
    %438 = arith.addf %437, %436 : vector<2x128xf32>
    %439 = arith.divf %437, %438 : vector<2x128xf32>
    %440 = vector.extract_strided_slice %433 {offsets = [0, 128], sizes = [2, 128], strides = [1, 1]} : vector<2x512xf32> to vector<2x128xf32>
    %441 = arith.negf %440 : vector<2x128xf32>
    %442 = math.exp %441 : vector<2x128xf32>
    %cst_111 = arith.constant 1.000000e+00 : f32
    %443 = vector.broadcast %cst_111 : f32 to vector<2x128xf32>
    %444 = arith.addf %443, %442 : vector<2x128xf32>
    %445 = arith.divf %443, %444 : vector<2x128xf32>
    %446 = vector.extract_strided_slice %433 {offsets = [0, 256], sizes = [2, 128], strides = [1, 1]} : vector<2x512xf32> to vector<2x128xf32>
    %447 = math.tanh %446 : vector<2x128xf32>
    %448 = vector.extract_strided_slice %433 {offsets = [0, 384], sizes = [2, 128], strides = [1, 1]} : vector<2x512xf32> to vector<2x128xf32>
    %449 = arith.negf %448 : vector<2x128xf32>
    %450 = math.exp %449 : vector<2x128xf32>
    %cst_112 = arith.constant 1.000000e+00 : f32
    %451 = vector.broadcast %cst_112 : f32 to vector<2x128xf32>
    %452 = arith.addf %451, %450 : vector<2x128xf32>
    %453 = arith.divf %451, %452 : vector<2x128xf32>
    %454 = arith.mulf %445, %421 : vector<2x128xf32>
    %455 = arith.mulf %439, %447 : vector<2x128xf32>
    %456 = arith.addf %454, %455 : vector<2x128xf32>
    %457 = math.tanh %456 : vector<2x128xf32>
    %458 = arith.mulf %453, %457 : vector<2x128xf32>
    %cst_113 = arith.constant dense<0.000000e+00> : vector<2x128xf32>
    %459 = tpu.matmul %458, %252, %cst_113 {dimension_numbers = #tpu.dot_dimension_numbers<[1], [0], [0], [1], [0, 0, 1, 1], [], []>} : vector<2x128xf32>, vector<128x128xf32>, vector<2x128xf32> -> vector<2x128xf32>
    %460 = vector.broadcast %253 : vector<1x128xf32> to vector<2x128xf32>
    %461 = arith.addf %459, %460 : vector<2x128xf32>
    %c2_i32_114 = arith.constant 2 : i32
    %462 = arith.muli %c5_i32_108, %c2_i32_114 : i32
    %463 = arith.index_cast %462 : i32 to index
    %c0_115 = arith.constant 0 : index
    %464 = vector.load %arg12[%463, %c0_115] : memref<16x128xf32, #tpu.memory_space<vmem>>, vector<2x128xf32>
    tpu.vector_store %arg12[%463, %c0_115], %461 {strides = array<i32>} : memref<16x128xf32, #tpu.memory_space<vmem>>, vector<2x128xf32>,
    %c6_i32_116 = arith.constant 6 : i32
    %465 = tpu.concatenate %461, %458 in 1 : vector<2x128xf32>, vector<2x128xf32> -> vector<2x256xf32>
    %cst_117 = arith.constant dense<0.000000e+00> : vector<2x512xf32>
    %466 = tpu.matmul %465, %250, %cst_117 {dimension_numbers = #tpu.dot_dimension_numbers<[1], [0], [0], [1], [0, 0, 1, 1], [], []>} : vector<2x256xf32>, vector<256x512xf32>, vector<2x512xf32> -> vector<2x512xf32>
    %467 = vector.broadcast %251 : vector<1x512xf32> to vector<2x512xf32>
    %468 = arith.addf %466, %467 : vector<2x512xf32>
    %469 = vector.extract_strided_slice %468 {offsets = [0, 0], sizes = [2, 128], strides = [1, 1]} : vector<2x512xf32> to vector<2x128xf32>
    %470 = arith.negf %469 : vector<2x128xf32>
    %471 = math.exp %470 : vector<2x128xf32>
    %cst_118 = arith.constant 1.000000e+00 : f32
    %472 = vector.broadcast %cst_118 : f32 to vector<2x128xf32>
    %473 = arith.addf %472, %471 : vector<2x128xf32>
    %474 = arith.divf %472, %473 : vector<2x128xf32>
    %475 = vector.extract_strided_slice %468 {offsets = [0, 128], sizes = [2, 128], strides = [1, 1]} : vector<2x512xf32> to vector<2x128xf32>
    %476 = arith.negf %475 : vector<2x128xf32>
    %477 = math.exp %476 : vector<2x128xf32>
    %cst_119 = arith.constant 1.000000e+00 : f32
    %478 = vector.broadcast %cst_119 : f32 to vector<2x128xf32>
    %479 = arith.addf %478, %477 : vector<2x128xf32>
    %480 = arith.divf %478, %479 : vector<2x128xf32>
    %481 = vector.extract_strided_slice %468 {offsets = [0, 256], sizes = [2, 128], strides = [1, 1]} : vector<2x512xf32> to vector<2x128xf32>
    %482 = math.tanh %481 : vector<2x128xf32>
    %483 = vector.extract_strided_slice %468 {offsets = [0, 384], sizes = [2, 128], strides = [1, 1]} : vector<2x512xf32> to vector<2x128xf32>
    %484 = arith.negf %483 : vector<2x128xf32>
    %485 = math.exp %484 : vector<2x128xf32>
    %cst_120 = arith.constant 1.000000e+00 : f32
    %486 = vector.broadcast %cst_120 : f32 to vector<2x128xf32>
    %487 = arith.addf %486, %485 : vector<2x128xf32>
    %488 = arith.divf %486, %487 : vector<2x128xf32>
    %489 = arith.mulf %480, %456 : vector<2x128xf32>
    %490 = arith.mulf %474, %482 : vector<2x128xf32>
    %491 = arith.addf %489, %490 : vector<2x128xf32>
    %492 = math.tanh %491 : vector<2x128xf32>
    %493 = arith.mulf %488, %492 : vector<2x128xf32>
    %cst_121 = arith.constant dense<0.000000e+00> : vector<2x128xf32>
    %494 = tpu.matmul %493, %252, %cst_121 {dimension_numbers = #tpu.dot_dimension_numbers<[1], [0], [0], [1], [0, 0, 1, 1], [], []>} : vector<2x128xf32>, vector<128x128xf32>, vector<2x128xf32> -> vector<2x128xf32>
    %495 = vector.broadcast %253 : vector<1x128xf32> to vector<2x128xf32>
    %496 = arith.addf %494, %495 : vector<2x128xf32>
    %c2_i32_122 = arith.constant 2 : i32
    %497 = arith.muli %c6_i32_116, %c2_i32_122 : i32
    %498 = arith.index_cast %497 : i32 to index
    %c0_123 = arith.constant 0 : index
    %499 = vector.load %arg12[%498, %c0_123] : memref<16x128xf32, #tpu.memory_space<vmem>>, vector<2x128xf32>
    tpu.vector_store %arg12[%498, %c0_123], %496 {strides = array<i32>} : memref<16x128xf32, #tpu.memory_space<vmem>>, vector<2x128xf32>,
    %c7_i32_124 = arith.constant 7 : i32
    %500 = tpu.concatenate %496, %493 in 1 : vector<2x128xf32>, vector<2x128xf32> -> vector<2x256xf32>
    %cst_125 = arith.constant dense<0.000000e+00> : vector<2x512xf32>
    %501 = tpu.matmul %500, %250, %cst_125 {dimension_numbers = #tpu.dot_dimension_numbers<[1], [0], [0], [1], [0, 0, 1, 1], [], []>} : vector<2x256xf32>, vector<256x512xf32>, vector<2x512xf32> -> vector<2x512xf32>
    %502 = vector.broadcast %251 : vector<1x512xf32> to vector<2x512xf32>
    %503 = arith.addf %501, %502 : vector<2x512xf32>
    %504 = vector.extract_strided_slice %503 {offsets = [0, 0], sizes = [2, 128], strides = [1, 1]} : vector<2x512xf32> to vector<2x128xf32>
    %505 = arith.negf %504 : vector<2x128xf32>
    %506 = math.exp %505 : vector<2x128xf32>
    %cst_126 = arith.constant 1.000000e+00 : f32
    %507 = vector.broadcast %cst_126 : f32 to vector<2x128xf32>
    %508 = arith.addf %507, %506 : vector<2x128xf32>
    %509 = arith.divf %507, %508 : vector<2x128xf32>
    %510 = vector.extract_strided_slice %503 {offsets = [0, 128], sizes = [2, 128], strides = [1, 1]} : vector<2x512xf32> to vector<2x128xf32>
    %511 = arith.negf %510 : vector<2x128xf32>
    %512 = math.exp %511 : vector<2x128xf32>
    %cst_127 = arith.constant 1.000000e+00 : f32
    %513 = vector.broadcast %cst_127 : f32 to vector<2x128xf32>
    %514 = arith.addf %513, %512 : vector<2x128xf32>
    %515 = arith.divf %513, %514 : vector<2x128xf32>
    %516 = vector.extract_strided_slice %503 {offsets = [0, 256], sizes = [2, 128], strides = [1, 1]} : vector<2x512xf32> to vector<2x128xf32>
    %517 = math.tanh %516 : vector<2x128xf32>
    %518 = vector.extract_strided_slice %503 {offsets = [0, 384], sizes = [2, 128], strides = [1, 1]} : vector<2x512xf32> to vector<2x128xf32>
    %519 = arith.negf %518 : vector<2x128xf32>
    %520 = math.exp %519 : vector<2x128xf32>
    %cst_128 = arith.constant 1.000000e+00 : f32
    %521 = vector.broadcast %cst_128 : f32 to vector<2x128xf32>
    %522 = arith.addf %521, %520 : vector<2x128xf32>
    %523 = arith.divf %521, %522 : vector<2x128xf32>
    %524 = arith.mulf %515, %491 : vector<2x128xf32>
    %525 = arith.mulf %509, %517 : vector<2x128xf32>
    %526 = arith.addf %524, %525 : vector<2x128xf32>
    %527 = math.tanh %526 : vector<2x128xf32>
    %528 = arith.mulf %523, %527 : vector<2x128xf32>
    %cst_129 = arith.constant dense<0.000000e+00> : vector<2x128xf32>
    %529 = tpu.matmul %528, %252, %cst_129 {dimension_numbers = #tpu.dot_dimension_numbers<[1], [0], [0], [1], [0, 0, 1, 1], [], []>} : vector<2x128xf32>, vector<128x128xf32>, vector<2x128xf32> -> vector<2x128xf32>
    %530 = vector.broadcast %253 : vector<1x128xf32> to vector<2x128xf32>
    %531 = arith.addf %529, %530 : vector<2x128xf32>
    %c2_i32_130 = arith.constant 2 : i32
    %532 = arith.muli %c7_i32_124, %c2_i32_130 : i32
    %533 = arith.index_cast %532 : i32 to index
    %c0_131 = arith.constant 0 : index
    %534 = vector.load %arg12[%533, %c0_131] : memref<16x128xf32, #tpu.memory_space<vmem>>, vector<2x128xf32>
    tpu.vector_store %arg12[%533, %c0_131], %531 {strides = array<i32>} : memref<16x128xf32, #tpu.memory_space<vmem>>, vector<2x128xf32>,
    %c8_i32_132 = arith.constant 8 : i32
    %c0_133 = arith.constant 0 : index
    %c0_134 = arith.constant 0 : index
    %535 = vector.load %arg12[%c0_133, %c0_134] : memref<16x128xf32, #tpu.memory_space<vmem>>, vector<16x128xf32>
    %c0_135 = arith.constant 0 : index
    %c0_136 = arith.constant 0 : index
    %536 = vector.load %arg8[%c0_135, %c0_136] : memref<128x128xf32, #tpu.memory_space<vmem>>, vector<128x128xf32>
    %cst_137 = arith.constant dense<0.000000e+00> : vector<16x128xf32>
    %537 = tpu.matmul %535, %536, %cst_137 {dimension_numbers = #tpu.dot_dimension_numbers<[1], [0], [0], [1], [0, 0, 1, 1], [], []>} : vector<16x128xf32>, vector<128x128xf32>, vector<16x128xf32> -> vector<16x128xf32>
    %c0_138 = arith.constant 0 : index
    %c0_139 = arith.constant 0 : index
    %538 = vector.load %arg9[%c0_138, %c0_139] : memref<1x128xf32, #tpu.memory_space<vmem>>, vector<1x128xf32>
    %539 = vector.broadcast %538 : vector<1x128xf32> to vector<16x128xf32>
    %540 = arith.addf %537, %539 : vector<16x128xf32>
    %c0_140 = arith.constant 0 : index
    %c0_141 = arith.constant 0 : index
    %541 = vector.load %arg10[%c0_140, %c0_141] : memref<16x128xf32, #tpu.memory_space<vmem>>, vector<16x128xf32>
    tpu.vector_store %arg10[%c0_140, %c0_141], %540 {strides = array<i32>} : memref<16x128xf32, #tpu.memory_space<vmem>>, vector<16x128xf32>,
    return
  }
}

</mosaic_0001>

<bundles_post_ra>
// kernel: glob_lstm_de_forward.1
= control target key start
LH: loop header
LB: loop body
LE: loop exit
PB: predicated region body
PF: predicated region fallthrough
CT: control target
= control target key end

     0   :  { %v8877_v3 = vmov 0.0   ;;  %vm6636_vm0 = vmmov 0   ;;  %s8862_s1 = inlined_call_operand.vmem [shape: f32[128,512], index: 1, kind: input, shape index: {}]   ;;  %s8863_s2 = inlined_call_operand.vmem [shape: f32[128,512], index: 2, kind: input, shape index: {}]   ;;  %s8864_s0 = inlined_call_operand.vmem [shape: f32[16,128], index: 0, kind: input, shape index: {}]   ;;  %s8865_s3 = inlined_call_operand.vmem [shape: f32[1,512], index: 3, kind: input, shape index: {}]   ;;  %s8866_s4 = inlined_call_operand.vmem [shape: f32[256,512], index: 4, kind: input, shape index: {}]   ;;  %s8867_s6 = inlined_call_operand.vmem [shape: f32[128,128], index: 6, kind: input, shape index: {}]   ;;  %s8868_s5 = inlined_call_operand.vmem [shape: f32[1,512], index: 5, kind: input, shape index: {}]   ;;  %s8869_s7 = inlined_call_operand.vmem [shape: f32[1,128], index: 7, kind: input, shape index: {}]   ;;  %s8870_s8 = inlined_call_operand.vmem [shape: f32[128,128], index: 8, kind: input, shape index: {}]   ;;  %s8871_s9 = inlined_call_operand.vmem [shape: f32[1,128], index: 9, kind: input, shape index: {}]   ;;  %s8872_s10 = inlined_call_operand.vmem [shape: f32[16,128], index: 10, kind: output, shape index: {}]  }
   0x1   :  { %v38_v0 = vld [vmem:[%s8862_s1 + $0x8] sm:$0xff]  ;;  %v40_v2 = vld [vmem:[%s8862_s1 + $0x18] sm:$0xff]  ;;  %187 = vmatprep.mubr.f32.mxu0 %v8877_v3  ;;  %264 = vmatprep.mubr.f32.mxu1 %v8877_v3  ;;  %v37_v6 = vld [vmem:[%s8862_s1] sm:$0xff] }
   0x2   :  { %v42_v1 = vld [vmem:[%s8862_s1 + $0x28] sm:$0xff]  ;;  %v44_v5 = vld [vmem:[%s8862_s1 + $0x38] sm:$0xff]  ;;  %v41_v7 = vld [vmem:[%s8862_s1 + $0x20] sm:$0xff] }
   0x3   :  { %v4550_v4 = vpack.c.bf16 %v42_v1, %v38_v0  ;;  %v4582_v8 = vpack.c.bf16 %v44_v5, %v40_v2  ;;  %v4552_v9 = vpack.c.bf16 %v41_v7, %v37_v6  ;;  %v39_v10 = vld [vmem:[%s8862_s1 + $0x10] sm:$0xff]  ;;  %v46_v12 = vld [vmem:[%s8862_s1 + $0x48] sm:$0xff]  ;;  %v48_v15 = vld [vmem:[%s8862_s1 + $0x58] sm:$0xff] }
   0x4   :  { %v43_v11 = vld [vmem:[%s8862_s1 + $0x30] sm:$0xff]  ;;  %v50_v14 = vld [vmem:[%s8862_s1 + $0x68] sm:$0xff]  ;;  %v52_v16 = vld [vmem:[%s8862_s1 + $0x78] sm:$0xff] }
   0x5   :  { %4551 = vmatprep.subr.bf16.mxu0 %v4550_v4  ;;  %v4584_v13 = vpack.c.bf16 %v43_v11, %v39_v10  ;;  %4583 = vmatprep.subr.bf16.mxu1 %v4582_v8  ;;  %v4554_v17 = vpack.c.bf16 %v50_v14, %v46_v12  ;;  %v4586_v18 = vpack.c.bf16 %v52_v16, %v48_v15  ;;  %v45_v19 = vld [vmem:[%s8862_s1 + $0x40] sm:$0xff]  ;;  %v47_v21 = vld [vmem:[%s8862_s1 + $0x50] sm:$0xff]  ;;  %v54_v24 = vld [vmem:[%s8862_s1 + $0x88] sm:$0xff] }
   0x6   :  { %4553 = vmatpush1.bf16.msra.mxu0 %v4552_v9  ;;  %v49_v20 = vld [vmem:[%s8862_s1 + $0x60] sm:$0xff]  ;;  %v51_v23 = vld [vmem:[%s8862_s1 + $0x70] sm:$0xff]  ;;  %v58_v25 = vld [vmem:[%s8862_s1 + $0xa8] sm:$0xff] }
   0x7   :  { %4585 = vmatpush1.bf16.msra.mxu1 %v4584_v13  ;;  %v4556_v22 = vpack.c.bf16 %v49_v20, %v45_v19  ;;  %4555 = vmatprep.subr.bf16.mxu0 %v4554_v17  ;;  %v4588_v26 = vpack.c.bf16 %v51_v23, %v47_v21  ;;  %v4558_v27 = vpack.c.bf16 %v58_v25, %v54_v24  ;;  %v56_v28 = vld [vmem:[%s8862_s1 + $0x98] sm:$0xff]  ;;  %v53_v30 = vld [vmem:[%s8862_s1 + $0x80] sm:$0xff]  ;;  %v55_v33 = vld [vmem:[%s8862_s1 + $0x90] sm:$0xff] }
   0x8   :  { %4587 = vmatprep.subr.bf16.mxu1 %v4586_v18  ;;  %v60_v29 = vld [vmem:[%s8862_s1 + $0xb8] sm:$0xff]  ;;  %v57_v32 = vld [vmem:[%s8862_s1 + $0xa0] sm:$0xff]  ;;  %v59_v34 = vld [vmem:[%s8862_s1 + $0xb0] sm:$0xff] }
   0x9   :  { %v4590_v31 = vpack.c.bf16 %v60_v29, %v56_v28  ;;  %v4560_v35 = vpack.c.bf16 %v57_v32, %v53_v30  ;;  %v62_v36 = vld [vmem:[%s8862_s1 + $0xc8] sm:$0xff]  ;;  %v64_v38 = vld [vmem:[%s8862_s1 + $0xd8] sm:$0xff]  ;;  %v4592_v39 = vpack.c.bf16 %v59_v34, %v55_v33  ;;  %v61_v42 = vld [vmem:[%s8862_s1 + $0xc0] sm:$0xff] }
   0xa   :  { %4557 = vmatpush1.bf16.msra.mxu0 %v4556_v22  ;;  %v66_v37 = vld [vmem:[%s8862_s1 + $0xe8] sm:$0xff]  ;;  %v68_v41 = vld [vmem:[%s8862_s1 + $0xf8] sm:$0xff]  ;;  %v65_v43 = vld [vmem:[%s8862_s1 + $0xe0] sm:$0xff] }
   0xb   :  { %4589 = vmatpush1.bf16.msra.mxu1 %v4588_v26  ;;  %4559 = vmatprep.subr.bf16.mxu0 %v4558_v27  ;;  %v4562_v40 = vpack.c.bf16 %v66_v37, %v62_v36  ;;  %v4594_v44 = vpack.c.bf16 %v68_v41, %v64_v38  ;;  %v63_v45 = vld [vmem:[%s8862_s1 + $0xd0] sm:$0xff]  ;;  %v70_v47 = vld [vmem:[%s8862_s1 + $0x108] sm:$0xff]  ;;  %v72_v49 = vld [vmem:[%s8862_s1 + $0x118] sm:$0xff]  ;;  %v4564_v51 = vpack.c.bf16 %v65_v43, %v61_v42 }
   0xc   :  { %4591 = vmatprep.subr.bf16.mxu1 %v4590_v31  ;;  %v67_v46 = vld [vmem:[%s8862_s1 + $0xf0] sm:$0xff]  ;;  %v74_v48 = vld [vmem:[%s8862_s1 + $0x128] sm:$0xff]  ;;  %v76_v50 = vld [vmem:[%s8862_s1 + $0x138] sm:$0xff] }
   0xd   :  { %v4596_v52 = vpack.c.bf16 %v67_v46, %v63_v45  ;;  %v4566_v53 = vpack.c.bf16 %v74_v48, %v70_v47  ;;  %v69_v54 = vld [vmem:[%s8862_s1 + $0x100] sm:$0xff]  ;;  %v71_v56 = vld [vmem:[%s8862_s1 + $0x110] sm:$0xff]  ;;  %v4598_v57 = vpack.c.bf16 %v76_v50, %v72_v49  ;;  %v78_v59 = vld [vmem:[%s8862_s1 + $0x148] sm:$0xff] }
   0xe   :  { %4561 = vmatpush1.bf16.msra.mxu0 %v4560_v35  ;;  %v73_v55 = vld [vmem:[%s8862_s1 + $0x120] sm:$0xff]  ;;  %v75_v58 = vld [vmem:[%s8862_s1 + $0x130] sm:$0xff]  ;;  %v82_v60 = vld [vmem:[%s8862_s1 + $0x168] sm:$0xff] }
   0xf   :  { %4593 = vmatpush1.bf16.msra.mxu1 %v4592_v39  ;;  %4563 = vmatprep.subr.bf16.mxu0 %v4562_v40  ;;  %v80_v61 = vld [vmem:[%s8862_s1 + $0x158] sm:$0xff]  ;;  %v4568_v63 = vpack.c.bf16 %v73_v55, %v69_v54  ;;  %v4600_v0 = vpack.c.bf16 %v75_v58, %v71_v56  ;;  %v4570_v1 = vpack.c.bf16 %v82_v60, %v78_v59  ;;  %v77_v2 = vld [vmem:[%s8862_s1 + $0x140] sm:$0xff]  ;;  %v79_v5 = vld [vmem:[%s8862_s1 + $0x150] sm:$0xff] }
  0x10   :  { %4595 = vmatprep.subr.bf16.mxu1 %v4594_v44  ;;  %v84_v62 = vld [vmem:[%s8862_s1 + $0x178] sm:$0xff]  ;;  %v81_v4 = vld [vmem:[%s8862_s1 + $0x160] sm:$0xff]  ;;  %v83_v7 = vld [vmem:[%s8862_s1 + $0x170] sm:$0xff] }
  0x11   :  { %v4602_v6 = vpack.c.bf16 %v84_v62, %v80_v61  ;;  %v86_v8 = vld [vmem:[%s8862_s1 + $0x188] sm:$0xff]  ;;  %v88_v10 = vld [vmem:[%s8862_s1 + $0x198] sm:$0xff]  ;;  %v4572_v12 = vpack.c.bf16 %v81_v4, %v77_v2  ;;  %v4604_v13 = vpack.c.bf16 %v83_v7, %v79_v5  ;;  %v85_v15 = vld [vmem:[%s8862_s1 + $0x180] sm:$0xff] }
  0x12   :  { %4565 = vmatpush1.bf16.msra.mxu0 %v4564_v51  ;;  %v90_v9 = vld [vmem:[%s8862_s1 + $0x1a8] sm:$0xff]  ;;  %v92_v11 = vld [vmem:[%s8862_s1 + $0x1b8] sm:$0xff]  ;;  %v89_v16 = vld [vmem:[%s8862_s1 + $0x1a0] sm:$0xff] }
  0x13   :  { %4597 = vmatpush1.bf16.msra.mxu1 %v4596_v52  ;;  %4567 = vmatprep.subr.bf16.mxu0 %v4566_v53  ;;  %v4574_v14 = vpack.c.bf16 %v90_v9, %v86_v8  ;;  %v87_v17 = vld [vmem:[%s8862_s1 + $0x190] sm:$0xff]  ;;  %v4606_v18 = vpack.c.bf16 %v92_v11, %v88_v10  ;;  %v94_v20 = vld [vmem:[%s8862_s1 + $0x1c8] sm:$0xff]  ;;  %v96_v22 = vld [vmem:[%s8862_s1 + $0x1d8] sm:$0xff]  ;;  %v4576_v24 = vpack.c.bf16 %v89_v16, %v85_v15 }
  0x14   :  { %4599 = vmatprep.subr.bf16.mxu1 %v4598_v57  ;;  %v91_v19 = vld [vmem:[%s8862_s1 + $0x1b0] sm:$0xff]  ;;  %v98_v21 = vld [vmem:[%s8862_s1 + $0x1e8] sm:$0xff]  ;;  %v100_v23 = vld [vmem:[%s8862_s1 + $0x1f8] sm:$0xff] }
  0x15   :  { %v4608_v25 = vpack.c.bf16 %v91_v19, %v87_v17  ;;  %v4578_v26 = vpack.c.bf16 %v98_v21, %v94_v20  ;;  %v93_v27 = vld [vmem:[%s8862_s1 + $0x1c0] sm:$0xff]  ;;  %v95_v29 = vld [vmem:[%s8862_s1 + $0x1d0] sm:$0xff]  ;;  %v4610_v30 = vpack.c.bf16 %v100_v23, %v96_v22  ;;  %v286_v32 = vld [vmem:[%s8863_s2 + $0x8] sm:$0xff] }
  0x16   :  { %4569 = vmatpush1.bf16.msra.mxu0 %v4568_v63  ;;  %v97_v28 = vld [vmem:[%s8862_s1 + $0x1e0] sm:$0xff]  ;;  %v99_v31 = vld [vmem:[%s8862_s1 + $0x1f0] sm:$0xff]  ;;  %v290_v33 = vld [vmem:[%s8863_s2 + $0x28] sm:$0xff] }
  0x17   :  { %4601 = vmatpush1.bf16.msra.mxu1 %v4600_v0  ;;  %4571 = vmatprep.subr.bf16.mxu0 %v4570_v1  ;;  %v288_v34 = vld [vmem:[%s8863_s2 + $0x18] sm:$0xff]  ;;  %v4580_v36 = vpack.c.bf16 %v97_v28, %v93_v27  ;;  %v4612_v37 = vpack.c.bf16 %v99_v31, %v95_v29  ;;  %v6898_v38 = vpack.c.bf16 %v290_v33, %v286_v32  ;;  %v285_v39 = vld [vmem:[%s8863_s2] sm:$0xff]  ;;  %v287_v41 = vld [vmem:[%s8863_s2 + $0x10] sm:$0xff] }
  0x18   :  { %4603 = vmatprep.subr.bf16.mxu1 %v4602_v6  ;;  %v292_v35 = vld [vmem:[%s8863_s2 + $0x38] sm:$0xff]  ;;  %v289_v40 = vld [vmem:[%s8863_s2 + $0x20] sm:$0xff]  ;;  %v291_v43 = vld [vmem:[%s8863_s2 + $0x30] sm:$0xff] }
  0x19   :  { %v6909_v42 = vpack.c.bf16 %v292_v35, %v288_v34  ;;  %v294_v44 = vld [vmem:[%s8863_s2 + $0x48] sm:$0xff]  ;;  %v296_v46 = vld [vmem:[%s8863_s2 + $0x58] sm:$0xff]  ;;  %v35_v48 = vld [vmem:[%s8864_s0] sm:$0xff]  ;;  %v6929_v49 = vpack.c.bf16 %v289_v40, %v285_v39  ;;  %v6932_v50 = vpack.c.bf16 %v291_v43, %v287_v41 }
  0x1a   :  { %4573 = vmatpush1.bf16.msra.mxu0 %v4572_v12  ;;  %v298_v45 = vld [vmem:[%s8863_s2 + $0x68] sm:$0xff]  ;;  %v300_v47 = vld [vmem:[%s8863_s2 + $0x78] sm:$0xff]  ;;  %v293_v52 = vld [vmem:[%s8863_s2 + $0x40] sm:$0xff] }
  0x1b   :  { %4605 = vmatpush1.bf16.msra.mxu1 %v4604_v13  ;;  %4575 = vmatprep.subr.bf16.mxu0 %v4574_v14  ;;  %v6934_v51 = vpack.c.bf16 %v298_v45, %v294_v44  ;;  %v297_v53 = vld [vmem:[%s8863_s2 + $0x60] sm:$0xff]  ;;  %v295_v54 = vld [vmem:[%s8863_s2 + $0x50] sm:$0xff]  ;;  %v6946_v55 = vpack.c.bf16 %v300_v47, %v296_v46  ;;  %v302_v57 = vld [vmem:[%s8863_s2 + $0x88] sm:$0xff] }
  0x1c   :  { %4607 = vmatprep.subr.bf16.mxu1 %v4606_v18  ;;  %v299_v56 = vld [vmem:[%s8863_s2 + $0x70] sm:$0xff]  ;;  %v306_v58 = vld [vmem:[%s8863_s2 + $0xa8] sm:$0xff]  ;;  %v304_v59 = vld [vmem:[%s8863_s2 + $0x98] sm:$0xff]  ;;  %v6964_v61 = vpack.c.bf16 %v297_v53, %v293_v52 }
  0x1d   :  { %v308_v60 = vld [vmem:[%s8863_s2 + $0xb8] sm:$0xff]  ;;  %v6968_v62 = vpack.c.bf16 %v299_v56, %v295_v54  ;;  %v6970_v63 = vpack.c.bf16 %v306_v58, %v302_v57  ;;  %v301_v0 = vld [vmem:[%s8863_s2 + $0x80] sm:$0xff]  ;;  %v303_v2 = vld [vmem:[%s8863_s2 + $0x90] sm:$0xff] }
  0x1e   :  { %4577 = vmatpush1.bf16.msra.mxu0 %v4576_v24  ;;  %v305_v1 = vld [vmem:[%s8863_s2 + $0xa0] sm:$0xff]  ;;  %v6982_v4 = vpack.c.bf16 %v308_v60, %v304_v59  ;;  %v307_v5 = vld [vmem:[%s8863_s2 + $0xb0] sm:$0xff]  ;;  %v310_v6 = vld [vmem:[%s8863_s2 + $0xc8] sm:$0xff] }
  0x1f   :  { %4609 = vmatpush1.bf16.msra.mxu1 %v4608_v25  ;;  %4579 = vmatprep.subr.bf16.mxu0 %v4578_v26  ;;  %v314_v7 = vld [vmem:[%s8863_s2 + $0xe8] sm:$0xff]  ;;  %v312_v8 = vld [vmem:[%s8863_s2 + $0xd8] sm:$0xff]  ;;  %v7002_v10 = vpack.c.bf16 %v305_v1, %v301_v0  ;;  %v7009_v12 = vpack.c.bf16 %v307_v5, %v303_v2  ;;  %v309_v14 = vld [vmem:[%s8863_s2 + $0xc0] sm:$0xff] }
  0x20   :  { %4611 = vmatprep.subr.bf16.mxu1 %v4610_v30  ;;  %v316_v9 = vld [vmem:[%s8863_s2 + $0xf8] sm:$0xff]  ;;  %v36_v11 = vld [vmem:[%s8864_s0 + $0x8] sm:$0xff]  ;;  %v7011_v13 = vpack.c.bf16 %v314_v7, %v310_v6  ;;  %v313_v15 = vld [vmem:[%s8863_s2 + $0xe0] sm:$0xff] }
  0x21   :  { %v311_v16 = vld [vmem:[%s8863_s2 + $0xd0] sm:$0xff]  ;;  %v7023_v17 = vpack.c.bf16 %v316_v9, %v312_v8  ;;  %v318_v19 = vld [vmem:[%s8863_s2 + $0x108] sm:$0xff]  ;;  %v320_v21 = vld [vmem:[%s8863_s2 + $0x118] sm:$0xff]  ;;  %v7042_v23 = vpack.c.bf16 %v313_v15, %v309_v14 }
  0x22   :  { %4581 = vmatpush1.bf16.msra.mxu0 %v4580_v36  ;;  %v315_v18 = vld [vmem:[%s8863_s2 + $0xf0] sm:$0xff]  ;;  %v322_v20 = vld [vmem:[%s8863_s2 + $0x128] sm:$0xff]  ;;  %v324_v22 = vld [vmem:[%s8863_s2 + $0x138] sm:$0xff] }
  0x23   :  { %4613 = vmatpush1.bf16.msra.mxu1 %v4612_v37  ;;  %4615 = vmatprep.subr.bf16.mxu0 %v6898_v38  ;;  %v7047_v24 = vpack.c.bf16 %v315_v18, %v311_v16  ;;  %v7049_v25 = vpack.c.bf16 %v322_v20, %v318_v19  ;;  %v317_v26 = vld [vmem:[%s8863_s2 + $0x100] sm:$0xff]  ;;  %v319_v28 = vld [vmem:[%s8863_s2 + $0x110] sm:$0xff]  ;;  %v7061_v29 = vpack.c.bf16 %v324_v22, %v320_v21  ;;  %v326_v31 = vld [vmem:[%s8863_s2 + $0x148] sm:$0xff]  ;;  %v103_v20 = vlaneseq }
  0x24   :  { %4647 = vmatprep.subr.bf16.mxu1 %v6909_v42  ;;  %v321_v27 = vld [vmem:[%s8863_s2 + $0x120] sm:$0xff]  ;;  %v323_v30 = vld [vmem:[%s8863_s2 + $0x130] sm:$0xff]  ;;  %v330_v32 = vld [vmem:[%s8863_s2 + $0x168] sm:$0xff] }
  0x25   :  { %188 = vmatmul.mubr.f32.vlgmr.msra.gmra.mrb[0].mxu0 %v35_v48  ;;  %v328_v33 = vld [vmem:[%s8863_s2 + $0x158] sm:$0xff]  ;;  %v7079_v35 = vpack.c.bf16 %v321_v27, %v317_v26  ;;  %v7083_v36 = vpack.c.bf16 %v323_v30, %v319_v28  ;;  %v7085_v37 = vpack.c.bf16 %v330_v32, %v326_v31  ;;  %v325_v39 = vld [vmem:[%s8863_s2 + $0x140] sm:$0xff]  ;;  %v327_v41 = vld [vmem:[%s8863_s2 + $0x150] sm:$0xff]  ;;  %v7222_v21 = vshrl.u32 %v103_v20, 7 }
  0x26   :  { %265 = vmatmul.mubr.f32.vlgmr.msra.gmra.mrb[0].mxu1 %v35_v48  ;;  %4617 = vmatpush1.bf16.msra.mxu0 %v6929_v49  ;;  %v332_v34 = vld [vmem:[%s8863_s2 + $0x178] sm:$0xff]  ;;  %v329_v40 = vld [vmem:[%s8863_s2 + $0x160] sm:$0xff]  ;;  %v331_v44 = vld [vmem:[%s8863_s2 + $0x170] sm:$0xff] }
  0x27   :  { %4649 = vmatpush1.bf16.msra.mxu1 %v6932_v50  ;;  %4619 = vmatprep.subr.bf16.mxu0 %v6934_v51  ;;  %v7097_v43 = vpack.c.bf16 %v332_v34, %v328_v33  ;;  %v334_v45 = vld [vmem:[%s8863_s2 + $0x188] sm:$0xff]  ;;  %v336_v47 = vld [vmem:[%s8863_s2 + $0x198] sm:$0xff]  ;;  %v7115_v52 = vpack.c.bf16 %v329_v40, %v325_v39  ;;  %v7119_v53 = vpack.c.bf16 %v331_v44, %v327_v41  ;;  %v333_v56 = vld [vmem:[%s8863_s2 + $0x180] sm:$0xff]  ;;  %v8876_v22 = vsub.s32 0, %v7222_v21 }
  0x28   :  { %4651 = vmatprep.subr.bf16.mxu1 %v6946_v55  ;;  %193 = vmatprep.mubr.f32.mxu0 %v8877_v3  ;;  %v338_v46 = vld [vmem:[%s8863_s2 + $0x1a8] sm:$0xff]  ;;  %v340_v48 = vld [vmem:[%s8863_s2 + $0x1b8] sm:$0xff]  ;;  %v337_v57 = vld [vmem:[%s8863_s2 + $0x1a0] sm:$0xff]  ;;  %v8875_v27 = vsub.s32 1, %v7222_v21  ;;  %v8873_v28 = vsub.s32 2, %v7222_v21  ;;  %v8874_v30 = vsub.s32 3, %v7222_v21 }
  0x29   :  { %270 = vmatprep.mubr.f32.mxu1 %v8877_v3  ;;  %194 = vmatmul.mubr.f32.gmra.mrb[2].mxu0 %v36_v11  ;;  %v7121_v54 = vpack.c.bf16 %v338_v46, %v334_v45  ;;  %v335_v58 = vld [vmem:[%s8863_s2 + $0x190] sm:$0xff]  ;;  %v7133_v59 = vpack.c.bf16 %v340_v48, %v336_v47  ;;  %v342_v0 = vld [vmem:[%s8863_s2 + $0x1c8] sm:$0xff]  ;;  %v344_v2 = vld [vmem:[%s8863_s2 + $0x1d8] sm:$0xff]  ;;  %v7151_v6 = vpack.c.bf16 %v337_v57, %v333_v56 }
  0x2a   :  { %4621 = vmatpush1.bf16.msra.mxu0 %v6964_v61  ;;  %271 = vmatmul.mubr.f32.gmra.mrb[2].mxu1 %v36_v11  ;;  %v339_v60 = vld [vmem:[%s8863_s2 + $0x1b0] sm:$0xff]  ;;  %v346_v1 = vld [vmem:[%s8863_s2 + $0x1e8] sm:$0xff]  ;;  %v348_v5 = vld [vmem:[%s8863_s2 + $0x1f8] sm:$0xff] }
  0x2b   :  { %4653 = vmatpush1.bf16.msra.mxu1 %v6968_v62  ;;  %4623 = vmatprep.subr.bf16.mxu0 %v6970_v63  ;;  %v7155_v7 = vpack.c.bf16 %v339_v60, %v335_v58  ;;  %v7157_v8 = vpack.c.bf16 %v346_v1, %v342_v0  ;;  %v341_v9 = vld [vmem:[%s8863_s2 + $0x1c0] sm:$0xff]  ;;  %v7166_v14 = vpack.c.bf16 %v348_v5, %v344_v2  ;;  %v343_v15 = vld [vmem:[%s8863_s2 + $0x1d0] sm:$0xff] }
  0x2c   :  { %4655 = vmatprep.subr.bf16.mxu1 %v6982_v4  ;;  %417 = vmatprep.mubr.f32.mxu0 %v8877_v3  ;;  %v345_v11 = vld [vmem:[%s8863_s2 + $0x1e0] sm:$0xff]  ;;  %v347_v16 = vld [vmem:[%s8863_s2 + $0x1f0] sm:$0xff] }
  0x2d   :  { %488 = vmatprep.mubr.f32.mxu1 %v8877_v3  ;;  %v7175_v18 = vpack.c.bf16 %v345_v11, %v341_v9  ;;  %v7179_v19 = vpack.c.bf16 %v347_v16, %v343_v15  ;;  %v101_v26 = vld [vmem:[%s8865_s3] sm:$0xf] }
  0x2e   :  { %4625 = vmatpush1.bf16.msra.mxu0 %v7002_v10  ;;  %v106_v31 = vrot.slane %v101_v26, %v8876_v22  ;;  %v110_v32 = vrot.slane %v101_v26, %v8875_v27  ;;  %v114_v33 = vrot.slane %v101_v26, %v8873_v28  ;;  %v118_v34 = vrot.slane %v101_v26, %v8874_v30  ;;  %v1961_v28 = vld [vmem:[%s8866_s4 + $0x380] sm:$0xff]  ;;  %v1939_v27 = vld [vmem:[%s8866_s4 + $0x2d0] sm:$0xff] }
  0x2f   :  { %4657 = vmatpush1.bf16.msra.mxu1 %v7009_v12  ;;  %4627 = vmatprep.subr.bf16.mxu0 %v7011_v13  ;;  %v1943_v22 = vld [vmem:[%s8866_s4 + $0x2f0] sm:$0xff] }
  0x30   :  { %4659 = vmatprep.subr.bf16.mxu1 %v7023_v17 }
  0x32   :  { %4629 = vmatpush1.bf16.msra.mxu0 %v7042_v23 }
  0x33   :  { %4661 = vmatpush1.bf16.msra.mxu1 %v7047_v24  ;;  %4631 = vmatprep.subr.bf16.mxu0 %v7049_v25 }
  0x34   :  { %4663 = vmatprep.subr.bf16.mxu1 %v7061_v29 }
  0x36   :  { %4633 = vmatpush1.bf16.msra.mxu0 %v7079_v35 }
  0x37   :  { %4665 = vmatpush1.bf16.msra.mxu1 %v7083_v36  ;;  %4635 = vmatprep.subr.bf16.mxu0 %v7085_v37 }
  0x38   :  { %4667 = vmatprep.subr.bf16.mxu1 %v7097_v43 }
  0x3a   :  { %4637 = vmatpush1.bf16.msra.mxu0 %v7115_v52 }
  0x3b   :  { %4669 = vmatpush1.bf16.msra.mxu1 %v7119_v53  ;;  %4639 = vmatprep.subr.bf16.mxu0 %v7121_v54 }
  0x3c   :  { %4671 = vmatprep.subr.bf16.mxu1 %v7133_v59 }
  0x3e   :  { %4641 = vmatpush1.bf16.msra.mxu0 %v7151_v6 }
  0x3f   :  { %4673 = vmatpush1.bf16.msra.mxu1 %v7155_v7  ;;  %4643 = vmatprep.subr.bf16.mxu0 %v7157_v8 }
  0x40   :  { %4675 = vmatprep.subr.bf16.mxu1 %v7166_v14 }
  0x42   :  { %4645 = vmatpush1.bf16.msra.mxu0 %v7175_v18 }
  0x43   :  { %4677 = vmatpush1.bf16.msra.mxu1 %v7179_v19  ;;  %4679 = vmatprep.subr.bf16.mxu0 %v6898_v38 }
  0x44   :  { %4711 = vmatprep.subr.bf16.mxu1 %v6909_v42 }
  0x45   :  { %418 = vmatmul.mubr.f32.vlgmr.msra.gmra.mrb[4].mxu0 %v8877_v3 }
  0x46   :  { %489 = vmatmul.mubr.f32.vlgmr.msra.gmra.mrb[4].mxu1 %v8877_v3  ;;  %4681 = vmatpush1.bf16.msra.mxu0 %v6929_v49 }
  0x47   :  { %4713 = vmatpush1.bf16.msra.mxu1 %v6932_v50  ;;  %4683 = vmatprep.subr.bf16.mxu0 %v6934_v51 }
  0x48   :  { %4715 = vmatprep.subr.bf16.mxu1 %v6946_v55  ;;  %591 = vmatprep.mubr.f32.mxu0 %v8877_v3 }
  0x49   :  { %662 = vmatprep.mubr.f32.mxu1 %v8877_v3 }
  0x4a   :  { %4685 = vmatpush1.bf16.msra.mxu0 %v6964_v61 }
  0x4b   :  { %4717 = vmatpush1.bf16.msra.mxu1 %v6968_v62  ;;  %4687 = vmatprep.subr.bf16.mxu0 %v6970_v63 }
  0x4c   :  { %4719 = vmatprep.subr.bf16.mxu1 %v6982_v4 }
  0x4e   :  { %4689 = vmatpush1.bf16.msra.mxu0 %v7002_v10 }
  0x4f   :  { %4721 = vmatpush1.bf16.msra.mxu1 %v7009_v12  ;;  %4691 = vmatprep.subr.bf16.mxu0 %v7011_v13 }
  0x50   :  { %4723 = vmatprep.subr.bf16.mxu1 %v7023_v17 }
  0x52   :  { %4693 = vmatpush1.bf16.msra.mxu0 %v7042_v23 }
  0x53   :  { %4725 = vmatpush1.bf16.msra.mxu1 %v7047_v24  ;;  %4695 = vmatprep.subr.bf16.mxu0 %v7049_v25 }
  0x54   :  { %4727 = vmatprep.subr.bf16.mxu1 %v7061_v29 }
  0x56   :  { %4697 = vmatpush1.bf16.msra.mxu0 %v7079_v35 }
  0x57   :  { %4729 = vmatpush1.bf16.msra.mxu1 %v7083_v36  ;;  %4699 = vmatprep.subr.bf16.mxu0 %v7085_v37 }
  0x58   :  { %4731 = vmatprep.subr.bf16.mxu1 %v7097_v43 }
  0x5a   :  { %4701 = vmatpush1.bf16.msra.mxu0 %v7115_v52 }
  0x5b   :  { %4733 = vmatpush1.bf16.msra.mxu1 %v7119_v53  ;;  %4703 = vmatprep.subr.bf16.mxu0 %v7121_v54 }
  0x5c   :  { %4735 = vmatprep.subr.bf16.mxu1 %v7133_v59 }
  0x5e   :  { %4705 = vmatpush1.bf16.msra.mxu0 %v7151_v6 }
  0x5f   :  { %4737 = vmatpush1.bf16.msra.mxu1 %v7155_v7  ;;  %4707 = vmatprep.subr.bf16.mxu0 %v7157_v8 }
  0x60   :  { %4739 = vmatprep.subr.bf16.mxu1 %v7166_v14 }
  0x62   :  { %4709 = vmatpush1.bf16.msra.mxu0 %v7175_v18 }
  0x63   :  { %4741 = vmatpush1.bf16.msra.mxu1 %v7179_v19  ;;  %4743 = vmatprep.subr.bf16.mxu0 %v6898_v38 }
  0x64   :  { %4775 = vmatprep.subr.bf16.mxu1 %v6909_v42 }
  0xf8   :  { %v189_v39 = vpop.f32.mrb[0].mxu0 }
  0xf9   :  { %v190_v40 = vadd.f32 %v189_v39, %v106_v31  ;;  %v191_v41 = vpop.f32.mrb[1].mxu0  ;;  %v266_v44 = vpop.f32.mrb[0].mxu1 }
  0xfa   :  { %v192_v45 = vadd.f32 %v191_v41, %v110_v32  ;;  %v267_v46 = vadd.f32 %v266_v44, %v114_v33  ;;  %v268_v47 = vpop.f32.mrb[1].mxu1 }
  0xfb   :  { %277 = vst [vmem:[#allocation2] sm:$0xff] %v190_v40  ;;  %v269_v48 = vadd.f32 %v268_v47, %v118_v34 }
  0xfc   :  { %278 = vst [vmem:[#allocation2 + $0x8] sm:$0xff] %v192_v45  ;;  %279 = vst [vmem:[#allocation2 + $0x10] sm:$0xff] %v267_v46  ;;  %v195_v56 = vpop.f32.mrb[2].mxu0 }
  0xfd   :  { %280 = vst [vmem:[#allocation2 + $0x18] sm:$0xff] %v269_v48  ;;  %v196_v57 = vadd.f32 %v195_v56, %v106_v31  ;;  %v197_v58 = vpop.f32.mrb[3].mxu0  ;;  %v272_v60 = vpop.f32.mrb[2].mxu1 }
  0xfe   :  { %v198_v0 = vadd.f32 %v197_v58, %v110_v32  ;;  %v273_v1 = vadd.f32 %v272_v60, %v114_v33  ;;  %v274_v2 = vpop.f32.mrb[3].mxu1 }
  0xff   :  { %281 = vst [vmem:[#allocation2 + $0x20] sm:$0xff] %v196_v57  ;;  %v275_v5 = vadd.f32 %v274_v2, %v118_v34 }
 0x100   :  { %282 = vst [vmem:[#allocation2 + $0x28] sm:$0xff] %v198_v0  ;;  %283 = vst [vmem:[#allocation2 + $0x30] sm:$0xff] %v273_v1 }
 0x101   :  { %284 = vst [vmem:[#allocation2 + $0x38] sm:$0xff] %v275_v5 }
 0x102   :  { %v349_v9 = vld [vmem:[#allocation2] sm:$0x3] }
 0x103   :  { %v350_v20 = vld [vmem:[#allocation2 + $0x8] sm:$0x3]  ;;  %v351_v44 = vld [vmem:[#allocation2 + $0x10] sm:$0x3] }
 0x104   :  { %v352_v32 = vld [vmem:[#allocation2 + $0x18] sm:$0x3] }
 0x118   :  { %v419_v11 = vpop.f32.mrb[4].mxu0 }
 0x119   :  { %v495_v15 = vadd.f32 %v419_v11, %v349_v9  ;;  %v490_v16 = vpop.f32.mrb[4].mxu1  ;;  %v421_v26 = vpop.f32.mrb[5].mxu0 }
 0x11a   :  { %v496_v39 = vadd.f32 %v421_v26, %v350_v20  ;;  %v492_v40 = vpop.f32.mrb[5].mxu1  ;;  %v497_v34 = vadd.f32 %v490_v16, %v351_v44  ;;  %v524_v44 = vld [vmem:[#allocation2 + $0x8] sm:$0xc] }
 0x11b   :  { %v4031_v41 = vmul.f32 -1.442695, %v495_v15  ;;  %v498_v33 = vadd.f32 %v492_v40, %v352_v32 }
 0x11c   :  { %v4032_v31 = vmul.f32 -1.442695, %v496_v39 }
 0x11d   :  { %6377 = vpow2.f32 %v4031_v41  ;;  %v4033_v45 = vmul.f32 -1.442695, %v498_v33 }
 0x11e   :  { %6379 = vpow2.f32 %v4032_v31  ;;  %v523_v31 = vld [vmem:[#allocation2] sm:$0xc] }
 0x11f   :  { %6381 = vpow2.f32 %v4033_v45 }
 0x120   :  { %6383 = vtanh.f32 %v497_v34 }
 0x127   :  { %v6378_v46 = vpop.eup %6377 }
 0x128   :  { %v6380_v47 = vpop.eup %6379  ;;  %v502_v48 = vadd.f32 1.0, %v6378_v46 }
 0x129   :  { %v508_v56 = vadd.f32 1.0, %v6380_v47  ;;  %v6382_v57 = vpop.eup %6381 }
 0x12a   :  { %6385 = vrcp.f32 %v502_v48  ;;  %v6384_v58 = vpop.eup %6383  ;;  %v515_v2 = vadd.f32 1.0, %v6382_v57  ;;  %v526_v48 = vld [vmem:[#allocation2 + $0x18] sm:$0xc] }
 0x12b   :  { %6387 = vrcp.f32 %v508_v56 }
 0x12c   :  { %6389 = vrcp.f32 %v515_v2 }
 0x134   :  { %v6386_v60 = vpop.eup %6385 }
 0x135   :  { %v6388_v0 = vpop.eup %6387  ;;  %v519_v1 = vmul.f32 %v6386_v60, %v6384_v58  ;;  %v525_v58 = vld [vmem:[#allocation2 + $0x10] sm:$0xc] }
 0x136   :  { %v518_v5 = vmul.f32 0.0, %v6388_v0  ;;  %v6390_v11 = vpop.eup %6389 }
 0x138   :  { %v7239_v9 = vadd.f32 %v519_v1, %v518_v5 }
 0x13a   :  { %6391 = vtanh.f32 %v7239_v9 }
 0x144   :  { %v6392_v15 = vpop.eup %6391 }
 0x145   :  { %v522_v16 = vmul.f32 %v6392_v15, %v6390_v11 }
 0x147   :  { %592 = vmatmul.mubr.f32.vlgmr.msra.gmra.mrb[6].mxu0 %v522_v16  ;;  %663 = vmatmul.mubr.f32.vlgmr.msra.gmra.mrb[6].mxu1 %v522_v16 }
 0x148   :  { %4745 = vmatpush1.bf16.msra.mxu0 %v6929_v49  ;;  %4777 = vmatpush1.bf16.msra.mxu1 %v6932_v50 }
 0x149   :  { %4747 = vmatprep.subr.bf16.mxu0 %v6934_v51  ;;  %4779 = vmatprep.subr.bf16.mxu1 %v6946_v55 }
 0x14a   :  { %783 = vmatprep.mubr.f32.mxu0 %v8877_v3  ;;  %854 = vmatprep.mubr.f32.mxu1 %v8877_v3 }
 0x14c   :  { %4749 = vmatpush1.bf16.msra.mxu0 %v6964_v61  ;;  %4781 = vmatpush1.bf16.msra.mxu1 %v6968_v62 }
 0x14d   :  { %4751 = vmatprep.subr.bf16.mxu0 %v6970_v63  ;;  %4783 = vmatprep.subr.bf16.mxu1 %v6982_v4 }
 0x150   :  { %4753 = vmatpush1.bf16.msra.mxu0 %v7002_v10  ;;  %4785 = vmatpush1.bf16.msra.mxu1 %v7009_v12 }
 0x151   :  { %4755 = vmatprep.subr.bf16.mxu0 %v7011_v13  ;;  %4787 = vmatprep.subr.bf16.mxu1 %v7023_v17 }
 0x154   :  { %4757 = vmatpush1.bf16.msra.mxu0 %v7042_v23  ;;  %4789 = vmatpush1.bf16.msra.mxu1 %v7047_v24 }
 0x155   :  { %4759 = vmatprep.subr.bf16.mxu0 %v7049_v25  ;;  %4791 = vmatprep.subr.bf16.mxu1 %v7061_v29 }
 0x158   :  { %4761 = vmatpush1.bf16.msra.mxu0 %v7079_v35  ;;  %4793 = vmatpush1.bf16.msra.mxu1 %v7083_v36 }
 0x159   :  { %4763 = vmatprep.subr.bf16.mxu0 %v7085_v37  ;;  %4795 = vmatprep.subr.bf16.mxu1 %v7097_v43 }
 0x15c   :  { %4765 = vmatpush1.bf16.msra.mxu0 %v7115_v52  ;;  %4797 = vmatpush1.bf16.msra.mxu1 %v7119_v53 }
 0x15d   :  { %4767 = vmatprep.subr.bf16.mxu0 %v7121_v54  ;;  %4799 = vmatprep.subr.bf16.mxu1 %v7133_v59 }
 0x160   :  { %4769 = vmatpush1.bf16.msra.mxu0 %v7151_v6  ;;  %4801 = vmatpush1.bf16.msra.mxu1 %v7155_v7 }
 0x161   :  { %4771 = vmatprep.subr.bf16.mxu0 %v7157_v8  ;;  %4803 = vmatprep.subr.bf16.mxu1 %v7166_v14 }
 0x164   :  { %4773 = vmatpush1.bf16.msra.mxu0 %v7175_v18  ;;  %4805 = vmatpush1.bf16.msra.mxu1 %v7179_v19 }
 0x165   :  { %4807 = vmatprep.subr.bf16.mxu0 %v6898_v38  ;;  %4839 = vmatprep.subr.bf16.mxu1 %v6909_v42 }
 0x21a   :  { %v593_v20 = vpop.f32.mrb[6].mxu0  ;;  %v664_v26 = vpop.f32.mrb[6].mxu1 }
 0x21b   :  { %v673_v39 = vrot.slane %v593_v20, 6  ;;  %v595_v40 = vpop.f32.mrb[7].mxu0  ;;  %v666_v41 = vpop.f32.mrb[7].mxu1  ;;  %v675_v57 = vrot.slane %v664_v26, 6 }
 0x21c   :  { %v674_v32 = vrot.slane %v595_v40, 6  ;;  %v676_v47 = vrot.slane %v666_v41, 6 }
 0x21d   :  { %v681_v33 = vadd.f32 %v673_v39, %v523_v31  ;;  %v683_v0 = vadd.f32 %v675_v57, %v525_v58  ;;  %v705_v39 = vrot.slane %v7239_v9, 6  ;;  %v712_v57 = vld [vmem:[#allocation2] sm:$0x30] }
 0x21e   :  { %v682_v45 = vadd.f32 %v674_v32, %v524_v44  ;;  %v684_v56 = vadd.f32 %v676_v47, %v526_v48 }
 0x21f   :  { %v4034_v34 = vmul.f32 -1.442695, %v681_v33 }
 0x220   :  { %v4035_v46 = vmul.f32 -1.442695, %v682_v45  ;;  %v4036_v60 = vmul.f32 -1.442695, %v684_v56 }
 0x221   :  { %6393 = vpow2.f32 %v4034_v34 }
 0x222   :  { %6395 = vpow2.f32 %v4035_v46 }
 0x223   :  { %6397 = vpow2.f32 %v4036_v60 }
 0x224   :  { %6399 = vtanh.f32 %v683_v0  ;;  %v713_v0 = vld [vmem:[#allocation2 + $0x8] sm:$0x30] }
 0x22b   :  { %v6394_v1 = vpop.eup %6393 }
 0x22c   :  { %v6396_v2 = vpop.eup %6395  ;;  %v688_v5 = vadd.f32 1.0, %v6394_v1 }
 0x22d   :  { %v694_v11 = vadd.f32 1.0, %v6396_v2  ;;  %v6398_v15 = vpop.eup %6397 }
 0x22e   :  { %6401 = vrcp.f32 %v688_v5  ;;  %v6400_v16 = vpop.eup %6399  ;;  %v701_v31 = vadd.f32 1.0, %v6398_v15  ;;  %v715_v15 = vld [vmem:[#allocation2 + $0x18] sm:$0x30] }
 0x22f   :  { %6403 = vrcp.f32 %v694_v11 }
 0x230   :  { %6405 = vrcp.f32 %v701_v31 }
 0x238   :  { %v6402_v20 = vpop.eup %6401 }
 0x239   :  { %v6404_v40 = vpop.eup %6403  ;;  %v708_v41 = vmul.f32 %v6402_v20, %v6400_v16 }
 0x23a   :  { %v707_v26 = vmul.f32 %v6404_v40, %v705_v39  ;;  %v6406_v33 = vpop.eup %6405  ;;  %v714_v39 = vld [vmem:[#allocation2 + $0x10] sm:$0x30] }
 0x23c   :  { %v7277_v32 = vadd.f32 %v708_v41, %v707_v26 }
 0x23e   :  { %6407 = vtanh.f32 %v7277_v32 }
 0x248   :  { %v6408_v44 = vpop.eup %6407 }
 0x249   :  { %v711_v45 = vmul.f32 %v6408_v44, %v6406_v33 }
 0x24b   :  { %v717_v34 = vrot.slane %v711_v45, 2 }
 0x24d   :  { %784 = vmatmul.mubr.f32.vlgmr.msra.gmra.mrb[8].mxu0 %v717_v34  ;;  %855 = vmatmul.mubr.f32.vlgmr.msra.gmra.mrb[8].mxu1 %v717_v34 }
 0x24e   :  { %4809 = vmatpush1.bf16.msra.mxu0 %v6929_v49  ;;  %4841 = vmatpush1.bf16.msra.mxu1 %v6932_v50 }
 0x24f   :  { %4811 = vmatprep.subr.bf16.mxu0 %v6934_v51  ;;  %4843 = vmatprep.subr.bf16.mxu1 %v6946_v55 }
 0x250   :  { %975 = vmatprep.mubr.f32.mxu0 %v8877_v3  ;;  %1046 = vmatprep.mubr.f32.mxu1 %v8877_v3 }
 0x252   :  { %4813 = vmatpush1.bf16.msra.mxu0 %v6964_v61  ;;  %4845 = vmatpush1.bf16.msra.mxu1 %v6968_v62 }
 0x253   :  { %4815 = vmatprep.subr.bf16.mxu0 %v6970_v63  ;;  %4847 = vmatprep.subr.bf16.mxu1 %v6982_v4 }
 0x256   :  { %4817 = vmatpush1.bf16.msra.mxu0 %v7002_v10  ;;  %4849 = vmatpush1.bf16.msra.mxu1 %v7009_v12 }
 0x257   :  { %4819 = vmatprep.subr.bf16.mxu0 %v7011_v13  ;;  %4851 = vmatprep.subr.bf16.mxu1 %v7023_v17 }
 0x25a   :  { %4821 = vmatpush1.bf16.msra.mxu0 %v7042_v23  ;;  %4853 = vmatpush1.bf16.msra.mxu1 %v7047_v24 }
 0x25b   :  { %4823 = vmatprep.subr.bf16.mxu0 %v7049_v25  ;;  %4855 = vmatprep.subr.bf16.mxu1 %v7061_v29 }
 0x25e   :  { %4825 = vmatpush1.bf16.msra.mxu0 %v7079_v35  ;;  %4857 = vmatpush1.bf16.msra.mxu1 %v7083_v36 }
 0x25f   :  { %4827 = vmatprep.subr.bf16.mxu0 %v7085_v37  ;;  %4859 = vmatprep.subr.bf16.mxu1 %v7097_v43 }
 0x262   :  { %4829 = vmatpush1.bf16.msra.mxu0 %v7115_v52  ;;  %4861 = vmatpush1.bf16.msra.mxu1 %v7119_v53 }
 0x263   :  { %4831 = vmatprep.subr.bf16.mxu0 %v7121_v54  ;;  %4863 = vmatprep.subr.bf16.mxu1 %v7133_v59 }
 0x266   :  { %4833 = vmatpush1.bf16.msra.mxu0 %v7151_v6  ;;  %4865 = vmatpush1.bf16.msra.mxu1 %v7155_v7 }
 0x267   :  { %4835 = vmatprep.subr.bf16.mxu0 %v7157_v8  ;;  %4867 = vmatprep.subr.bf16.mxu1 %v7166_v14 }
 0x26a   :  { %4837 = vmatpush1.bf16.msra.mxu0 %v7175_v18  ;;  %4869 = vmatpush1.bf16.msra.mxu1 %v7179_v19 }
 0x26b   :  { %4871 = vmatprep.subr.bf16.mxu0 %v6898_v38  ;;  %4903 = vmatprep.subr.bf16.mxu1 %v6909_v42 }
 0x320   :  { %v785_v9 = vpop.f32.mrb[8].mxu0  ;;  %v856_v46 = vpop.f32.mrb[8].mxu1 }
 0x321   :  { %v865_v47 = vrot.slane %v785_v9, 4  ;;  %v787_v48 = vpop.f32.mrb[9].mxu0  ;;  %v858_v56 = vpop.f32.mrb[9].mxu1  ;;  %v867_v20 = vrot.slane %v856_v46, 4 }
 0x322   :  { %v866_v58 = vrot.slane %v787_v48, 4  ;;  %v868_v11 = vrot.slane %v858_v56, 4 }
 0x323   :  { %v873_v60 = vadd.f32 %v865_v47, %v712_v57  ;;  %v875_v41 = vadd.f32 %v867_v20, %v714_v39  ;;  %v897_v47 = vrot.slane %v7277_v32, 6  ;;  %v904_v20 = vld [vmem:[#allocation2] sm:$0xc0] }
 0x324   :  { %v874_v1 = vadd.f32 %v866_v58, %v713_v0  ;;  %v876_v16 = vadd.f32 %v868_v11, %v715_v15 }
 0x325   :  { %v4037_v2 = vmul.f32 -1.442695, %v873_v60 }
 0x326   :  { %v4038_v5 = vmul.f32 -1.442695, %v874_v1  ;;  %v4039_v40 = vmul.f32 -1.442695, %v876_v16 }
 0x327   :  { %6409 = vpow2.f32 %v4037_v2 }
 0x328   :  { %6411 = vpow2.f32 %v4038_v5 }
 0x329   :  { %6413 = vpow2.f32 %v4039_v40 }
 0x32a   :  { %6415 = vtanh.f32 %v875_v41  ;;  %v905_v41 = vld [vmem:[#allocation2 + $0x8] sm:$0xc0] }
 0x331   :  { %v6410_v31 = vpop.eup %6409 }
 0x332   :  { %v6412_v26 = vpop.eup %6411  ;;  %v880_v33 = vadd.f32 1.0, %v6410_v31 }
 0x333   :  { %v886_v44 = vadd.f32 1.0, %v6412_v26  ;;  %v6414_v45 = vpop.eup %6413 }
 0x334   :  { %6417 = vrcp.f32 %v880_v33  ;;  %v6416_v34 = vpop.eup %6415  ;;  %v893_v57 = vadd.f32 1.0, %v6414_v45  ;;  %v907_v45 = vld [vmem:[#allocation2 + $0x18] sm:$0xc0] }
 0x335   :  { %6419 = vrcp.f32 %v886_v44 }
 0x336   :  { %6421 = vrcp.f32 %v893_v57 }
 0x33e   :  { %v6418_v9 = vpop.eup %6417 }
 0x33f   :  { %v6420_v48 = vpop.eup %6419  ;;  %v900_v56 = vmul.f32 %v6418_v9, %v6416_v34 }
 0x340   :  { %v899_v46 = vmul.f32 %v6420_v48, %v897_v47  ;;  %v6422_v60 = vpop.eup %6421  ;;  %v906_v47 = vld [vmem:[#allocation2 + $0x10] sm:$0xc0] }
 0x342   :  { %v7315_v58 = vadd.f32 %v900_v56, %v899_v46 }
 0x344   :  { %6423 = vtanh.f32 %v7315_v58 }
 0x34e   :  { %v6424_v0 = vpop.eup %6423 }
 0x34f   :  { %v903_v1 = vmul.f32 %v6424_v0, %v6422_v60 }
 0x351   :  { %v909_v2 = vrot.slane %v903_v1, 4 }
 0x353   :  { %976 = vmatmul.mubr.f32.vlgmr.msra.gmra.mrb[10].mxu0 %v909_v2  ;;  %1047 = vmatmul.mubr.f32.vlgmr.msra.gmra.mrb[10].mxu1 %v909_v2 }
 0x354   :  { %4873 = vmatpush1.bf16.msra.mxu0 %v6929_v49  ;;  %4905 = vmatpush1.bf16.msra.mxu1 %v6932_v50 }
 0x355   :  { %4875 = vmatprep.subr.bf16.mxu0 %v6934_v51  ;;  %4907 = vmatprep.subr.bf16.mxu1 %v6946_v55 }
 0x356   :  { %1167 = vmatprep.mubr.f32.mxu0 %v8877_v3  ;;  %1238 = vmatprep.mubr.f32.mxu1 %v8877_v3 }
 0x358   :  { %4877 = vmatpush1.bf16.msra.mxu0 %v6964_v61  ;;  %4909 = vmatpush1.bf16.msra.mxu1 %v6968_v62 }
 0x359   :  { %4879 = vmatprep.subr.bf16.mxu0 %v6970_v63  ;;  %4911 = vmatprep.subr.bf16.mxu1 %v6982_v4 }
 0x35c   :  { %4881 = vmatpush1.bf16.msra.mxu0 %v7002_v10  ;;  %4913 = vmatpush1.bf16.msra.mxu1 %v7009_v12 }
 0x35d   :  { %4883 = vmatprep.subr.bf16.mxu0 %v7011_v13  ;;  %4915 = vmatprep.subr.bf16.mxu1 %v7023_v17 }
 0x360   :  { %4885 = vmatpush1.bf16.msra.mxu0 %v7042_v23  ;;  %4917 = vmatpush1.bf16.msra.mxu1 %v7047_v24 }
 0x361   :  { %4887 = vmatprep.subr.bf16.mxu0 %v7049_v25  ;;  %4919 = vmatprep.subr.bf16.mxu1 %v7061_v29 }
 0x364   :  { %4889 = vmatpush1.bf16.msra.mxu0 %v7079_v35  ;;  %4921 = vmatpush1.bf16.msra.mxu1 %v7083_v36 }
 0x365   :  { %4891 = vmatprep.subr.bf16.mxu0 %v7085_v37  ;;  %4923 = vmatprep.subr.bf16.mxu1 %v7097_v43 }
 0x368   :  { %4893 = vmatpush1.bf16.msra.mxu0 %v7115_v52  ;;  %4925 = vmatpush1.bf16.msra.mxu1 %v7119_v53 }
 0x369   :  { %4895 = vmatprep.subr.bf16.mxu0 %v7121_v54  ;;  %4927 = vmatprep.subr.bf16.mxu1 %v7133_v59 }
 0x36c   :  { %4897 = vmatpush1.bf16.msra.mxu0 %v7151_v6  ;;  %4929 = vmatpush1.bf16.msra.mxu1 %v7155_v7 }
 0x36d   :  { %4899 = vmatprep.subr.bf16.mxu0 %v7157_v8  ;;  %4931 = vmatprep.subr.bf16.mxu1 %v7166_v14 }
 0x370   :  { %4901 = vmatpush1.bf16.msra.mxu0 %v7175_v18  ;;  %4933 = vmatpush1.bf16.msra.mxu1 %v7179_v19 }
 0x371   :  { %4935 = vmatprep.subr.bf16.mxu0 %v6898_v38  ;;  %4967 = vmatprep.subr.bf16.mxu1 %v6909_v42 }
 0x426   :  { %v977_v32 = vpop.f32.mrb[10].mxu0  ;;  %v1048_v5 = vpop.f32.mrb[10].mxu1 }
 0x427   :  { %v1057_v11 = vrot.slane %v977_v32, 2  ;;  %v979_v15 = vpop.f32.mrb[11].mxu0  ;;  %v1050_v16 = vpop.f32.mrb[11].mxu1  ;;  %v1059_v9 = vrot.slane %v1048_v5, 2 }
 0x428   :  { %v1058_v39 = vrot.slane %v979_v15, 2  ;;  %v1060_v44 = vrot.slane %v1050_v16, 2 }
 0x429   :  { %v1065_v40 = vadd.f32 %v1057_v11, %v904_v20  ;;  %v1067_v56 = vadd.f32 %v1059_v9, %v906_v47  ;;  %v1089_v11 = vrot.slane %v7315_v58, 6  ;;  %v1096_v58 = vld [vmem:[#allocation2 + $0x20] sm:$0x3] }
 0x42a   :  { %v1066_v31 = vadd.f32 %v1058_v39, %v905_v41  ;;  %v1068_v34 = vadd.f32 %v1060_v44, %v907_v45 }
 0x42b   :  { %v4040_v26 = vmul.f32 -1.442695, %v1065_v40 }
 0x42c   :  { %v4041_v33 = vmul.f32 -1.442695, %v1066_v31  ;;  %v4042_v48 = vmul.f32 -1.442695, %v1068_v34  ;;  %v1097_v34 = vld [vmem:[#allocation2 + $0x28] sm:$0x3] }
 0x42d   :  { %6425 = vpow2.f32 %v4040_v26 }
 0x42e   :  { %6427 = vpow2.f32 %v4041_v33 }
 0x42f   :  { %6429 = vpow2.f32 %v4042_v48 }
 0x430   :  { %6431 = vtanh.f32 %v1067_v56 }
 0x437   :  { %v6426_v57 = vpop.eup %6425 }
 0x438   :  { %v6428_v46 = vpop.eup %6427  ;;  %v1072_v60 = vadd.f32 1.0, %v6426_v57 }
 0x439   :  { %v1078_v0 = vadd.f32 1.0, %v6428_v46  ;;  %v6430_v1 = vpop.eup %6429  ;;  %v1099_v46 = vld [vmem:[#allocation2 + $0x38] sm:$0x3] }
 0x43a   :  { %6433 = vrcp.f32 %v1072_v60  ;;  %v6432_v2 = vpop.eup %6431  ;;  %v1085_v20 = vadd.f32 1.0, %v6430_v1 }
 0x43b   :  { %6435 = vrcp.f32 %v1078_v0  ;;  %v1098_v0 = vld [vmem:[#allocation2 + $0x30] sm:$0x3] }
 0x43c   :  { %6437 = vrcp.f32 %v1085_v20 }
 0x444   :  { %v6434_v32 = vpop.eup %6433 }
 0x445   :  { %v6436_v15 = vpop.eup %6435  ;;  %v1092_v16 = vmul.f32 %v6434_v32, %v6432_v2 }
 0x446   :  { %v1091_v5 = vmul.f32 %v6436_v15, %v1089_v11  ;;  %v6438_v40 = vpop.eup %6437 }
 0x448   :  { %v7353_v39 = vadd.f32 %v1092_v16, %v1091_v5 }
 0x44a   :  { %6439 = vtanh.f32 %v7353_v39 }
 0x454   :  { %v6440_v41 = vpop.eup %6439 }
 0x455   :  { %v1095_v31 = vmul.f32 %v6440_v41, %v6438_v40  ;;  %v1269_v41 = vrot.slane %v7353_v39, 6 }
 0x457   :  { %v1101_v26 = vrot.slane %v1095_v31, 6 }
 0x459   :  { %1168 = vmatmul.mubr.f32.vlgmr.msra.gmra.mrb[12].mxu0 %v1101_v26  ;;  %1239 = vmatmul.mubr.f32.vlgmr.msra.gmra.mrb[12].mxu1 %v1101_v26 }
 0x45a   :  { %4937 = vmatpush1.bf16.msra.mxu0 %v6929_v49  ;;  %4969 = vmatpush1.bf16.msra.mxu1 %v6932_v50 }
 0x45b   :  { %4939 = vmatprep.subr.bf16.mxu0 %v6934_v51  ;;  %4971 = vmatprep.subr.bf16.mxu1 %v6946_v55 }
 0x45c   :  { %1344 = vmatprep.mubr.f32.mxu0 %v8877_v3  ;;  %1415 = vmatprep.mubr.f32.mxu1 %v8877_v3 }
 0x45e   :  { %4941 = vmatpush1.bf16.msra.mxu0 %v6964_v61  ;;  %4973 = vmatpush1.bf16.msra.mxu1 %v6968_v62 }
 0x45f   :  { %4943 = vmatprep.subr.bf16.mxu0 %v6970_v63  ;;  %4975 = vmatprep.subr.bf16.mxu1 %v6982_v4 }
 0x462   :  { %4945 = vmatpush1.bf16.msra.mxu0 %v7002_v10  ;;  %4977 = vmatpush1.bf16.msra.mxu1 %v7009_v12 }
 0x463   :  { %4947 = vmatprep.subr.bf16.mxu0 %v7011_v13  ;;  %4979 = vmatprep.subr.bf16.mxu1 %v7023_v17 }
 0x466   :  { %4949 = vmatpush1.bf16.msra.mxu0 %v7042_v23  ;;  %4981 = vmatpush1.bf16.msra.mxu1 %v7047_v24 }
 0x467   :  { %4951 = vmatprep.subr.bf16.mxu0 %v7049_v25  ;;  %4983 = vmatprep.subr.bf16.mxu1 %v7061_v29 }
 0x46a   :  { %4953 = vmatpush1.bf16.msra.mxu0 %v7079_v35  ;;  %4985 = vmatpush1.bf16.msra.mxu1 %v7083_v36 }
 0x46b   :  { %4955 = vmatprep.subr.bf16.mxu0 %v7085_v37  ;;  %4987 = vmatprep.subr.bf16.mxu1 %v7097_v43 }
 0x46e   :  { %4957 = vmatpush1.bf16.msra.mxu0 %v7115_v52  ;;  %4989 = vmatpush1.bf16.msra.mxu1 %v7119_v53 }
 0x46f   :  { %4959 = vmatprep.subr.bf16.mxu0 %v7121_v54  ;;  %4991 = vmatprep.subr.bf16.mxu1 %v7133_v59 }
 0x472   :  { %4961 = vmatpush1.bf16.msra.mxu0 %v7151_v6  ;;  %4993 = vmatpush1.bf16.msra.mxu1 %v7155_v7 }
 0x473   :  { %4963 = vmatprep.subr.bf16.mxu0 %v7157_v8  ;;  %4995 = vmatprep.subr.bf16.mxu1 %v7166_v14 }
 0x476   :  { %4965 = vmatpush1.bf16.msra.mxu0 %v7175_v18  ;;  %4997 = vmatpush1.bf16.msra.mxu1 %v7179_v19 }
 0x477   :  { %4999 = vmatprep.subr.bf16.mxu0 %v6898_v38  ;;  %5031 = vmatprep.subr.bf16.mxu1 %v6909_v42 }
 0x52c   :  { %v1169_v33 = vpop.f32.mrb[12].mxu0  ;;  %v1240_v44 = vpop.f32.mrb[12].mxu1 }
 0x52d   :  { %v1245_v45 = vadd.f32 %v1169_v33, %v1096_v58  ;;  %v1171_v9 = vpop.f32.mrb[13].mxu0  ;;  %v1242_v47 = vpop.f32.mrb[13].mxu1  ;;  %v1247_v2 = vadd.f32 %v1240_v44, %v1098_v0 }
 0x52e   :  { %v1246_v48 = vadd.f32 %v1171_v9, %v1097_v34  ;;  %v1248_v60 = vadd.f32 %v1242_v47, %v1099_v46  ;;  %v1276_v46 = vld [vmem:[#allocation2 + $0x20] sm:$0xc] }
 0x52f   :  { %v4043_v56 = vmul.f32 -1.442695, %v1245_v45 }
 0x530   :  { %v4044_v57 = vmul.f32 -1.442695, %v1246_v48  ;;  %v4045_v1 = vmul.f32 -1.442695, %v1248_v60 }
 0x531   :  { %6441 = vpow2.f32 %v4043_v56 }
 0x532   :  { %6443 = vpow2.f32 %v4044_v57 }
 0x533   :  { %6445 = vpow2.f32 %v4045_v1  ;;  %v1277_v1 = vld [vmem:[#allocation2 + $0x28] sm:$0xc] }
 0x534   :  { %6447 = vtanh.f32 %v1247_v2 }
 0x53b   :  { %v6442_v32 = vpop.eup %6441 }
 0x53c   :  { %v6444_v11 = vpop.eup %6443  ;;  %v1252_v15 = vadd.f32 1.0, %v6442_v32 }
 0x53d   :  { %v1258_v16 = vadd.f32 1.0, %v6444_v11  ;;  %v6446_v20 = vpop.eup %6445 }
 0x53e   :  { %6449 = vrcp.f32 %v1252_v15  ;;  %v6448_v5 = vpop.eup %6447  ;;  %v1265_v58 = vadd.f32 1.0, %v6446_v20 }
 0x53f   :  { %6451 = vrcp.f32 %v1258_v16  ;;  %v1279_v16 = vld [vmem:[#allocation2 + $0x38] sm:$0xc] }
 0x540   :  { %6453 = vrcp.f32 %v1265_v58 }
 0x548   :  { %v6450_v40 = vpop.eup %6449 }
 0x549   :  { %v6452_v31 = vpop.eup %6451  ;;  %v1272_v26 = vmul.f32 %v6450_v40, %v6448_v5  ;;  %v1278_v5 = vld [vmem:[#allocation2 + $0x30] sm:$0xc] }
 0x54a   :  { %v1271_v33 = vmul.f32 %v6452_v31, %v1269_v41  ;;  %v6454_v44 = vpop.eup %6453 }
 0x54c   :  { %v7391_v45 = vadd.f32 %v1272_v26, %v1271_v33 }
 0x54e   :  { %6455 = vtanh.f32 %v7391_v45 }
 0x558   :  { %v6456_v34 = vpop.eup %6455 }
 0x559   :  { %v1275_v9 = vmul.f32 %v6456_v34, %v6454_v44 }
 0x55b   :  { %1345 = vmatmul.mubr.f32.vlgmr.msra.gmra.mrb[14].mxu0 %v1275_v9  ;;  %1416 = vmatmul.mubr.f32.vlgmr.msra.gmra.mrb[14].mxu1 %v1275_v9  ;;  %v1458_v9 = vrot.slane %v7391_v45, 6 }
 0x55c   :  { %5001 = vmatpush1.bf16.msra.mxu0 %v6929_v49  ;;  %5033 = vmatpush1.bf16.msra.mxu1 %v6932_v50 }
 0x55d   :  { %5003 = vmatprep.subr.bf16.mxu0 %v6934_v51  ;;  %5035 = vmatprep.subr.bf16.mxu1 %v6946_v55 }
 0x55e   :  { %1536 = vmatprep.mubr.f32.mxu0 %v8877_v3  ;;  %1607 = vmatprep.mubr.f32.mxu1 %v8877_v3 }
 0x560   :  { %5005 = vmatpush1.bf16.msra.mxu0 %v6964_v61  ;;  %5037 = vmatpush1.bf16.msra.mxu1 %v6968_v62 }
 0x561   :  { %5007 = vmatprep.subr.bf16.mxu0 %v6970_v63  ;;  %5039 = vmatprep.subr.bf16.mxu1 %v6982_v4 }
 0x564   :  { %5009 = vmatpush1.bf16.msra.mxu0 %v7002_v10  ;;  %5041 = vmatpush1.bf16.msra.mxu1 %v7009_v12 }
 0x565   :  { %5011 = vmatprep.subr.bf16.mxu0 %v7011_v13  ;;  %5043 = vmatprep.subr.bf16.mxu1 %v7023_v17 }
 0x568   :  { %5013 = vmatpush1.bf16.msra.mxu0 %v7042_v23  ;;  %5045 = vmatpush1.bf16.msra.mxu1 %v7047_v24 }
 0x569   :  { %5015 = vmatprep.subr.bf16.mxu0 %v7049_v25  ;;  %5047 = vmatprep.subr.bf16.mxu1 %v7061_v29 }
 0x56c   :  { %5017 = vmatpush1.bf16.msra.mxu0 %v7079_v35  ;;  %5049 = vmatpush1.bf16.msra.mxu1 %v7083_v36 }
 0x56d   :  { %5019 = vmatprep.subr.bf16.mxu0 %v7085_v37  ;;  %5051 = vmatprep.subr.bf16.mxu1 %v7097_v43 }
 0x570   :  { %5021 = vmatpush1.bf16.msra.mxu0 %v7115_v52  ;;  %5053 = vmatpush1.bf16.msra.mxu1 %v7119_v53 }
 0x571   :  { %5023 = vmatprep.subr.bf16.mxu0 %v7121_v54  ;;  %5055 = vmatprep.subr.bf16.mxu1 %v7133_v59 }
 0x574   :  { %5025 = vmatpush1.bf16.msra.mxu0 %v7151_v6  ;;  %5057 = vmatpush1.bf16.msra.mxu1 %v7155_v7 }
 0x575   :  { %5027 = vmatprep.subr.bf16.mxu0 %v7157_v8  ;;  %5059 = vmatprep.subr.bf16.mxu1 %v7166_v14 }
 0x578   :  { %5029 = vmatpush1.bf16.msra.mxu0 %v7175_v18  ;;  %5061 = vmatpush1.bf16.msra.mxu1 %v7179_v19 }
 0x579   :  { %5063 = vmatprep.subr.bf16.mxu0 %v6898_v38  ;;  %5095 = vmatprep.subr.bf16.mxu1 %v6909_v42 }
 0x62e   :  { %v1346_v39 = vpop.f32.mrb[14].mxu0  ;;  %v1417_v47 = vpop.f32.mrb[14].mxu1 }
 0x62f   :  { %v1426_v48 = vrot.slane %v1346_v39, 6  ;;  %v1348_v56 = vpop.f32.mrb[15].mxu0  ;;  %v1419_v57 = vpop.f32.mrb[15].mxu1  ;;  %v1428_v38 = vrot.slane %v1417_v47, 6 }
 0x630   :  { %v1427_v60 = vrot.slane %v1348_v56, 6  ;;  %v1429_v15 = vrot.slane %v1419_v57, 6 }
 0x631   :  { %v1434_v0 = vadd.f32 %v1426_v48, %v1276_v46  ;;  %v1436_v40 = vadd.f32 %v1428_v38, %v1278_v5  ;;  %v1853_v38 = vld [vmem:[%s8866_s4 + $0x20] sm:$0xff] }
 0x632   :  { %v1435_v2 = vadd.f32 %v1427_v60, %v1277_v1  ;;  %v1437_v20 = vadd.f32 %v1429_v15, %v1279_v16 }
 0x633   :  { %v4046_v32 = vmul.f32 -1.442695, %v1434_v0 }
 0x634   :  { %v4047_v11 = vmul.f32 -1.442695, %v1435_v2  ;;  %v4048_v42 = vmul.f32 -1.442695, %v1437_v20  ;;  %v1849_v20 = vld [vmem:[%s8866_s4] sm:$0xff] }
 0x635   :  { %6457 = vpow2.f32 %v4046_v32 }
 0x636   :  { %6459 = vpow2.f32 %v4047_v11 }
 0x637   :  { %6461 = vpow2.f32 %v4048_v42  ;;  %v1858_v42 = vld [vmem:[%s8866_s4 + $0x48] sm:$0xff] }
 0x638   :  { %6463 = vtanh.f32 %v1436_v40  ;;  %v1862_v40 = vld [vmem:[%s8866_s4 + $0x68] sm:$0xff] }
 0x63f   :  { %v6458_v41 = vpop.eup %6457 }
 0x640   :  { %v6460_v31 = vpop.eup %6459  ;;  %v1441_v26 = vadd.f32 1.0, %v6458_v41 }
 0x641   :  { %v1447_v58 = vadd.f32 1.0, %v6460_v31  ;;  %v6462_v33 = vpop.eup %6461  ;;  %v7489_v31 = vpack.c.bf16 %v1853_v38, %v1849_v20  ;;  %v1897_v38 = vld [vmem:[%s8866_s4 + $0x180] sm:$0xff] }
 0x642   :  { %6465 = vrcp.f32 %v1441_v26  ;;  %v6464_v44 = vpop.eup %6463  ;;  %v1454_v56 = vadd.f32 1.0, %v6462_v33  ;;  %v1857_v33 = vld [vmem:[%s8866_s4 + $0x40] sm:$0xff] }
 0x643   :  { %6467 = vrcp.f32 %v1447_v58  ;;  %v7491_v58 = vpack.c.bf16 %v1862_v40, %v1858_v42  ;;  %v1876_v40 = vld [vmem:[%s8866_s4 + $0xd8] sm:$0xff] }
 0x644   :  { %6469 = vrcp.f32 %v1454_v56  ;;  %v1865_v56 = vld [vmem:[%s8866_s4 + $0x80] sm:$0xff] }
 0x64c   :  { %v6466_v34 = vpop.eup %6465 }
 0x64d   :  { %v6468_v39 = vpop.eup %6467  ;;  %v1461_v48 = vmul.f32 %v6466_v34, %v6464_v44  ;;  %v1861_v44 = vld [vmem:[%s8866_s4 + $0x60] sm:$0xff]  ;;  %v1866_v34 = vld [vmem:[%s8866_s4 + $0x88] sm:$0xff] }
 0x64e   :  { %v1460_v47 = vmul.f32 %v6468_v39, %v1458_v9  ;;  %v6470_v46 = vpop.eup %6469  ;;  %v1870_v9 = vld [vmem:[%s8866_s4 + $0xa8] sm:$0xff]  ;;  %v7506_v39 = vpack.c.bf16 %v1861_v44, %v1857_v33  ;;  %v1875_v33 = vld [vmem:[%s8866_s4 + $0xd0] sm:$0xff] }
 0x64f   :  { %v1879_v44 = vld [vmem:[%s8866_s4 + $0xf0] sm:$0xff] }
 0x650   :  { %v7429_v57 = vadd.f32 %v1461_v48, %v1460_v47  ;;  %v7509_v48 = vpack.c.bf16 %v1870_v9, %v1866_v34  ;;  %v1869_v47 = vld [vmem:[%s8866_s4 + $0xa0] sm:$0xff]  ;;  %v7662_v34 = vpack.c.bf16 %v1879_v44, %v1875_v33  ;;  %v1906_v9 = vld [vmem:[%s8866_s4 + $0x1c8] sm:$0xff]  ;;  %v1899_v33 = vld [vmem:[%s8866_s4 + $0x190] sm:$0xff] }
 0x651   :  { %v1903_v44 = vld [vmem:[%s8866_s4 + $0x1b0] sm:$0xff] }
 0x652   :  { %6471 = vtanh.f32 %v7429_v57 }
 0x65c   :  { %v6472_v60 = vpop.eup %6471 }
 0x65d   :  { %v1464_v0 = vmul.f32 %v6472_v60, %v6470_v46  ;;  %v1874_v46 = vld [vmem:[%s8866_s4 + $0xc8] sm:$0xff] }
 0x65e   :  { %v1878_v60 = vld [vmem:[%s8866_s4 + $0xe8] sm:$0xff] }
 0x65f   :  { %v1470_v1 = vrot.slane %v1464_v0, 2  ;;  %v7528_v0 = vpack.c.bf16 %v1878_v60, %v1874_v46  ;;  %v1905_v46 = vld [vmem:[%s8866_s4 + $0x1c0] sm:$0xff] }
 0x660   :  { %v1909_v60 = vld [vmem:[%s8866_s4 + $0x1e0] sm:$0xff] }
 0x661   :  { %1537 = vmatmul.mubr.f32.vlgmr.msra.gmra.mrb[16].mxu0 %v1470_v1  ;;  %1608 = vmatmul.mubr.f32.vlgmr.msra.gmra.mrb[16].mxu1 %v1470_v1  ;;  %v1873_v1 = vld [vmem:[%s8866_s4 + $0xc0] sm:$0xff] }
 0x662   :  { %5065 = vmatpush1.bf16.msra.mxu0 %v6929_v49  ;;  %5097 = vmatpush1.bf16.msra.mxu1 %v6932_v50  ;;  %v1850_v49 = vld [vmem:[%s8866_s4 + $0x8] sm:$0xff] }
 0x663   :  { %5067 = vmatprep.subr.bf16.mxu0 %v6934_v51  ;;  %5099 = vmatprep.subr.bf16.mxu1 %v6946_v55  ;;  %v1854_v50 = vld [vmem:[%s8866_s4 + $0x28] sm:$0xff] }
 0x664   :  { %1728 = vmatprep.mubr.f32.mxu0 %v8877_v3  ;;  %1799 = vmatprep.mubr.f32.mxu1 %v8877_v3  ;;  %v7470_v51 = vpack.c.bf16 %v1854_v50, %v1850_v49  ;;  %v1877_v49 = vld [vmem:[%s8866_s4 + $0xe0] sm:$0xff] }
 0x665   :  { %v7536_v50 = vpack.c.bf16 %v1877_v49, %v1873_v1  ;;  %v7680_v1 = vpack.c.bf16 %v1909_v60, %v1905_v46  ;;  %v1884_v49 = vld [vmem:[%s8866_s4 + $0x118] sm:$0xff]  ;;  %v1934_v46 = vld [vmem:[%s8866_s4 + $0x2a8] sm:$0xff] }
 0x666   :  { %5069 = vmatpush1.bf16.msra.mxu0 %v6964_v61  ;;  %5101 = vmatpush1.bf16.msra.mxu1 %v6968_v62  ;;  %8993 = vst [vmem:[#allocation4_spill] sm:$0xff] %v7470_v51 }
 0x667   :  { %5071 = vmatprep.subr.bf16.mxu0 %v6970_v63  ;;  %5103 = vmatprep.subr.bf16.mxu1 %v6982_v4  ;;  %8994 = vst [vmem:[#allocation5_spill] sm:$0xff] %v7536_v50  ;;  %9003 = vst [vmem:[#allocation14_spill] sm:$0xff] %v7680_v1 }
 0x66a   :  { %5073 = vmatpush1.bf16.msra.mxu0 %v7002_v10  ;;  %5105 = vmatpush1.bf16.msra.mxu1 %v7009_v12  ;;  %v1465_v10 = vld [vmem:[#allocation2 + $0x20] sm:$0x30] }
 0x66b   :  { %5075 = vmatprep.subr.bf16.mxu0 %v7011_v13  ;;  %5107 = vmatprep.subr.bf16.mxu1 %v7023_v17  ;;  %v1466_v17 = vld [vmem:[#allocation2 + $0x28] sm:$0x30] }
 0x66e   :  { %5077 = vmatpush1.bf16.msra.mxu0 %v7042_v23  ;;  %5109 = vmatpush1.bf16.msra.mxu1 %v7047_v24 }
 0x66f   :  { %5079 = vmatprep.subr.bf16.mxu0 %v7049_v25  ;;  %5111 = vmatprep.subr.bf16.mxu1 %v7061_v29 }
 0x672   :  { %5081 = vmatpush1.bf16.msra.mxu0 %v7079_v35  ;;  %5113 = vmatpush1.bf16.msra.mxu1 %v7083_v36  ;;  %v1468_v35 = vld [vmem:[#allocation2 + $0x38] sm:$0x30] }
 0x673   :  { %5083 = vmatprep.subr.bf16.mxu0 %v7085_v37  ;;  %5115 = vmatprep.subr.bf16.mxu1 %v7097_v43  ;;  %v1467_v43 = vld [vmem:[#allocation2 + $0x30] sm:$0x30] }
 0x676   :  { %5085 = vmatpush1.bf16.msra.mxu0 %v7115_v52  ;;  %5117 = vmatpush1.bf16.msra.mxu1 %v7119_v53 }
 0x677   :  { %5087 = vmatprep.subr.bf16.mxu0 %v7121_v54  ;;  %5119 = vmatprep.subr.bf16.mxu1 %v7133_v59 }
 0x67a   :  { %5089 = vmatpush1.bf16.msra.mxu0 %v7151_v6  ;;  %5121 = vmatpush1.bf16.msra.mxu1 %v7155_v7 }
 0x67b   :  { %5091 = vmatprep.subr.bf16.mxu0 %v7157_v8  ;;  %5123 = vmatprep.subr.bf16.mxu1 %v7166_v14 }
 0x67e   :  { %5093 = vmatpush1.bf16.msra.mxu0 %v7175_v18  ;;  %5125 = vmatpush1.bf16.msra.mxu1 %v7179_v19  ;;  %v1650_v19 = vrot.slane %v7429_v57, 6  ;;  %v7518_v57 = vpack.c.bf16 %v1869_v47, %v1865_v56  ;;  %v1910_v56 = vld [vmem:[%s8866_s4 + $0x1e8] sm:$0xff] }
 0x67f   :  { %5127 = vmatprep.subr.bf16.mxu0 %v7470_v51  ;;  %v7671_v47 = vpack.c.bf16 %v1910_v56, %v1906_v9  ;;  %v7770_v9 = vpack.c.bf16 %v1903_v44, %v1899_v33  ;;  %v1930_v56 = vld [vmem:[%s8866_s4 + $0x288] sm:$0xff]  ;;  %v1915_v33 = vld [vmem:[%s8866_s4 + $0x210] sm:$0xff] }
 0x680   :  { %v7779_v60 = vpack.c.bf16 %v1934_v46, %v1930_v56  ;;  %v1919_v44 = vld [vmem:[%s8866_s4 + $0x230] sm:$0xff]  ;;  %v1946_v56 = vld [vmem:[%s8866_s4 + $0x308] sm:$0xff] }
 0x681   :  { %9002 = vst [vmem:[#allocation13_spill] sm:$0xff] %v7671_v47  ;;  %9011 = vst [vmem:[#allocation22_spill] sm:$0xff] %v7770_v9  ;;  %v7844_v46 = vpack.c.bf16 %v1919_v44, %v1915_v33 }
 0x682   :  { %9012 = vst [vmem:[#allocation23_spill] sm:$0xff] %v7779_v60 }
 0x683   :  { %9019 = vst [vmem:[#allocation30_spill] sm:$0xff] %v7844_v46 }
 0x734   :  { %v1538_v55 = vpop.f32.mrb[16].mxu0  ;;  %v1609_v61 = vpop.f32.mrb[16].mxu1 }
 0x735   :  { %v1618_v62 = vrot.slane %v1538_v55, 4  ;;  %v1540_v63 = vpop.f32.mrb[17].mxu0  ;;  %v1611_v4 = vpop.f32.mrb[17].mxu1  ;;  %v1620_v37 = vrot.slane %v1609_v61, 4  ;;  %v1852_v55 = vld [vmem:[%s8866_s4 + $0x18] sm:$0xff] }
 0x736   :  { %v1619_v12 = vrot.slane %v1540_v63, 4  ;;  %v1621_v29 = vrot.slane %v1611_v4, 4  ;;  %v1856_v61 = vld [vmem:[%s8866_s4 + $0x38] sm:$0xff]  ;;  %v1851_v63 = vld [vmem:[%s8866_s4 + $0x10] sm:$0xff] }
 0x737   :  { %v1626_v13 = vadd.f32 %v1618_v62, %v1465_v10  ;;  %v1628_v53 = vadd.f32 %v1620_v37, %v1467_v43  ;;  %v7545_v62 = vpack.c.bf16 %v1856_v61, %v1852_v55  ;;  %v1855_v4 = vld [vmem:[%s8866_s4 + $0x30] sm:$0xff]  ;;  %v1888_v55 = vld [vmem:[%s8866_s4 + $0x138] sm:$0xff] }
 0x738   :  { %v1627_v23 = vadd.f32 %v1619_v12, %v1466_v17  ;;  %v1629_v36 = vadd.f32 %v1621_v29, %v1468_v35  ;;  %v7554_v10 = vpack.c.bf16 %v1855_v4, %v1851_v63  ;;  %v1882_v12 = vld [vmem:[%s8866_s4 + $0x108] sm:$0xff]  ;;  %v1860_v29 = vld [vmem:[%s8866_s4 + $0x58] sm:$0xff]  ;;  %v1859_v37 = vld [vmem:[%s8866_s4 + $0x50] sm:$0xff]  ;;  %v7689_v61 = vpack.c.bf16 %v1888_v55, %v1884_v49 }
 0x739   :  { %v4049_v24 = vmul.f32 -1.442695, %v1626_v13  ;;  %8995 = vst [vmem:[#allocation6_spill] sm:$0xff] %v7545_v62  ;;  %v1886_v13 = vld [vmem:[%s8866_s4 + $0x128] sm:$0xff]  ;;  %5191 = vmatprep.subr.bf16.mxu1 %v7545_v62  ;;  %v1864_v35 = vld [vmem:[%s8866_s4 + $0x78] sm:$0xff]  ;;  %v1863_v43 = vld [vmem:[%s8866_s4 + $0x70] sm:$0xff] }
 0x73a   :  { %v4050_v25 = vmul.f32 -1.442695, %v1627_v23  ;;  %v4051_v52 = vmul.f32 -1.442695, %v1629_v36  ;;  %v7563_v17 = vpack.c.bf16 %v1886_v13, %v1882_v12  ;;  %v1881_v23 = vld [vmem:[%s8866_s4 + $0x100] sm:$0xff]  ;;  %v7581_v36 = vpack.c.bf16 %v1864_v35, %v1860_v29  ;;  %v1883_v63 = vld [vmem:[%s8866_s4 + $0x110] sm:$0xff] }
 0x73b   :  { %6473 = vpow2.f32 %v4049_v24  ;;  %v1885_v24 = vld [vmem:[%s8866_s4 + $0x120] sm:$0xff]  ;;  %v1887_v4 = vld [vmem:[%s8866_s4 + $0x130] sm:$0xff]  ;;  %v1914_v13 = vld [vmem:[%s8866_s4 + $0x208] sm:$0xff] }
 0x73c   :  { %6475 = vpow2.f32 %v4050_v25  ;;  %8996 = vst [vmem:[#allocation7_spill] sm:$0xff] %v7563_v17  ;;  %v7572_v25 = vpack.c.bf16 %v1885_v24, %v1881_v23  ;;  %v7698_v12 = vpack.c.bf16 %v1887_v4, %v1883_v63  ;;  %v1918_v23 = vld [vmem:[%s8866_s4 + $0x228] sm:$0xff]  ;;  %v1913_v29 = vld [vmem:[%s8866_s4 + $0x200] sm:$0xff]  ;;  %v1908_v4 = vld [vmem:[%s8866_s4 + $0x1d8] sm:$0xff] }
 0x73d   :  { %6477 = vpow2.f32 %v4051_v52  ;;  %v7590_v52 = vpack.c.bf16 %v1863_v43, %v1859_v37  ;;  %v7707_v24 = vpack.c.bf16 %v1918_v23, %v1914_v13  ;;  %v1917_v35 = vld [vmem:[%s8866_s4 + $0x220] sm:$0xff]  ;;  %v1892_v43 = vld [vmem:[%s8866_s4 + $0x158] sm:$0xff] }
 0x73e   :  { %6479 = vtanh.f32 %v1628_v53  ;;  %8997 = vst [vmem:[#allocation8_spill] sm:$0xff] %v7572_v25  ;;  %v1890_v53 = vld [vmem:[%s8866_s4 + $0x148] sm:$0xff]  ;;  %v7716_v37 = vpack.c.bf16 %v1917_v35, %v1913_v29  ;;  %v1929_v49 = vld [vmem:[%s8866_s4 + $0x280] sm:$0xff]  ;;  %v1912_v13 = vld [vmem:[%s8866_s4 + $0x1f8] sm:$0xff] }
 0x73f   :  { %9004 = vst [vmem:[#allocation15_spill] sm:$0xff] %v7707_v24  ;;  %v1933_v55 = vld [vmem:[%s8866_s4 + $0x2a0] sm:$0xff]  ;;  %v7797_v23 = vpack.c.bf16 %v1912_v13, %v1908_v4  ;;  %v1907_v29 = vld [vmem:[%s8866_s4 + $0x1d0] sm:$0xff] }
 0x740   :  { %9005 = vst [vmem:[#allocation16_spill] sm:$0xff] %v7716_v37  ;;  %v7788_v63 = vpack.c.bf16 %v1933_v55, %v1929_v49  ;;  %v1911_v35 = vld [vmem:[%s8866_s4 + $0x1f0] sm:$0xff]  ;;  %v1950_v49 = vld [vmem:[%s8866_s4 + $0x328] sm:$0xff]  ;;  %v1945_v55 = vld [vmem:[%s8866_s4 + $0x300] sm:$0xff] }
 0x741   :  { %9014 = vst [vmem:[#allocation25_spill] sm:$0xff] %v7797_v23  ;;  %v1949_v4 = vld [vmem:[%s8866_s4 + $0x320] sm:$0xff]  ;;  %v7857_v13 = vpack.c.bf16 %v1950_v49, %v1946_v56 }
 0x742   :  { %9013 = vst [vmem:[#allocation24_spill] sm:$0xff] %v7788_v63  ;;  %v1953_v56 = vld [vmem:[%s8866_s4 + $0x340] sm:$0xff] }
 0x743   :  { %9020 = vst [vmem:[#allocation31_spill] sm:$0xff] %v7857_v13  ;;  %v1957_v49 = vld [vmem:[%s8866_s4 + $0x360] sm:$0xff] }
 0x745   :  { %v6474_v54 = vpop.eup %6473 }
 0x746   :  { %v6476_v59 = vpop.eup %6475  ;;  %v1633_v6 = vadd.f32 1.0, %v6474_v54  ;;  %v1894_v54 = vld [vmem:[%s8866_s4 + $0x168] sm:$0xff] }
 0x747   :  { %v1639_v7 = vadd.f32 1.0, %v6476_v59  ;;  %v6478_v8 = vpop.eup %6477  ;;  %v7599_v59 = vpack.c.bf16 %v1894_v54, %v1890_v53  ;;  %v1896_v53 = vld [vmem:[%s8866_s4 + $0x178] sm:$0xff] }
 0x748   :  { %6481 = vrcp.f32 %v1633_v6  ;;  %v6480_v14 = vpop.eup %6479  ;;  %v1646_v32 = vadd.f32 1.0, %v6478_v8  ;;  %v1889_v6 = vld [vmem:[%s8866_s4 + $0x140] sm:$0xff]  ;;  %v7725_v54 = vpack.c.bf16 %v1896_v53, %v1892_v43  ;;  %v7806_v43 = vpack.c.bf16 %v1911_v35, %v1907_v29  ;;  %v1938_v53 = vld [vmem:[%s8866_s4 + $0x2c8] sm:$0xff]  ;;  %v1924_v35 = vld [vmem:[%s8866_s4 + $0x258] sm:$0xff] }
 0x749   :  { %6483 = vrcp.f32 %v1639_v7  ;;  %8998 = vst [vmem:[#allocation9_spill] sm:$0xff] %v7599_v59  ;;  %v1893_v7 = vld [vmem:[%s8866_s4 + $0x160] sm:$0xff]  ;;  %v7859_v29 = vpack.c.bf16 %v1949_v4, %v1945_v55  ;;  %v1932_v55 = vld [vmem:[%s8866_s4 + $0x298] sm:$0xff] }
 0x74a   :  { %6485 = vrcp.f32 %v1646_v32  ;;  %v7608_v8 = vpack.c.bf16 %v1893_v7, %v1889_v6  ;;  %9006 = vst [vmem:[#allocation17_spill] sm:$0xff] %v7725_v54  ;;  %v1891_v6 = vld [vmem:[%s8866_s4 + $0x150] sm:$0xff]  ;;  %9015 = vst [vmem:[#allocation26_spill] sm:$0xff] %v7806_v43  ;;  %v1936_v4 = vld [vmem:[%s8866_s4 + $0x2b8] sm:$0xff] }
 0x74b   :  { %v1895_v7 = vld [vmem:[%s8866_s4 + $0x170] sm:$0xff]  ;;  %9021 = vst [vmem:[#allocation32_spill] sm:$0xff] %v7859_v29 }
 0x74c   :  { %8999 = vst [vmem:[#allocation10_spill] sm:$0xff] %v7608_v8 }
 0x752   :  { %v6482_v18 = vpop.eup %6481 }
 0x753   :  { %v6484_v45 = vpop.eup %6483  ;;  %v1653_v2 = vmul.f32 %v6482_v18, %v6480_v14  ;;  %v1868_v14 = vld [vmem:[%s8866_s4 + $0x98] sm:$0xff] }
 0x754   :  { %v1652_v11 = vmul.f32 %v6484_v45, %v1650_v19  ;;  %v6486_v16 = vpop.eup %6485  ;;  %v1872_v18 = vld [vmem:[%s8866_s4 + $0xb8] sm:$0xff]  ;;  %v1867_v45 = vld [vmem:[%s8866_s4 + $0x90] sm:$0xff] }
 0x755   :  { %v7617_v19 = vpack.c.bf16 %v1872_v18, %v1868_v14  ;;  %v7734_v14 = vpack.c.bf16 %v1895_v7, %v1891_v6  ;;  %v1922_v18 = vld [vmem:[%s8866_s4 + $0x248] sm:$0xff]  ;;  %v1937_v7 = vld [vmem:[%s8866_s4 + $0x2c0] sm:$0xff] }
 0x756   :  { %v7474_v15 = vadd.f32 %v1653_v2, %v1652_v11  ;;  %v1871_v2 = vld [vmem:[%s8866_s4 + $0xb0] sm:$0xff]  ;;  %v1898_v11 = vld [vmem:[%s8866_s4 + $0x188] sm:$0xff] }
 0x757   :  { %v7626_v32 = vpack.c.bf16 %v1871_v2, %v1867_v45  ;;  %9007 = vst [vmem:[#allocation18_spill] sm:$0xff] %v7734_v14  ;;  %v1926_v45 = vld [vmem:[%s8866_s4 + $0x268] sm:$0xff] }
 0x758   :  { %6487 = vtanh.f32 %v7474_v15  ;;  %v7743_v2 = vpack.c.bf16 %v1926_v45, %v1922_v18  ;;  %v1942_v6 = vld [vmem:[%s8866_s4 + $0x2e8] sm:$0xff]  ;;  %v1941_v45 = vld [vmem:[%s8866_s4 + $0x2e0] sm:$0xff] }
 0x759   :  { %v7818_v18 = vpack.c.bf16 %v1942_v6, %v1938_v53  ;;  %v1928_v53 = vld [vmem:[%s8866_s4 + $0x278] sm:$0xff]  ;;  %v1923_v6 = vld [vmem:[%s8866_s4 + $0x250] sm:$0xff] }
 0x75a   :  { %9008 = vst [vmem:[#allocation19_spill] sm:$0xff] %v7743_v2 }
 0x75b   :  { %9016 = vst [vmem:[#allocation27_spill] sm:$0xff] %v7818_v18 }
 0x762   :  { %v6488_v5 = vpop.eup %6487 }
 0x763   :  { %v1656_v41 = vmul.f32 %v6488_v5, %v6486_v16  ;;  %v1902_v16 = vld [vmem:[%s8866_s4 + $0x1a8] sm:$0xff]  ;;  %v1901_v5 = vld [vmem:[%s8866_s4 + $0x1a0] sm:$0xff] }
 0x764   :  { %v7635_v20 = vpack.c.bf16 %v1902_v16, %v1898_v11  ;;  %v7644_v42 = vpack.c.bf16 %v1901_v5, %v1897_v38  ;;  %v1921_v11 = vld [vmem:[%s8866_s4 + $0x240] sm:$0xff]  ;;  %v1900_v5 = vld [vmem:[%s8866_s4 + $0x198] sm:$0xff] }
 0x765   :  { %v1662_v26 = vrot.slane %v1656_v41, 4  ;;  %v1880_v41 = vld [vmem:[%s8866_s4 + $0xf8] sm:$0xff]  ;;  %v1925_v16 = vld [vmem:[%s8866_s4 + $0x260] sm:$0xff] }
 0x766   :  { %9000 = vst [vmem:[#allocation11_spill] sm:$0xff] %v7635_v20  ;;  %9001 = vst [vmem:[#allocation12_spill] sm:$0xff] %v7644_v42  ;;  %v7752_v38 = vpack.c.bf16 %v1925_v16, %v1921_v11  ;;  %v1916_v11 = vld [vmem:[%s8866_s4 + $0x218] sm:$0xff] }
 0x767   :  { %1729 = vmatmul.mubr.f32.vlgmr.msra.gmra.mrb[18].mxu0 %v1662_v26  ;;  %1800 = vmatmul.mubr.f32.vlgmr.msra.gmra.mrb[18].mxu1 %v1662_v26  ;;  %v7653_v26 = vpack.c.bf16 %v1880_v41, %v1876_v40  ;;  %v1904_v40 = vld [vmem:[%s8866_s4 + $0x1b8] sm:$0xff] }
 0x768   :  { %5129 = vmatpush1.bf16.msra.mxu0 %v7489_v31  ;;  %5193 = vmatpush1.bf16.msra.mxu1 %v7554_v10  ;;  %9009 = vst [vmem:[#allocation20_spill] sm:$0xff] %v7752_v38  ;;  %v7761_v41 = vpack.c.bf16 %v1904_v40, %v1900_v5  ;;  %v1920_v16 = vld [vmem:[%s8866_s4 + $0x238] sm:$0xff]  ;;  %v7830_v5 = vpack.c.bf16 %v1941_v45, %v1937_v7  ;;  %v1927_v45 = vld [vmem:[%s8866_s4 + $0x270] sm:$0xff] }
 0x769   :  { %5131 = vmatprep.subr.bf16.mxu0 %v7491_v58  ;;  %5195 = vmatprep.subr.bf16.mxu1 %v7581_v36  ;;  %v7832_v40 = vpack.c.bf16 %v1920_v16, %v1916_v11  ;;  %v7870_v7 = vpack.c.bf16 %v1928_v53, %v1924_v35  ;;  %v1954_v11 = vld [vmem:[%s8866_s4 + $0x348] sm:$0xff]  ;;  %v7883_v33 = vpack.c.bf16 %v1927_v45, %v1923_v6  ;;  %v1931_v35 = vld [vmem:[%s8866_s4 + $0x290] sm:$0xff] }
 0x76a   :  { %9010 = vst [vmem:[#allocation21_spill] sm:$0xff] %v7761_v41  ;;  %9017 = vst [vmem:[#allocation28_spill] sm:$0xff] %v7830_v5  ;;  %v1958_v16 = vld [vmem:[%s8866_s4 + $0x368] sm:$0xff]  ;;  %v1935_v53 = vld [vmem:[%s8866_s4 + $0x2b0] sm:$0xff]  ;;  %v7907_v6 = vpack.c.bf16 %v1957_v49, %v1953_v56  ;;  %v7909_v45 = vpack.c.bf16 %v1936_v4, %v1932_v55 }
 0x76b   :  { %9018 = vst [vmem:[#allocation29_spill] sm:$0xff] %v7832_v40  ;;  %9022 = vst [vmem:[#allocation33_spill] sm:$0xff] %v7870_v7  ;;  %v7885_v44 = vpack.c.bf16 %v1958_v16, %v1954_v11  ;;  %v1962_v11 = vld [vmem:[%s8866_s4 + $0x388] sm:$0xff]  ;;  %v1965_v56 = vld [vmem:[%s8866_s4 + $0x3a0] sm:$0xff]  ;;  %v7933_v4 = vpack.c.bf16 %v1935_v53, %v1931_v35 }
 0x76c   :  { %5133 = vmatpush1.bf16.msra.mxu0 %v7506_v39  ;;  %5197 = vmatpush1.bf16.msra.mxu1 %v7590_v52  ;;  %9023 = vst [vmem:[#allocation34_spill] sm:$0xff] %v7883_v33  ;;  %9025 = vst [vmem:[#allocation36_spill] sm:$0xff] %v7907_v6  ;;  %v1966_v16 = vld [vmem:[%s8866_s4 + $0x3a8] sm:$0xff]  ;;  %v1940_v49 = vld [vmem:[%s8866_s4 + $0x2d8] sm:$0xff]  ;;  %v7951_v53 = vpack.c.bf16 %v1965_v56, %v1961_v28  ;;  %v7969_v56 = vpack.c.bf16 %v1943_v22, %v1939_v27 }
 0x76d   :  { %5135 = vmatprep.subr.bf16.mxu0 %v7509_v48  ;;  %5199 = vmatprep.subr.bf16.mxu1 %v7617_v19  ;;  %9024 = vst [vmem:[#allocation35_spill] sm:$0xff] %v7885_v44  ;;  %9026 = vst [vmem:[#allocation37_spill] sm:$0xff] %v7909_v45  ;;  %v7921_v30 = vpack.c.bf16 %v1966_v16, %v1962_v11  ;;  %v1944_v55 = vld [vmem:[%s8866_s4 + $0x2f8] sm:$0xff]  ;;  %v1970_v11 = vld [vmem:[%s8866_s4 + $0x3c8] sm:$0xff] }
 0x76e   :  { %9028 = vst [vmem:[#allocation39_spill] sm:$0xff] %v7933_v4  ;;  %v7939_v16 = vpack.c.bf16 %v1944_v55, %v1940_v49  ;;  %v1974_v35 = vld [vmem:[%s8866_s4 + $0x3e8] sm:$0xff]  ;;  %9030 = vst [vmem:[#allocation41_spill] sm:$0xff] %v7951_v53  ;;  %v1948_v49 = vld [vmem:[%s8866_s4 + $0x318] sm:$0xff] }
 0x76f   :  { %9027 = vst [vmem:[#allocation38_spill] sm:$0xff] %v7921_v30  ;;  %v1952_v55 = vld [vmem:[%s8866_s4 + $0x338] sm:$0xff]  ;;  %v7960_v3 = vpack.c.bf16 %v1974_v35, %v1970_v11  ;;  %v1973_v28 = vld [vmem:[%s8866_s4 + $0x3e0] sm:$0xff]  ;;  %9032 = vst [vmem:[#allocation43_spill] sm:$0xff] %v7969_v56 }
 0x770   :  { %5137 = vmatpush1.bf16.msra.mxu0 %v7518_v57  ;;  %5201 = vmatpush1.bf16.msra.mxu1 %v7626_v32  ;;  %9029 = vst [vmem:[#allocation40_spill] sm:$0xff] %v7939_v16  ;;  %v1947_v35 = vld [vmem:[%s8866_s4 + $0x310] sm:$0xff] }
 0x771   :  { %5139 = vmatprep.subr.bf16.mxu0 %v7528_v0  ;;  %5203 = vmatprep.subr.bf16.mxu1 %v7653_v26  ;;  %9031 = vst [vmem:[#allocation42_spill] sm:$0xff] %v7960_v3  ;;  %v1951_v22 = vld [vmem:[%s8866_s4 + $0x330] sm:$0xff] }
 0x772   :  { %v7987_v27 = vpack.c.bf16 %v1951_v22, %v1947_v35  ;;  %v1964_v35 = vld [vmem:[%s8866_s4 + $0x398] sm:$0xff] }
 0x773   :  { %v1968_v22 = vld [vmem:[%s8866_s4 + $0x3b8] sm:$0xff] }
 0x774   :  { %5141 = vmatpush1.bf16.msra.mxu0 %v7536_v50  ;;  %5205 = vmatpush1.bf16.msra.mxu1 %v7662_v34  ;;  %9035 = vst [vmem:[#allocation46_spill] sm:$0xff] %v7987_v27 }
 0x775   :  { %5143 = vmatprep.subr.bf16.mxu0 %v7563_v17  ;;  %5207 = vmatprep.subr.bf16.mxu1 %v7689_v61 }
 0x778   :  { %5145 = vmatpush1.bf16.msra.mxu0 %v7572_v25  ;;  %5209 = vmatpush1.bf16.msra.mxu1 %v7698_v12 }
 0x779   :  { %5147 = vmatprep.subr.bf16.mxu0 %v7599_v59  ;;  %5211 = vmatprep.subr.bf16.mxu1 %v7725_v54 }
 0x77c   :  { %5149 = vmatpush1.bf16.msra.mxu0 %v7608_v8  ;;  %5213 = vmatpush1.bf16.msra.mxu1 %v7734_v14 }
 0x77d   :  { %5151 = vmatprep.subr.bf16.mxu0 %v7635_v20  ;;  %5215 = vmatprep.subr.bf16.mxu1 %v7761_v41 }
 0x780   :  { %5153 = vmatpush1.bf16.msra.mxu0 %v7644_v42  ;;  %5217 = vmatpush1.bf16.msra.mxu1 %v7770_v9  ;;  %v1659_v9 = vld [vmem:[#allocation2 + $0x30] sm:$0xc0] }
 0x781   :  { %5155 = vmatprep.subr.bf16.mxu0 %v7671_v47  ;;  %5219 = vmatprep.subr.bf16.mxu1 %v7797_v23 }
 0x784   :  { %5157 = vmatpush1.bf16.msra.mxu0 %v7680_v1  ;;  %5221 = vmatpush1.bf16.msra.mxu1 %v7806_v43 }
 0x785   :  { %5159 = vmatprep.subr.bf16.mxu0 %v7707_v24  ;;  %5223 = vmatprep.subr.bf16.mxu1 %v7832_v40  ;;  %v1658_v40 = vld [vmem:[#allocation2 + $0x28] sm:$0xc0] }
 0x788   :  { %5161 = vmatpush1.bf16.msra.mxu0 %v7716_v37  ;;  %5225 = vmatpush1.bf16.msra.mxu1 %v7844_v46 }
 0x789   :  { %5163 = vmatprep.subr.bf16.mxu0 %v7743_v2  ;;  %5227 = vmatprep.subr.bf16.mxu1 %v7870_v7 }
 0x78c   :  { %5165 = vmatpush1.bf16.msra.mxu0 %v7752_v38  ;;  %5229 = vmatpush1.bf16.msra.mxu1 %v7883_v33  ;;  %v7972_v33 = vpack.c.bf16 %v1952_v55, %v1948_v49  ;;  %v1960_v49 = vld [vmem:[%s8866_s4 + $0x378] sm:$0xff]  ;;  %v1955_v55 = vld [vmem:[%s8866_s4 + $0x350] sm:$0xff] }
 0x78d   :  { %5167 = vmatprep.subr.bf16.mxu0 %v7779_v60  ;;  %5231 = vmatprep.subr.bf16.mxu1 %v7909_v45  ;;  %v1969_v45 = vld [vmem:[%s8866_s4 + $0x3c0] sm:$0xff] }
 0x78e   :  { %9033 = vst [vmem:[#allocation44_spill] sm:$0xff] %v7972_v33  ;;  %v7975_v11 = vpack.c.bf16 %v1973_v28, %v1969_v45  ;;  %v1956_v45 = vld [vmem:[%s8866_s4 + $0x358] sm:$0xff] }
 0x78f   :  { %v7998_v28 = vpack.c.bf16 %v1960_v49, %v1956_v45  ;;  %v8013_v45 = vpack.c.bf16 %v1968_v22, %v1964_v35  ;;  %v1963_v49 = vld [vmem:[%s8866_s4 + $0x390] sm:$0xff] }
 0x790   :  { %5169 = vmatpush1.bf16.msra.mxu0 %v7788_v63  ;;  %5233 = vmatpush1.bf16.msra.mxu1 %v7933_v4  ;;  %9034 = vst [vmem:[#allocation45_spill] sm:$0xff] %v7975_v11  ;;  %v1972_v4 = vld [vmem:[%s8866_s4 + $0x3d8] sm:$0xff]  ;;  %v1971_v22 = vld [vmem:[%s8866_s4 + $0x3d0] sm:$0xff] }
 0x791   :  { %5171 = vmatprep.subr.bf16.mxu0 %v7818_v18  ;;  %5235 = vmatprep.subr.bf16.mxu1 %v7939_v16  ;;  %9036 = vst [vmem:[#allocation47_spill] sm:$0xff] %v7998_v28  ;;  %9038 = vst [vmem:[#allocation49_spill] sm:$0xff] %v8013_v45  ;;  %v1967_v16 = vld [vmem:[%s8866_s4 + $0x3b0] sm:$0xff] }
 0x794   :  { %5173 = vmatpush1.bf16.msra.mxu0 %v7830_v5  ;;  %5237 = vmatpush1.bf16.msra.mxu1 %v7969_v56 }
 0x795   :  { %5175 = vmatprep.subr.bf16.mxu0 %v7857_v13  ;;  %5239 = vmatprep.subr.bf16.mxu1 %v7972_v33  ;;  %v1959_v33 = vld [vmem:[%s8866_s4 + $0x370] sm:$0xff] }
 0x796   :  { %v8010_v56 = vpack.c.bf16 %v1959_v33, %v1955_v55  ;;  %v1976_v33 = vld [vmem:[%s8866_s4 + $0x3f8] sm:$0xff]  ;;  %v8028_v55 = vpack.c.bf16 %v1967_v16, %v1963_v49 }
 0x797   :  { %v8031_v35 = vpack.c.bf16 %v1976_v33, %v1972_v4 }
 0x798   :  { %5177 = vmatpush1.bf16.msra.mxu0 %v7859_v29  ;;  %5241 = vmatpush1.bf16.msra.mxu1 %v7987_v27  ;;  %9037 = vst [vmem:[#allocation48_spill] sm:$0xff] %v8010_v56  ;;  %9039 = vst [vmem:[#allocation50_spill] sm:$0xff] %v8028_v55 }
 0x799   :  { %5179 = vmatprep.subr.bf16.mxu0 %v7885_v44  ;;  %5243 = vmatprep.subr.bf16.mxu1 %v7998_v28  ;;  %9040 = vst [vmem:[#allocation51_spill] sm:$0xff] %v8031_v35  ;;  %v1975_v28 = vld [vmem:[%s8866_s4 + $0x3f0] sm:$0xff] }
 0x79a   :  { %v8040_v27 = vpack.c.bf16 %v1975_v28, %v1971_v22  ;;  %v1660_v22 = vld [vmem:[#allocation2 + $0x38] sm:$0xc0] }
 0x79c   :  { %5181 = vmatpush1.bf16.msra.mxu0 %v7907_v6  ;;  %5245 = vmatpush1.bf16.msra.mxu1 %v8010_v56  ;;  %9041 = vst [vmem:[#allocation52_spill] sm:$0xff] %v8040_v27  ;;  %v1657_v56 = vld [vmem:[#allocation2 + $0x20] sm:$0xc0] }
 0x79d   :  { %5183 = vmatprep.subr.bf16.mxu0 %v7921_v30  ;;  %5247 = vmatprep.subr.bf16.mxu1 %v8013_v45 }
 0x7a0   :  { %5185 = vmatpush1.bf16.msra.mxu0 %v7951_v53  ;;  %5249 = vmatpush1.bf16.msra.mxu1 %v8028_v55 }
 0x7a1   :  { %5187 = vmatprep.subr.bf16.mxu0 %v7960_v3  ;;  %5251 = vmatprep.subr.bf16.mxu1 %v8031_v35 }
 0x7a4   :  { %5189 = vmatpush1.bf16.msra.mxu0 %v7975_v11  ;;  %5253 = vmatpush1.bf16.msra.mxu1 %v8040_v27 }
 0x7a5   :  { %5279 = vmatprep.subr.bf16.mxu1 %v7470_v51 }
 0x83a   :  { %v1730_v4 = vpop.f32.mrb[18].mxu0  ;;  %v1801_v16 = vpop.f32.mrb[18].mxu1 }
 0x83b   :  { %v1810_v49 = vrot.slane %v1730_v4, 2  ;;  %v1732_v33 = vpop.f32.mrb[19].mxu0  ;;  %v1803_v45 = vpop.f32.mrb[19].mxu1  ;;  %v1812_v27 = vrot.slane %v1801_v16, 2 }
 0x83c   :  { %v1811_v7 = vrot.slane %v1732_v33, 2  ;;  %v1813_v28 = vrot.slane %v1803_v45, 2 }
 0x83d   :  { %v1818_v46 = vadd.f32 %v1810_v49, %v1657_v56  ;;  %v1820_v41 = vadd.f32 %v1812_v27, %v1659_v9  ;;  %v1979_v27 = vld [vmem:[%s8867_s6 + $0x8] sm:$0xff]  ;;  %v8925_v49 = vmov 0.0|0.0  }
 0x83e   :  { %v1819_v43 = vadd.f32 %v1811_v7, %v1658_v40  ;;  %v1821_v35 = vadd.f32 %v1813_v28, %v1660_v22  ;;  %5254 = vmatprep.subr.bf16.mxu0 %v8925_v49  ;;  %v1980_v28 = vld [vmem:[%s8867_s6 + $0x10] sm:$0xff]  ;;  %v1981_v22 = vld [vmem:[%s8867_s6 + $0x18] sm:$0xff] }
 0x83f   :  { %v4052_v23 = vmul.f32 -1.442695, %v1818_v46 }
 0x840   :  { %v4053_v55 = vmul.f32 -1.442695, %v1819_v43  ;;  %v4054_v51 = vmul.f32 -1.442695, %v1821_v35 }
 0x841   :  { %6489 = vpow2.f32 %v4052_v23  ;;  %v1842_v23 = vrot.slane %v7474_v15, 6  ;;  %v1978_v15 = vld [vmem:[%s8867_s6] sm:$0xff] }
 0x842   :  { %6491 = vpow2.f32 %v4053_v55  ;;  %v8089_v35 = vpack.c.bf16 %v1979_v27, %v1978_v15  ;;  %v1991_v15 = vld [vmem:[%s8867_s6 + $0x68] sm:$0xff] }
 0x843   :  { %6493 = vpow2.f32 %v4054_v51 }
 0x844   :  { %6495 = vtanh.f32 %v1820_v41 }
 0x84b   :  { %v6490_v14 = vpop.eup %6489 }
 0x84c   :  { %v6492_v4 = vpop.eup %6491  ;;  %v1825_v54 = vadd.f32 1.0, %v6490_v14 }
 0x84d   :  { %v1831_v33 = vadd.f32 1.0, %v6492_v4  ;;  %v6494_v40 = vpop.eup %6493  ;;  %v8101_v4 = vpack.c.bf16 %v1981_v22, %v1980_v28  ;;  %v1992_v28 = vld [vmem:[%s8867_s6 + $0x70] sm:$0xff]  ;;  %v1993_v22 = vld [vmem:[%s8867_s6 + $0x78] sm:$0xff] }
 0x84e   :  { %6497 = vrcp.f32 %v1825_v54  ;;  %v6496_v46 = vpop.eup %6495  ;;  %v1838_v45 = vadd.f32 1.0, %v6494_v40  ;;  %v1995_v54 = vld [vmem:[%s8864_s0 + $0xe] sm:$0x3] }
 0x84f   :  { %6499 = vrcp.f32 %v1831_v33  ;;  %v1982_v33 = vld [vmem:[%s8867_s6 + $0x20] sm:$0xff]  ;;  %v1983_v40 = vld [vmem:[%s8867_s6 + $0x28] sm:$0xff] }
 0x850   :  { %6501 = vrcp.f32 %v1838_v45  ;;  %v1987_v45 = vld [vmem:[%s8867_s6 + $0x48] sm:$0xff] }
 0x858   :  { %v6498_v43 = vpop.eup %6497 }
 0x859   :  { %v6500_v7 = vpop.eup %6499  ;;  %v1845_v56 = vmul.f32 %v6498_v43, %v6496_v46  ;;  %v8111_v46 = vpack.c.bf16 %v1983_v40, %v1982_v33  ;;  %v1984_v43 = vld [vmem:[%s8867_s6 + $0x30] sm:$0xff]  ;;  %v8162_v33 = vpack.c.bf16 %v1993_v22, %v1992_v28  ;;  %v1977_v40 = vld [vmem:[%s8868_s5] sm:$0xf] }
 0x85a   :  { %v1844_v55 = vmul.f32 %v6500_v7, %v1842_v23  ;;  %v6502_v14 = vpop.eup %6501  ;;  %v1985_v23 = vld [vmem:[%s8867_s6 + $0x38] sm:$0xff] }
 0x85b   :  { %v8121_v7 = vpack.c.bf16 %v1985_v23, %v1984_v43  ;;  %9047 = vst [vmem:[#allocation57_spill] sm:$0xff] %v8162_v33  ;;  %v9048_v43 = vsub.s32 0, %v7222_v21 }
 0x85c   :  { %v8046_v16 = vadd.f32 %v1845_v56, %v1844_v55  ;;  %v1986_v56 = vld [vmem:[%s8867_s6 + $0x40] sm:$0xff] }
 0x85d   :  { %9042 = vst [vmem:[#allocation53_spill] sm:$0xff] %v8121_v7  ;;  %v8131_v55 = vpack.c.bf16 %v1987_v45, %v1986_v56  ;;  %v8172_v23 = vrot.slane %v1977_v40, %v9048_v43  ;;  %v9050_v56 = vsub.s32 1, %v7222_v21 }
 0x85e   :  { %6503 = vtanh.f32 %v8046_v16 }
 0x85f   :  { %9043 = vst [vmem:[#allocation54_spill] sm:$0xff] %v8131_v55  ;;  %9049 = vst [vmem:[#allocation58_spill] sm:$0xff] %v8172_v23  ;;  %v8176_v45 = vrot.slane %v1977_v40, %v9050_v56  ;;  %v9053_v56 = vsub.s32 2, %v7222_v21 }
 0x861   :  { %9051 = vst [vmem:[#allocation59_spill] sm:$0xff] %v8176_v45 }
 0x868   :  { %v6504_v51 = vpop.eup %6503 }
 0x869   :  { %v1848_v41 = vmul.f32 %v6504_v51, %v6502_v14  ;;  %v1988_v14 = vld [vmem:[%s8867_s6 + $0x50] sm:$0xff]  ;;  %v1989_v51 = vld [vmem:[%s8867_s6 + $0x58] sm:$0xff] }
 0x86b   :  { %v1997_v9 = vrot.slane %v1848_v41, 6  ;;  %v8140_v41 = vpack.c.bf16 %v1989_v51, %v1988_v14 }
 0x86d   :  { %2084 = vmatprep.mubr.f32.mxu0 %v1997_v9  ;;  %2155 = vmatprep.mubr.f32.mxu1 %v1997_v9  ;;  %9044 = vst [vmem:[#allocation55_spill] sm:$0xff] %v8140_v41  ;;  %v9045_v9 = vmov 0.0  }
 0x86e   :  { %2085 = vmatmul.mubr.f32.vlgmr.msra.gmra.mrb[20].mxu0 %v1995_v54  ;;  %2156 = vmatmul.mubr.f32.vlgmr.msra.gmra.mrb[20].mxu1 %v1995_v54  ;;  %v1990_v54 = vld [vmem:[%s8867_s6 + $0x60] sm:$0xff] }
 0x86f   :  { %5281 = vmatpush1.bf16.msra.mxu1 %v7489_v31  ;;  %5256 = vmatpush3.bf16.msra.mxu0 %v8089_v35  ;;  %v8152_v27 = vpack.c.bf16 %v1991_v15, %v1990_v54 }
 0x870   :  { %5283 = vmatprep.subr.bf16.mxu1 %v7491_v58  ;;  %5257 = vmatprep.subr.bf16.mxu0 %v8925_v49 }
 0x871   :  { %4267 = vmatprep.mubr.msk.f32.mxu0 %vm6636_vm0, %v9045_v9  ;;  %9046 = vst [vmem:[#allocation56_spill] sm:$0xff] %v8152_v27 }
 0x873   :  { %5285 = vmatpush1.bf16.msra.mxu1 %v7506_v39  ;;  %5259 = vmatpush3.bf16.msra.mxu0 %v8101_v4 }
 0x874   :  { %5287 = vmatprep.subr.bf16.mxu1 %v7509_v48  ;;  %5260 = vmatprep.subr.bf16.mxu0 %v8925_v49 }
 0x877   :  { %5289 = vmatpush1.bf16.msra.mxu1 %v7518_v57  ;;  %5262 = vmatpush3.bf16.msra.mxu0 %v8111_v46 }
 0x878   :  { %5291 = vmatprep.subr.bf16.mxu1 %v7528_v0  ;;  %5263 = vmatprep.subr.bf16.mxu0 %v8925_v49 }
 0x87b   :  { %5293 = vmatpush1.bf16.msra.mxu1 %v7536_v50  ;;  %5265 = vmatpush3.bf16.msra.mxu0 %v8121_v7 }
 0x87c   :  { %5295 = vmatprep.subr.bf16.mxu1 %v7563_v17  ;;  %5266 = vmatprep.subr.bf16.mxu0 %v8925_v49 }
 0x87f   :  { %5297 = vmatpush1.bf16.msra.mxu1 %v7572_v25  ;;  %5268 = vmatpush3.bf16.msra.mxu0 %v8131_v55 }
 0x880   :  { %5299 = vmatprep.subr.bf16.mxu1 %v7599_v59  ;;  %5269 = vmatprep.subr.bf16.mxu0 %v8925_v49 }
 0x883   :  { %5301 = vmatpush1.bf16.msra.mxu1 %v7608_v8  ;;  %5271 = vmatpush3.bf16.msra.mxu0 %v8140_v41 }
 0x884   :  { %5303 = vmatprep.subr.bf16.mxu1 %v7635_v20  ;;  %5272 = vmatprep.subr.bf16.mxu0 %v8925_v49 }
 0x887   :  { %5305 = vmatpush1.bf16.msra.mxu1 %v7644_v42  ;;  %5274 = vmatpush3.bf16.msra.mxu0 %v8152_v27 }
 0x888   :  { %5307 = vmatprep.subr.bf16.mxu1 %v7671_v47  ;;  %5275 = vmatprep.subr.bf16.mxu0 %v8925_v49 }
 0x88b   :  { %5309 = vmatpush1.bf16.msra.mxu1 %v7680_v1  ;;  %5277 = vmatpush3.bf16.msra.mxu0 %v8162_v33 }
 0x88c   :  { %5311 = vmatprep.subr.bf16.mxu1 %v7707_v24  ;;  %5343 = vmatprep.subr.bf16.mxu0 %v7545_v62 }
 0x88f   :  { %5313 = vmatpush1.bf16.msra.mxu1 %v7716_v37 }
 0x890   :  { %5315 = vmatprep.subr.bf16.mxu1 %v7743_v2 }
 0x893   :  { %5317 = vmatpush1.bf16.msra.mxu1 %v7752_v38 }
 0x894   :  { %5319 = vmatprep.subr.bf16.mxu1 %v7779_v60 }
 0x897   :  { %5321 = vmatpush1.bf16.msra.mxu1 %v7788_v63 }
 0x898   :  { %5323 = vmatprep.subr.bf16.mxu1 %v7818_v18 }
 0x89b   :  { %5325 = vmatpush1.bf16.msra.mxu1 %v7830_v5 }
 0x89c   :  { %5327 = vmatprep.subr.bf16.mxu1 %v7857_v13 }
 0x89f   :  { %5329 = vmatpush1.bf16.msra.mxu1 %v7859_v29 }
 0x8a0   :  { %5331 = vmatprep.subr.bf16.mxu1 %v7885_v44 }
 0x8a3   :  { %5333 = vmatpush1.bf16.msra.mxu1 %v7907_v6 }
 0x8a4   :  { %5335 = vmatprep.subr.bf16.mxu1 %v7921_v30  ;;  %v8187_v30 = vrot.slane %v1977_v40, %v9053_v56 }
 0x8a7   :  { %5337 = vmatpush1.bf16.msra.mxu1 %v7951_v53 }
 0x8a8   :  { %5339 = vmatprep.subr.bf16.mxu1 %v7960_v3 }
 0x8ab   :  { %5341 = vmatpush1.bf16.msra.mxu1 %v7975_v11 }
 0x8ac   :  { %5406 = vmatprep.subr.bf16.mxu1 %v8925_v49  ;;  %v9052_v49 = vsub.s32 3, %v7222_v21 }
 0x8ae   :  { %v8182_v11 = vrot.slane %v1977_v40, %v9052_v49 }
 0x941   :  { %v2086_v14 = vpop.f32.mrb[20].mxu0  ;;  %v2157_v51 = vpop.f32.mrb[20].mxu1 }
 0x942   :  { %v2087_v54 = vadd.f32 %v2086_v14, %v8172_v23  ;;  %v2088_v15 = vpop.f32.mrb[21].mxu0  ;;  %v2159_v28 = vpop.f32.mrb[21].mxu1  ;;  %v2158_v14 = vadd.f32 %v2157_v51, %v8187_v30 }
 0x943   :  { %v2089_v22 = vadd.f32 %v2088_v15, %v8176_v45  ;;  %v2160_v43 = vadd.f32 %v2159_v28, %v8182_v11  ;;  %v2182_v28 = vrot.slane %v8046_v16, 6  ;;  %v9054_v16 = vld [vmem:[#allocation17_spill] sm:$0xff] }
 0x944   :  { %v4055_v3 = vmul.f32 -1.442695, %v2087_v54 }
 0x945   :  { %v4056_v53 = vmul.f32 -1.442695, %v2089_v22  ;;  %v4057_v6 = vmul.f32 -1.442695, %v2160_v43 }
 0x946   :  { %6505 = vpow2.f32 %v4055_v3 }
 0x947   :  { %6507 = vpow2.f32 %v4056_v53 }
 0x948   :  { %6509 = vpow2.f32 %v4057_v6 }
 0x949   :  { %6511 = vtanh.f32 %v2158_v14  ;;  %v9056_v14 = vld [vmem:[#allocation21_spill] sm:$0xff] }
 0x950   :  { %v6506_v23 = vpop.eup %6505 }
 0x951   :  { %v6508_v15 = vpop.eup %6507  ;;  %v2165_v45 = vadd.f32 1.0, %v6506_v23 }
 0x952   :  { %v2171_v49 = vadd.f32 1.0, %v6508_v15  ;;  %v6510_v54 = vpop.eup %6509  ;;  %v9057_v15 = vld [vmem:[#allocation22_spill] sm:$0xff] }
 0x953   :  { %6513 = vrcp.f32 %v2165_v45  ;;  %v6512_v3 = vpop.eup %6511  ;;  %v2178_v22 = vadd.f32 1.0, %v6510_v54  ;;  %v9055_v45 = vld [vmem:[#allocation18_spill] sm:$0xff] }
 0x954   :  { %6515 = vrcp.f32 %v2171_v49  ;;  %v9058_v49 = vld [vmem:[#allocation25_spill] sm:$0xff]  ;;  %v9059_v54 = vld [vmem:[#allocation26_spill] sm:$0xff] }
 0x955   :  { %6517 = vrcp.f32 %v2178_v22  ;;  %v9063_v22 = vld [vmem:[#allocation34_spill] sm:$0xff] }
 0x95d   :  { %v6514_v53 = vpop.eup %6513 }
 0x95e   :  { %v6516_v21 = vpop.eup %6515  ;;  %v2185_v40 = vmul.f32 %v6514_v53, %v6512_v3  ;;  %v9060_v3 = vld [vmem:[#allocation29_spill] sm:$0xff]  ;;  %v9061_v53 = vld [vmem:[#allocation30_spill] sm:$0xff] }
 0x95f   :  { %v2184_v56 = vmul.f32 %v6516_v21, %v2182_v28  ;;  %v6518_v6 = vpop.eup %6517  ;;  %v9062_v28 = vld [vmem:[#allocation33_spill] sm:$0xff] }
 0x960   :  { %v9064_v21 = vld [vmem:[#allocation37_spill] sm:$0xff] }
 0x961   :  { %v8191_v43 = vadd.f32 %v2185_v40, %v2184_v56  ;;  %v9065_v40 = vld [vmem:[#allocation39_spill] sm:$0xff]  ;;  %v9066_v56 = vld [vmem:[#allocation40_spill] sm:$0xff] }
 0x963   :  { %6519 = vtanh.f32 %v8191_v43 }
 0x96d   :  { %v6520_v23 = vpop.eup %6519 }
 0x96e   :  { %v2188_v51 = vmul.f32 %v6520_v23, %v6518_v6  ;;  %v9067_v6 = vld [vmem:[#allocation43_spill] sm:$0xff]  ;;  %v9068_v23 = vld [vmem:[#allocation44_spill] sm:$0xff] }
 0x970   :  { %4268 = vmatmul.mubr.f32.vlgmr.msra.gmra.mrb[22].mxu0 %v2188_v51  ;;  %2330 = vmatprep.mubr.f32.mxu1 %v2188_v51 }
 0x971   :  { %2401 = vmatprep.mubr.f32.mxu0 %v2188_v51  ;;  %5345 = vmatpush1.bf16.msra.mxu0 %v7554_v10  ;;  %v9069_v51 = vld [vmem:[#allocation46_spill] sm:$0xff] }
 0x972   :  { %5347 = vmatprep.subr.bf16.mxu0 %v7581_v36 }
 0x975   :  { %5349 = vmatpush1.bf16.msra.mxu0 %v7590_v52 }
 0x976   :  { %5351 = vmatprep.subr.bf16.mxu0 %v7617_v19 }
 0x979   :  { %5353 = vmatpush1.bf16.msra.mxu0 %v7626_v32 }
 0x97a   :  { %5355 = vmatprep.subr.bf16.mxu0 %v7653_v26 }
 0x97d   :  { %5357 = vmatpush1.bf16.msra.mxu0 %v7662_v34 }
 0x97e   :  { %5359 = vmatprep.subr.bf16.mxu0 %v7689_v61 }
 0x981   :  { %5361 = vmatpush1.bf16.msra.mxu0 %v7698_v12 }
 0x982   :  { %5363 = vmatprep.subr.bf16.mxu0 %v9054_v16 }
 0x985   :  { %5365 = vmatpush1.bf16.msra.mxu0 %v9055_v45 }
 0x986   :  { %5367 = vmatprep.subr.bf16.mxu0 %v9056_v14 }
 0x989   :  { %5369 = vmatpush1.bf16.msra.mxu0 %v9057_v15 }
 0x98a   :  { %5371 = vmatprep.subr.bf16.mxu0 %v9058_v49 }
 0x98d   :  { %5373 = vmatpush1.bf16.msra.mxu0 %v9059_v54  ;;  %v9070_v54 = vld [vmem:[#allocation47_spill] sm:$0xff] }
 0x98e   :  { %5375 = vmatprep.subr.bf16.mxu0 %v9060_v3  ;;  %v9071_v3 = vld [vmem:[#allocation48_spill] sm:$0xff] }
 0x991   :  { %5377 = vmatpush1.bf16.msra.mxu0 %v9061_v53  ;;  %v9072_v53 = vld [vmem:[#allocation49_spill] sm:$0xff] }
 0x992   :  { %5379 = vmatprep.subr.bf16.mxu0 %v9062_v28  ;;  %v9073_v28 = vld [vmem:[#allocation50_spill] sm:$0xff] }
 0x995   :  { %5381 = vmatpush1.bf16.msra.mxu0 %v9063_v22  ;;  %v9074_v22 = vld [vmem:[#allocation51_spill] sm:$0xff] }
 0x996   :  { %5383 = vmatprep.subr.bf16.mxu0 %v9064_v21  ;;  %v9075_v21 = vld [vmem:[#allocation52_spill] sm:$0xff] }
 0x999   :  { %5385 = vmatpush1.bf16.msra.mxu0 %v9065_v40  ;;  %v9076_v40 = vld [vmem:[#allocation4_spill] sm:$0xff] }
 0x99a   :  { %5387 = vmatprep.subr.bf16.mxu0 %v9066_v56 }
 0x99d   :  { %5389 = vmatpush1.bf16.msra.mxu0 %v9067_v6 }
 0x99e   :  { %5391 = vmatprep.subr.bf16.mxu0 %v9068_v23  ;;  %v8229_v23 = vld [vmem:[%s8869_s7] ss:$0 sm:$0xff] }
 0x9a1   :  { %5393 = vmatpush1.bf16.msra.mxu0 %v9069_v51 }
 0x9a2   :  { %5395 = vmatprep.subr.bf16.mxu0 %v9070_v54 }
 0x9a5   :  { %5397 = vmatpush1.bf16.msra.mxu0 %v9071_v3 }
 0x9a6   :  { %5399 = vmatprep.subr.bf16.mxu0 %v9072_v53 }
 0x9a9   :  { %5401 = vmatpush1.bf16.msra.mxu0 %v9073_v28 }
 0x9aa   :  { %5403 = vmatprep.subr.bf16.mxu0 %v9074_v22 }
 0x9ad   :  { %5405 = vmatpush1.bf16.msra.mxu0 %v9075_v21  ;;  %v9077_v21 = vmov 0.0|0.0  }
 0x9ae   :  { %5431 = vmatprep.subr.bf16.mxu0 %v9076_v40 }
 0xa43   :  { %v2261_v51 = vpop.f32.mrb[22].mxu0 }
 0xa44   :  { %v2262_v54 = vadd.f32 %v8229_v23, %v2261_v51  ;;  %v4269_v6 = vpop.f32.mrb[23].mxu0  ;;  %v9080_v51 = vld [vmem:[#allocation41_spill] sm:$0xff] }
 0xa45   :  { %v9079_v6 = vld [vmem:[#allocation38_spill] sm:$0xff] }
 0xa46   :  { %2265 = vst [vmem:[#allocation3] sm:$0x3] %v2262_v54  ;;  %2331 = vmatmul.mubr.f32.vlgmr.msra.gmra.mrb[22].mxu1 %v2262_v54  ;;  %2402 = vmatmul.mubr.f32.vlgmr.msra.gmra.mrb[24].mxu0 %v2262_v54  ;;  %v9078_v54 = vld [vmem:[#allocation36_spill] sm:$0xff] }
 0xa47   :  { %5408 = vmatpush3.bf16.msra.mxu1 %v8089_v35  ;;  %4302 = vmatprep.mubr.msk.f32.mxu1 %vm6636_vm0, %v9045_v9 }
 0xa48   :  { %5409 = vmatprep.subr.bf16.mxu1 %v9077_v21  ;;  %5433 = vmatpush1.bf16.msra.mxu0 %v7489_v31 }
 0xa49   :  { %5435 = vmatprep.subr.bf16.mxu0 %v7491_v58 }
 0xa4b   :  { %5411 = vmatpush3.bf16.msra.mxu1 %v8101_v4 }
 0xa4c   :  { %5412 = vmatprep.subr.bf16.mxu1 %v9077_v21  ;;  %5437 = vmatpush1.bf16.msra.mxu0 %v7506_v39 }
 0xa4d   :  { %5439 = vmatprep.subr.bf16.mxu0 %v7509_v48 }
 0xa4f   :  { %5414 = vmatpush3.bf16.msra.mxu1 %v8111_v46 }
 0xa50   :  { %5415 = vmatprep.subr.bf16.mxu1 %v9077_v21  ;;  %5441 = vmatpush1.bf16.msra.mxu0 %v7518_v57 }
 0xa51   :  { %5443 = vmatprep.subr.bf16.mxu0 %v7528_v0 }
 0xa53   :  { %5417 = vmatpush3.bf16.msra.mxu1 %v8121_v7 }
 0xa54   :  { %5418 = vmatprep.subr.bf16.mxu1 %v9077_v21  ;;  %5445 = vmatpush1.bf16.msra.mxu0 %v7536_v50 }
 0xa55   :  { %5447 = vmatprep.subr.bf16.mxu0 %v7563_v17 }
 0xa57   :  { %5420 = vmatpush3.bf16.msra.mxu1 %v8131_v55 }
 0xa58   :  { %5421 = vmatprep.subr.bf16.mxu1 %v9077_v21  ;;  %5449 = vmatpush1.bf16.msra.mxu0 %v7572_v25 }
 0xa59   :  { %5451 = vmatprep.subr.bf16.mxu0 %v7599_v59 }
 0xa5b   :  { %5423 = vmatpush3.bf16.msra.mxu1 %v8140_v41 }
 0xa5c   :  { %5424 = vmatprep.subr.bf16.mxu1 %v9077_v21  ;;  %5453 = vmatpush1.bf16.msra.mxu0 %v7608_v8 }
 0xa5d   :  { %5455 = vmatprep.subr.bf16.mxu0 %v7635_v20 }
 0xa5f   :  { %5426 = vmatpush3.bf16.msra.mxu1 %v8152_v27 }
 0xa60   :  { %5427 = vmatprep.subr.bf16.mxu1 %v9077_v21  ;;  %5457 = vmatpush1.bf16.msra.mxu0 %v7644_v42 }
 0xa61   :  { %5459 = vmatprep.subr.bf16.mxu0 %v7671_v47 }
 0xa63   :  { %5429 = vmatpush3.bf16.msra.mxu1 %v8162_v33 }
 0xa64   :  { %5495 = vmatprep.subr.bf16.mxu1 %v7545_v62  ;;  %5461 = vmatpush1.bf16.msra.mxu0 %v7680_v1 }
 0xa65   :  { %5463 = vmatprep.subr.bf16.mxu0 %v7707_v24 }
 0xa68   :  { %5465 = vmatpush1.bf16.msra.mxu0 %v7716_v37  ;;  %v9084_v37 = vld [vmem:[#allocation59_spill] sm:$0xff] }
 0xa69   :  { %5467 = vmatprep.subr.bf16.mxu0 %v7743_v2 }
 0xa6c   :  { %5469 = vmatpush1.bf16.msra.mxu0 %v7752_v38  ;;  %v9081_v38 = vld [vmem:[#allocation42_spill] sm:$0xff] }
 0xa6d   :  { %5471 = vmatprep.subr.bf16.mxu0 %v7779_v60  ;;  %v9082_v60 = vld [vmem:[#allocation45_spill] sm:$0xff] }
 0xa70   :  { %5473 = vmatpush1.bf16.msra.mxu0 %v7788_v63  ;;  %v9083_v63 = vld [vmem:[#allocation58_spill] sm:$0xff] }
 0xa71   :  { %5475 = vmatprep.subr.bf16.mxu0 %v7818_v18 }
 0xa74   :  { %5477 = vmatpush1.bf16.msra.mxu0 %v7830_v5 }
 0xa75   :  { %5479 = vmatprep.subr.bf16.mxu0 %v7857_v13 }
 0xa78   :  { %5481 = vmatpush1.bf16.msra.mxu0 %v7859_v29 }
 0xa79   :  { %5483 = vmatprep.subr.bf16.mxu0 %v7885_v44 }
 0xa7c   :  { %5485 = vmatpush1.bf16.msra.mxu0 %v9078_v54 }
 0xa7d   :  { %5487 = vmatprep.subr.bf16.mxu0 %v9079_v6 }
 0xa80   :  { %5489 = vmatpush1.bf16.msra.mxu0 %v9080_v51 }
 0xa81   :  { %5491 = vmatprep.subr.bf16.mxu0 %v9081_v38 }
 0xa84   :  { %5493 = vmatpush1.bf16.msra.mxu0 %v9082_v60 }
 0xa85   :  { %5558 = vmatprep.subr.bf16.mxu0 %v9077_v21 }
 0xb19   :  { %v2332_v18 = vpop.f32.mrb[22].mxu1  ;;  %v2403_v5 = vpop.f32.mrb[24].mxu0 }
 0xb1a   :  { %v2333_v13 = vadd.f32 %v2332_v18, %v9083_v63  ;;  %v2334_v2 = vpop.f32.mrb[23].mxu1  ;;  %v2405_v29 = vpop.f32.mrb[25].mxu0  ;;  %v2404_v38 = vadd.f32 %v2403_v5, %v8187_v30 }
 0xb1b   :  { %v2335_v44 = vadd.f32 %v2334_v2, %v9084_v37  ;;  %v2406_v51 = vadd.f32 %v2405_v29, %v8182_v11 }
 0xb1c   :  { %v4059_v24 = vmul.f32 -1.442695, %v2333_v13 }
 0xb1d   :  { %v4060_v54 = vmul.f32 -1.442695, %v2335_v44  ;;  %v4061_v6 = vmul.f32 -1.442695, %v2406_v51  ;;  %v9091_v51 = vld [vmem:[#allocation39_spill] sm:$0xff] }
 0xb1e   :  { %6521 = vpow2.f32 %v4059_v24 }
 0xb1f   :  { %6523 = vpow2.f32 %v4060_v54 }
 0xb20   :  { %6525 = vpow2.f32 %v4061_v6 }
 0xb21   :  { %6527 = vtanh.f32 %v2404_v38  ;;  %v9087_v38 = vld [vmem:[#allocation30_spill] sm:$0xff] }
 0xb28   :  { %v6522_v60 = vpop.eup %6521 }
 0xb29   :  { %v6524_v1 = vpop.eup %6523  ;;  %v2411_v62 = vadd.f32 1.0, %v6522_v60 }
 0xb2a   :  { %v2417_v33 = vadd.f32 1.0, %v6524_v1  ;;  %v6526_v18 = vpop.eup %6525  ;;  %v9086_v1 = vld [vmem:[#allocation29_spill] sm:$0xff] }
 0xb2b   :  { %6529 = vrcp.f32 %v2411_v62  ;;  %v6528_v63 = vpop.eup %6527  ;;  %v2424_v24 = vadd.f32 1.0, %v6526_v18  ;;  %v9085_v62 = vld [vmem:[#allocation26_spill] sm:$0xff]  ;;  %v9092_v18 = vld [vmem:[#allocation43_spill] sm:$0xff] }
 0xb2c   :  { %6531 = vrcp.f32 %v2417_v33  ;;  %v9089_v33 = vld [vmem:[#allocation34_spill] sm:$0xff] }
 0xb2d   :  { %6533 = vrcp.f32 %v2424_v24  ;;  %v9096_v24 = vld [vmem:[#allocation52_spill] sm:$0xff] }
 0xb35   :  { %v6530_v2 = vpop.eup %6529 }
 0xb36   :  { %v6532_v13 = vpop.eup %6531  ;;  %v2428_v44 = vmul.f32 %v6530_v2, %v6528_v63  ;;  %v9088_v63 = vld [vmem:[#allocation33_spill] sm:$0xff]  ;;  %v9093_v2 = vld [vmem:[#allocation44_spill] sm:$0xff] }
 0xb37   :  { %v2427_v54 = vmul.f32 %v6532_v13, %v8191_v43  ;;  %v6534_v5 = vpop.eup %6533  ;;  %v9090_v43 = vld [vmem:[#allocation37_spill] sm:$0xff]  ;;  %v9094_v13 = vld [vmem:[#allocation46_spill] sm:$0xff] }
 0xb39   :  { %v8287_v29 = vadd.f32 %v2428_v44, %v2427_v54  ;;  %v9095_v44 = vld [vmem:[#allocation47_spill] sm:$0xff] }
 0xb3b   :  { %6535 = vtanh.f32 %v8287_v29 }
 0xb45   :  { %v6536_v60 = vpop.eup %6535 }
 0xb46   :  { %v2431_v6 = vmul.f32 %v6536_v60, %v6534_v5 }
 0xb48   :  { %4303 = vmatmul.mubr.f32.vlgmr.msra.gmra.mrb[24].mxu1 %v2431_v6  ;;  %2567 = vmatprep.mubr.f32.mxu0 %v2431_v6 }
 0xb49   :  { %2638 = vmatprep.mubr.f32.mxu1 %v2431_v6  ;;  %5497 = vmatpush1.bf16.msra.mxu1 %v7554_v10  ;;  %v9097_v6 = vld [vmem:[#allocation57_spill] sm:$0xff] }
 0xb4a   :  { %5499 = vmatprep.subr.bf16.mxu1 %v7581_v36 }
 0xb4d   :  { %5501 = vmatpush1.bf16.msra.mxu1 %v7590_v52 }
 0xb4e   :  { %5503 = vmatprep.subr.bf16.mxu1 %v7617_v19 }
 0xb51   :  { %5505 = vmatpush1.bf16.msra.mxu1 %v7626_v32 }
 0xb52   :  { %5507 = vmatprep.subr.bf16.mxu1 %v7653_v26 }
 0xb55   :  { %5509 = vmatpush1.bf16.msra.mxu1 %v7662_v34 }
 0xb56   :  { %5511 = vmatprep.subr.bf16.mxu1 %v7689_v61 }
 0xb59   :  { %5513 = vmatpush1.bf16.msra.mxu1 %v7698_v12 }
 0xb5a   :  { %5515 = vmatprep.subr.bf16.mxu1 %v9054_v16 }
 0xb5d   :  { %5517 = vmatpush1.bf16.msra.mxu1 %v9055_v45 }
 0xb5e   :  { %5519 = vmatprep.subr.bf16.mxu1 %v9056_v14 }
 0xb61   :  { %5521 = vmatpush1.bf16.msra.mxu1 %v9057_v15 }
 0xb62   :  { %5523 = vmatprep.subr.bf16.mxu1 %v9058_v49 }
 0xb65   :  { %5525 = vmatpush1.bf16.msra.mxu1 %v9085_v62 }
 0xb66   :  { %5527 = vmatprep.subr.bf16.mxu1 %v9086_v1 }
 0xb69   :  { %5529 = vmatpush1.bf16.msra.mxu1 %v9087_v38 }
 0xb6a   :  { %5531 = vmatprep.subr.bf16.mxu1 %v9088_v63 }
 0xb6d   :  { %5533 = vmatpush1.bf16.msra.mxu1 %v9089_v33 }
 0xb6e   :  { %5535 = vmatprep.subr.bf16.mxu1 %v9090_v43 }
 0xb71   :  { %5537 = vmatpush1.bf16.msra.mxu1 %v9091_v51 }
 0xb72   :  { %5539 = vmatprep.subr.bf16.mxu1 %v9066_v56 }
 0xb75   :  { %5541 = vmatpush1.bf16.msra.mxu1 %v9092_v18 }
 0xb76   :  { %5543 = vmatprep.subr.bf16.mxu1 %v9093_v2 }
 0xb79   :  { %5545 = vmatpush1.bf16.msra.mxu1 %v9094_v13 }
 0xb7a   :  { %5547 = vmatprep.subr.bf16.mxu1 %v9095_v44 }
 0xb7d   :  { %5549 = vmatpush1.bf16.msra.mxu1 %v9071_v3 }
 0xb7e   :  { %5551 = vmatprep.subr.bf16.mxu1 %v9072_v53 }
 0xb81   :  { %5553 = vmatpush1.bf16.msra.mxu1 %v9073_v28 }
 0xb82   :  { %5555 = vmatprep.subr.bf16.mxu1 %v9074_v22 }
 0xb85   :  { %5557 = vmatpush1.bf16.msra.mxu1 %v9096_v24 }
 0xb86   :  { %5583 = vmatprep.subr.bf16.mxu1 %v9076_v40 }
 0xc1b   :  { %v2498_v54 = vpop.f32.mrb[24].mxu1 }
 0xc1c   :  { %v2499_v5 = vadd.f32 %v8229_v23, %v2498_v54  ;;  %v4304_v60 = vpop.f32.mrb[25].mxu1  ;;  %v9098_v54 = vld [vmem:[#allocation6_spill] sm:$0xff] }
 0xc1d   :  { %v9100_v60 = vld [vmem:[#allocation15_spill] sm:$0xff] }
 0xc1e   :  { %2502 = vst [vmem:[#allocation3 + $0x2] sm:$0x3] %v2499_v5  ;;  %2568 = vmatmul.mubr.f32.vlgmr.msra.gmra.mrb[26].mxu0 %v2499_v5  ;;  %2639 = vmatmul.mubr.f32.vlgmr.msra.gmra.mrb[26].mxu1 %v2499_v5  ;;  %v9099_v5 = vld [vmem:[#allocation14_spill] sm:$0xff] }
 0xc1f   :  { %5560 = vmatpush3.bf16.msra.mxu0 %v8089_v35  ;;  %4337 = vmatprep.mubr.msk.f32.mxu0 %vm6636_vm0, %v9045_v9 }
 0xc20   :  { %5561 = vmatprep.subr.bf16.mxu0 %v9077_v21  ;;  %5585 = vmatpush1.bf16.msra.mxu1 %v7489_v31 }
 0xc21   :  { %5587 = vmatprep.subr.bf16.mxu1 %v7491_v58 }
 0xc23   :  { %5563 = vmatpush3.bf16.msra.mxu0 %v8101_v4 }
 0xc24   :  { %5564 = vmatprep.subr.bf16.mxu0 %v9077_v21  ;;  %5589 = vmatpush1.bf16.msra.mxu1 %v7506_v39 }
 0xc25   :  { %5591 = vmatprep.subr.bf16.mxu1 %v7509_v48 }
 0xc27   :  { %5566 = vmatpush3.bf16.msra.mxu0 %v8111_v46 }
 0xc28   :  { %5567 = vmatprep.subr.bf16.mxu0 %v9077_v21  ;;  %5593 = vmatpush1.bf16.msra.mxu1 %v7518_v57 }
 0xc29   :  { %5595 = vmatprep.subr.bf16.mxu1 %v7528_v0 }
 0xc2b   :  { %5569 = vmatpush3.bf16.msra.mxu0 %v8121_v7 }
 0xc2c   :  { %5570 = vmatprep.subr.bf16.mxu0 %v9077_v21  ;;  %5597 = vmatpush1.bf16.msra.mxu1 %v7536_v50 }
 0xc2d   :  { %5599 = vmatprep.subr.bf16.mxu1 %v7563_v17 }
 0xc2f   :  { %5572 = vmatpush3.bf16.msra.mxu0 %v8131_v55 }
 0xc30   :  { %5573 = vmatprep.subr.bf16.mxu0 %v9077_v21  ;;  %5601 = vmatpush1.bf16.msra.mxu1 %v7572_v25 }
 0xc31   :  { %5603 = vmatprep.subr.bf16.mxu1 %v7599_v59  ;;  %v9105_v59 = vld [vmem:[#allocation24_spill] sm:$0xff] }
 0xc33   :  { %5575 = vmatpush3.bf16.msra.mxu0 %v8140_v41  ;;  %v9101_v41 = vld [vmem:[#allocation16_spill] sm:$0xff] }
 0xc34   :  { %5576 = vmatprep.subr.bf16.mxu0 %v9077_v21  ;;  %5605 = vmatpush1.bf16.msra.mxu1 %v7608_v8  ;;  %v9102_v8 = vld [vmem:[#allocation19_spill] sm:$0xff] }
 0xc35   :  { %5607 = vmatprep.subr.bf16.mxu1 %v7635_v20  ;;  %v9103_v20 = vld [vmem:[#allocation20_spill] sm:$0xff] }
 0xc37   :  { %5578 = vmatpush3.bf16.msra.mxu0 %v8152_v27  ;;  %v9104_v27 = vld [vmem:[#allocation23_spill] sm:$0xff] }
 0xc38   :  { %5579 = vmatprep.subr.bf16.mxu0 %v9077_v21  ;;  %5609 = vmatpush1.bf16.msra.mxu1 %v7644_v42  ;;  %v9106_v42 = vld [vmem:[#allocation27_spill] sm:$0xff] }
 0xc39   :  { %5611 = vmatprep.subr.bf16.mxu1 %v7671_v47  ;;  %v9107_v47 = vld [vmem:[#allocation28_spill] sm:$0xff] }
 0xc3b   :  { %5581 = vmatpush3.bf16.msra.mxu0 %v9097_v6  ;;  %v9108_v6 = vld [vmem:[#allocation31_spill] sm:$0xff] }
 0xc3c   :  { %5647 = vmatprep.subr.bf16.mxu0 %v9098_v54  ;;  %5613 = vmatpush1.bf16.msra.mxu1 %v9099_v5  ;;  %v9109_v54 = vld [vmem:[#allocation32_spill] sm:$0xff]  ;;  %v9110_v5 = vld [vmem:[#allocation35_spill] sm:$0xff] }
 0xc3d   :  { %5615 = vmatprep.subr.bf16.mxu1 %v9100_v60  ;;  %v9111_v60 = vld [vmem:[#allocation36_spill] sm:$0xff] }
 0xc40   :  { %5617 = vmatpush1.bf16.msra.mxu1 %v9101_v41  ;;  %v9112_v41 = vld [vmem:[#allocation38_spill] sm:$0xff] }
 0xc41   :  { %5619 = vmatprep.subr.bf16.mxu1 %v9102_v8  ;;  %v9113_v8 = vld [vmem:[#allocation41_spill] sm:$0xff] }
 0xc44   :  { %5621 = vmatpush1.bf16.msra.mxu1 %v9103_v20  ;;  %v9114_v20 = vld [vmem:[#allocation42_spill] sm:$0xff] }
 0xc45   :  { %5623 = vmatprep.subr.bf16.mxu1 %v9104_v27  ;;  %v9115_v27 = vld [vmem:[#allocation45_spill] sm:$0xff] }
 0xc48   :  { %5625 = vmatpush1.bf16.msra.mxu1 %v9105_v59  ;;  %v9116_v59 = vld [vmem:[#allocation58_spill] sm:$0xff] }
 0xc49   :  { %5627 = vmatprep.subr.bf16.mxu1 %v9106_v42 }
 0xc4c   :  { %5629 = vmatpush1.bf16.msra.mxu1 %v9107_v47 }
 0xc4d   :  { %5631 = vmatprep.subr.bf16.mxu1 %v9108_v6 }
 0xc50   :  { %5633 = vmatpush1.bf16.msra.mxu1 %v9109_v54 }
 0xc51   :  { %5635 = vmatprep.subr.bf16.mxu1 %v9110_v5 }
 0xc54   :  { %5637 = vmatpush1.bf16.msra.mxu1 %v9111_v60 }
 0xc55   :  { %5639 = vmatprep.subr.bf16.mxu1 %v9112_v41 }
 0xc58   :  { %5641 = vmatpush1.bf16.msra.mxu1 %v9113_v8 }
 0xc59   :  { %5643 = vmatprep.subr.bf16.mxu1 %v9114_v20 }
 0xc5c   :  { %5645 = vmatpush1.bf16.msra.mxu1 %v9115_v27 }
 0xc5d   :  { %5710 = vmatprep.subr.bf16.mxu1 %v9077_v21 }
 0xcf1   :  { %v2569_v42 = vpop.f32.mrb[26].mxu0  ;;  %v2640_v47 = vpop.f32.mrb[26].mxu1 }
 0xcf2   :  { %v2570_v6 = vadd.f32 %v2569_v42, %v9116_v59  ;;  %v2571_v25 = vpop.f32.mrb[27].mxu0  ;;  %v2642_v54 = vpop.f32.mrb[27].mxu1  ;;  %v2641_v20 = vadd.f32 %v2640_v47, %v8187_v30 }
 0xcf3   :  { %v2572_v5 = vadd.f32 %v2571_v25, %v9084_v37  ;;  %v2643_v8 = vadd.f32 %v2642_v54, %v8182_v11 }
 0xcf4   :  { %v4062_v55 = vmul.f32 -1.442695, %v2570_v6 }
 0xcf5   :  { %v4063_v60 = vmul.f32 -1.442695, %v2572_v5  ;;  %v4064_v41 = vmul.f32 -1.442695, %v2643_v8 }
 0xcf6   :  { %6537 = vpow2.f32 %v4062_v55 }
 0xcf7   :  { %6539 = vpow2.f32 %v4063_v60 }
 0xcf8   :  { %6541 = vpow2.f32 %v4064_v41 }
 0xcf9   :  { %6543 = vtanh.f32 %v2641_v20  ;;  %v9117_v20 = vld [vmem:[#allocation53_spill] sm:$0xff] }
 0xd00   :  { %v6538_v27 = vpop.eup %6537 }
 0xd01   :  { %v6540_v17 = vpop.eup %6539  ;;  %v2648_v50 = vadd.f32 1.0, %v6538_v27  ;;  %v9119_v27 = vld [vmem:[#allocation7_spill] sm:$0xff] }
 0xd02   :  { %v2654_v7 = vadd.f32 1.0, %v6540_v17  ;;  %v6542_v42 = vpop.eup %6541 }
 0xd03   :  { %6545 = vrcp.f32 %v2648_v50  ;;  %v6544_v59 = vpop.eup %6543  ;;  %v2661_v55 = vadd.f32 1.0, %v6542_v42  ;;  %v9121_v42 = vld [vmem:[#allocation8_spill] sm:$0xff] }
 0xd04   :  { %6547 = vrcp.f32 %v2654_v7  ;;  %v9118_v7 = vld [vmem:[#allocation5_spill] sm:$0xff] }
 0xd05   :  { %6549 = vrcp.f32 %v2661_v55  ;;  %v9125_v55 = vld [vmem:[#allocation11_spill] sm:$0xff] }
 0xd0d   :  { %v6546_v25 = vpop.eup %6545 }
 0xd0e   :  { %v6548_v6 = vpop.eup %6547  ;;  %v2665_v5 = vmul.f32 %v6546_v25, %v6544_v59  ;;  %v9122_v25 = vld [vmem:[#allocation9_spill] sm:$0xff] }
 0xd0f   :  { %v2664_v60 = vmul.f32 %v6548_v6, %v8287_v29  ;;  %v6550_v8 = vpop.eup %6549  ;;  %v9120_v29 = vld [vmem:[#allocation54_spill] sm:$0xff]  ;;  %v9123_v6 = vld [vmem:[#allocation55_spill] sm:$0xff] }
 0xd11   :  { %v8378_v54 = vadd.f32 %v2665_v5, %v2664_v60  ;;  %v9124_v5 = vld [vmem:[#allocation10_spill] sm:$0xff]  ;;  %v9126_v60 = vld [vmem:[#allocation56_spill] sm:$0xff] }
 0xd13   :  { %6551 = vtanh.f32 %v8378_v54 }
 0xd1d   :  { %v6552_v47 = vpop.eup %6551 }
 0xd1e   :  { %v2668_v41 = vmul.f32 %v6552_v47, %v6550_v8  ;;  %v9127_v8 = vld [vmem:[#allocation12_spill] sm:$0xff]  ;;  %v9128_v47 = vld [vmem:[#allocation13_spill] sm:$0xff] }
 0xd20   :  { %4338 = vmatmul.mubr.f32.vlgmr.msra.gmra.mrb[28].mxu0 %v2668_v41  ;;  %2804 = vmatprep.mubr.f32.mxu1 %v2668_v41 }
 0xd21   :  { %2875 = vmatprep.mubr.f32.mxu0 %v2668_v41  ;;  %5649 = vmatpush1.bf16.msra.mxu0 %v7554_v10  ;;  %v9129_v41 = vld [vmem:[#allocation57_spill] sm:$0xff] }
 0xd22   :  { %5651 = vmatprep.subr.bf16.mxu0 %v7581_v36 }
 0xd25   :  { %5653 = vmatpush1.bf16.msra.mxu0 %v7590_v52 }
 0xd26   :  { %5655 = vmatprep.subr.bf16.mxu0 %v7617_v19 }
 0xd29   :  { %5657 = vmatpush1.bf16.msra.mxu0 %v7626_v32 }
 0xd2a   :  { %5659 = vmatprep.subr.bf16.mxu0 %v7653_v26 }
 0xd2d   :  { %5661 = vmatpush1.bf16.msra.mxu0 %v7662_v34 }
 0xd2e   :  { %5663 = vmatprep.subr.bf16.mxu0 %v7689_v61 }
 0xd31   :  { %5665 = vmatpush1.bf16.msra.mxu0 %v7698_v12 }
 0xd32   :  { %5667 = vmatprep.subr.bf16.mxu0 %v9054_v16 }
 0xd35   :  { %5669 = vmatpush1.bf16.msra.mxu0 %v9055_v45 }
 0xd36   :  { %5671 = vmatprep.subr.bf16.mxu0 %v9056_v14 }
 0xd39   :  { %5673 = vmatpush1.bf16.msra.mxu0 %v9057_v15 }
 0xd3a   :  { %5675 = vmatprep.subr.bf16.mxu0 %v9058_v49 }
 0xd3d   :  { %5677 = vmatpush1.bf16.msra.mxu0 %v9085_v62 }
 0xd3e   :  { %5679 = vmatprep.subr.bf16.mxu0 %v9086_v1 }
 0xd41   :  { %5681 = vmatpush1.bf16.msra.mxu0 %v9087_v38 }
 0xd42   :  { %5683 = vmatprep.subr.bf16.mxu0 %v9088_v63 }
 0xd45   :  { %5685 = vmatpush1.bf16.msra.mxu0 %v9089_v33 }
 0xd46   :  { %5687 = vmatprep.subr.bf16.mxu0 %v9090_v43 }
 0xd49   :  { %5689 = vmatpush1.bf16.msra.mxu0 %v9091_v51 }
 0xd4a   :  { %5691 = vmatprep.subr.bf16.mxu0 %v9066_v56 }
 0xd4d   :  { %5693 = vmatpush1.bf16.msra.mxu0 %v9092_v18 }
 0xd4e   :  { %5695 = vmatprep.subr.bf16.mxu0 %v9093_v2 }
 0xd51   :  { %5697 = vmatpush1.bf16.msra.mxu0 %v9094_v13 }
 0xd52   :  { %5699 = vmatprep.subr.bf16.mxu0 %v9095_v44 }
 0xd55   :  { %5701 = vmatpush1.bf16.msra.mxu0 %v9071_v3 }
 0xd56   :  { %5703 = vmatprep.subr.bf16.mxu0 %v9072_v53 }
 0xd59   :  { %5705 = vmatpush1.bf16.msra.mxu0 %v9073_v28 }
 0xd5a   :  { %5707 = vmatprep.subr.bf16.mxu0 %v9074_v22 }
 0xd5d   :  { %5709 = vmatpush1.bf16.msra.mxu0 %v9096_v24 }
 0xd5e   :  { %5735 = vmatprep.subr.bf16.mxu0 %v9076_v40 }
 0xdf3   :  { %v2735_v50 = vpop.f32.mrb[28].mxu0 }
 0xdf4   :  { %v2736_v17 = vadd.f32 %v8229_v23, %v2735_v50  ;;  %v4339_v59 = vpop.f32.mrb[29].mxu0  ;;  %v9130_v50 = vld [vmem:[#allocation6_spill] sm:$0xff] }
 0xdf5   :  { %v9132_v59 = vld [vmem:[#allocation15_spill] sm:$0xff] }
 0xdf6   :  { %2739 = vst [vmem:[#allocation3 + $0x4] sm:$0x3] %v2736_v17  ;;  %2805 = vmatmul.mubr.f32.vlgmr.msra.gmra.mrb[28].mxu1 %v2736_v17  ;;  %2876 = vmatmul.mubr.f32.vlgmr.msra.gmra.mrb[30].mxu0 %v2736_v17  ;;  %v9131_v17 = vld [vmem:[#allocation14_spill] sm:$0xff] }
 0xdf7   :  { %5712 = vmatpush3.bf16.msra.mxu1 %v8089_v35  ;;  %4372 = vmatprep.mubr.msk.f32.mxu1 %vm6636_vm0, %v9045_v9 }
 0xdf8   :  { %5713 = vmatprep.subr.bf16.mxu1 %v9077_v21  ;;  %5737 = vmatpush1.bf16.msra.mxu0 %v7489_v31 }
 0xdf9   :  { %5739 = vmatprep.subr.bf16.mxu0 %v7491_v58 }
 0xdfb   :  { %5715 = vmatpush3.bf16.msra.mxu1 %v8101_v4 }
 0xdfc   :  { %5716 = vmatprep.subr.bf16.mxu1 %v9077_v21  ;;  %5741 = vmatpush1.bf16.msra.mxu0 %v7506_v39 }
 0xdfd   :  { %5743 = vmatprep.subr.bf16.mxu0 %v7509_v48 }
 0xdff   :  { %5718 = vmatpush3.bf16.msra.mxu1 %v8111_v46 }
 0xe00   :  { %5719 = vmatprep.subr.bf16.mxu1 %v9077_v21  ;;  %5745 = vmatpush1.bf16.msra.mxu0 %v7518_v57 }
 0xe01   :  { %5747 = vmatprep.subr.bf16.mxu0 %v7528_v0 }
 0xe03   :  { %5721 = vmatpush3.bf16.msra.mxu1 %v9117_v20 }
 0xe04   :  { %5722 = vmatprep.subr.bf16.mxu1 %v9077_v21  ;;  %5749 = vmatpush1.bf16.msra.mxu0 %v9118_v7 }
 0xe05   :  { %5751 = vmatprep.subr.bf16.mxu0 %v9119_v27 }
 0xe07   :  { %5724 = vmatpush3.bf16.msra.mxu1 %v9120_v29 }
 0xe08   :  { %5725 = vmatprep.subr.bf16.mxu1 %v9077_v21  ;;  %5753 = vmatpush1.bf16.msra.mxu0 %v9121_v42 }
 0xe09   :  { %5755 = vmatprep.subr.bf16.mxu0 %v9122_v25  ;;  %v9137_v25 = vld [vmem:[#allocation24_spill] sm:$0xff] }
 0xe0b   :  { %5727 = vmatpush3.bf16.msra.mxu1 %v9123_v6  ;;  %v9133_v6 = vld [vmem:[#allocation16_spill] sm:$0xff] }
 0xe0c   :  { %5728 = vmatprep.subr.bf16.mxu1 %v9077_v21  ;;  %5757 = vmatpush1.bf16.msra.mxu0 %v9124_v5  ;;  %v9134_v5 = vld [vmem:[#allocation19_spill] sm:$0xff] }
 0xe0d   :  { %5759 = vmatprep.subr.bf16.mxu0 %v9125_v55  ;;  %v9135_v55 = vld [vmem:[#allocation20_spill] sm:$0xff] }
 0xe0f   :  { %5730 = vmatpush3.bf16.msra.mxu1 %v9126_v60  ;;  %v9136_v60 = vld [vmem:[#allocation23_spill] sm:$0xff] }
 0xe10   :  { %5731 = vmatprep.subr.bf16.mxu1 %v9077_v21  ;;  %5761 = vmatpush1.bf16.msra.mxu0 %v9127_v8  ;;  %v9138_v8 = vld [vmem:[#allocation27_spill] sm:$0xff] }
 0xe11   :  { %5763 = vmatprep.subr.bf16.mxu0 %v9128_v47  ;;  %v9139_v47 = vld [vmem:[#allocation28_spill] sm:$0xff] }
 0xe13   :  { %5733 = vmatpush3.bf16.msra.mxu1 %v9129_v41  ;;  %v9140_v41 = vld [vmem:[#allocation31_spill] sm:$0xff] }
 0xe14   :  { %5799 = vmatprep.subr.bf16.mxu1 %v9130_v50  ;;  %5765 = vmatpush1.bf16.msra.mxu0 %v9131_v17  ;;  %v9141_v50 = vld [vmem:[#allocation32_spill] sm:$0xff]  ;;  %v9142_v17 = vld [vmem:[#allocation35_spill] sm:$0xff] }
 0xe15   :  { %5767 = vmatprep.subr.bf16.mxu0 %v9132_v59  ;;  %v9143_v59 = vld [vmem:[#allocation36_spill] sm:$0xff] }
 0xe18   :  { %5769 = vmatpush1.bf16.msra.mxu0 %v9133_v6  ;;  %v9144_v6 = vld [vmem:[#allocation38_spill] sm:$0xff] }
 0xe19   :  { %5771 = vmatprep.subr.bf16.mxu0 %v9134_v5  ;;  %v9145_v5 = vld [vmem:[#allocation41_spill] sm:$0xff] }
 0xe1c   :  { %5773 = vmatpush1.bf16.msra.mxu0 %v9135_v55  ;;  %v9146_v55 = vld [vmem:[#allocation42_spill] sm:$0xff] }
 0xe1d   :  { %5775 = vmatprep.subr.bf16.mxu0 %v9136_v60  ;;  %v9147_v60 = vld [vmem:[#allocation45_spill] sm:$0xff] }
 0xe20   :  { %5777 = vmatpush1.bf16.msra.mxu0 %v9137_v25  ;;  %v9148_v25 = vld [vmem:[#allocation58_spill] sm:$0xff] }
 0xe21   :  { %5779 = vmatprep.subr.bf16.mxu0 %v9138_v8 }
 0xe24   :  { %5781 = vmatpush1.bf16.msra.mxu0 %v9139_v47 }
 0xe25   :  { %5783 = vmatprep.subr.bf16.mxu0 %v9140_v41 }
 0xe28   :  { %5785 = vmatpush1.bf16.msra.mxu0 %v9141_v50 }
 0xe29   :  { %5787 = vmatprep.subr.bf16.mxu0 %v9142_v17 }
 0xe2c   :  { %5789 = vmatpush1.bf16.msra.mxu0 %v9143_v59 }
 0xe2d   :  { %5791 = vmatprep.subr.bf16.mxu0 %v9144_v6 }
 0xe30   :  { %5793 = vmatpush1.bf16.msra.mxu0 %v9145_v5 }
 0xe31   :  { %5795 = vmatprep.subr.bf16.mxu0 %v9146_v55 }
 0xe34   :  { %5797 = vmatpush1.bf16.msra.mxu0 %v9147_v60 }
 0xe35   :  { %5862 = vmatprep.subr.bf16.mxu0 %v9077_v21 }
 0xec9   :  { %v2806_v8 = vpop.f32.mrb[28].mxu1  ;;  %v2877_v47 = vpop.f32.mrb[30].mxu0 }
 0xeca   :  { %v2807_v41 = vadd.f32 %v2806_v8, %v9148_v25  ;;  %v2808_v42 = vpop.f32.mrb[29].mxu1  ;;  %v2879_v50 = vpop.f32.mrb[31].mxu0  ;;  %v2878_v55 = vadd.f32 %v2877_v47, %v8187_v30  ;;  %v9152_v47 = vld [vmem:[#allocation54_spill] sm:$0xff] }
 0xecb   :  { %v2809_v17 = vadd.f32 %v2808_v42, %v9084_v37  ;;  %v2880_v5 = vadd.f32 %v2879_v50, %v8182_v11 }
 0xecc   :  { %v4065_v29 = vmul.f32 -1.442695, %v2807_v41 }
 0xecd   :  { %v4066_v59 = vmul.f32 -1.442695, %v2809_v17  ;;  %v4067_v6 = vmul.f32 -1.442695, %v2880_v5 }
 0xece   :  { %6553 = vpow2.f32 %v4065_v29 }
 0xecf   :  { %6555 = vpow2.f32 %v4066_v59 }
 0xed0   :  { %6557 = vpow2.f32 %v4067_v6 }
 0xed1   :  { %6559 = vtanh.f32 %v2878_v55  ;;  %v9151_v55 = vld [vmem:[#allocation7_spill] sm:$0xff] }
 0xed8   :  { %v6554_v60 = vpop.eup %6553 }
 0xed9   :  { %v6556_v27 = vpop.eup %6555  ;;  %v2885_v7 = vadd.f32 1.0, %v6554_v60 }
 0xeda   :  { %v2891_v20 = vadd.f32 1.0, %v6556_v27  ;;  %v6558_v8 = vpop.eup %6557  ;;  %v9149_v27 = vld [vmem:[#allocation53_spill] sm:$0xff] }
 0xedb   :  { %6561 = vrcp.f32 %v2885_v7  ;;  %v6560_v25 = vpop.eup %6559  ;;  %v2898_v29 = vadd.f32 1.0, %v6558_v8  ;;  %v9153_v8 = vld [vmem:[#allocation8_spill] sm:$0xff] }
 0xedc   :  { %6563 = vrcp.f32 %v2891_v20 }
 0xedd   :  { %6565 = vrcp.f32 %v2898_v29  ;;  %v9157_v29 = vld [vmem:[#allocation11_spill] sm:$0xff] }
 0xee5   :  { %v6562_v42 = vpop.eup %6561 }
 0xee6   :  { %v6564_v41 = vpop.eup %6563  ;;  %v2902_v17 = vmul.f32 %v6562_v42, %v6560_v25  ;;  %v9150_v25 = vld [vmem:[#allocation5_spill] sm:$0xff] }
 0xee7   :  { %v2901_v59 = vmul.f32 %v6564_v41, %v8378_v54  ;;  %v6566_v5 = vpop.eup %6565  ;;  %v9154_v42 = vld [vmem:[#allocation9_spill] sm:$0xff]  ;;  %v9155_v41 = vld [vmem:[#allocation55_spill] sm:$0xff] }
 0xee9   :  { %v8469_v50 = vadd.f32 %v2902_v17, %v2901_v59  ;;  %v9156_v17 = vld [vmem:[#allocation10_spill] sm:$0xff]  ;;  %v9158_v59 = vld [vmem:[#allocation56_spill] sm:$0xff] }
 0xeeb   :  { %6567 = vtanh.f32 %v8469_v50 }
 0xef5   :  { %v6568_v60 = vpop.eup %6567 }
 0xef6   :  { %v2905_v6 = vmul.f32 %v6568_v60, %v6566_v5  ;;  %v9159_v5 = vld [vmem:[#allocation12_spill] sm:$0xff]  ;;  %v9160_v60 = vld [vmem:[#allocation13_spill] sm:$0xff] }
 0xef8   :  { %4373 = vmatmul.mubr.f32.vlgmr.msra.gmra.mrb[30].mxu1 %v2905_v6  ;;  %3041 = vmatprep.mubr.f32.mxu0 %v2905_v6 }
 0xef9   :  { %3112 = vmatprep.mubr.f32.mxu1 %v2905_v6  ;;  %5801 = vmatpush1.bf16.msra.mxu1 %v7554_v10  ;;  %v9161_v6 = vld [vmem:[#allocation57_spill] sm:$0xff] }
 0xefa   :  { %5803 = vmatprep.subr.bf16.mxu1 %v7581_v36 }
 0xefd   :  { %5805 = vmatpush1.bf16.msra.mxu1 %v7590_v52 }
 0xefe   :  { %5807 = vmatprep.subr.bf16.mxu1 %v7617_v19 }
 0xf01   :  { %5809 = vmatpush1.bf16.msra.mxu1 %v7626_v32 }
 0xf02   :  { %5811 = vmatprep.subr.bf16.mxu1 %v7653_v26 }
 0xf05   :  { %5813 = vmatpush1.bf16.msra.mxu1 %v7662_v34 }
 0xf06   :  { %5815 = vmatprep.subr.bf16.mxu1 %v7689_v61 }
 0xf09   :  { %5817 = vmatpush1.bf16.msra.mxu1 %v7698_v12 }
 0xf0a   :  { %5819 = vmatprep.subr.bf16.mxu1 %v9054_v16 }
 0xf0d   :  { %5821 = vmatpush1.bf16.msra.mxu1 %v9055_v45 }
 0xf0e   :  { %5823 = vmatprep.subr.bf16.mxu1 %v9056_v14 }
 0xf11   :  { %5825 = vmatpush1.bf16.msra.mxu1 %v9057_v15 }
 0xf12   :  { %5827 = vmatprep.subr.bf16.mxu1 %v9058_v49 }
 0xf15   :  { %5829 = vmatpush1.bf16.msra.mxu1 %v9085_v62 }
 0xf16   :  { %5831 = vmatprep.subr.bf16.mxu1 %v9086_v1 }
 0xf19   :  { %5833 = vmatpush1.bf16.msra.mxu1 %v9087_v38 }
 0xf1a   :  { %5835 = vmatprep.subr.bf16.mxu1 %v9088_v63 }
 0xf1d   :  { %5837 = vmatpush1.bf16.msra.mxu1 %v9089_v33 }
 0xf1e   :  { %5839 = vmatprep.subr.bf16.mxu1 %v9090_v43 }
 0xf21   :  { %5841 = vmatpush1.bf16.msra.mxu1 %v9091_v51 }
 0xf22   :  { %5843 = vmatprep.subr.bf16.mxu1 %v9066_v56 }
 0xf25   :  { %5845 = vmatpush1.bf16.msra.mxu1 %v9092_v18 }
 0xf26   :  { %5847 = vmatprep.subr.bf16.mxu1 %v9093_v2 }
 0xf29   :  { %5849 = vmatpush1.bf16.msra.mxu1 %v9094_v13 }
 0xf2a   :  { %5851 = vmatprep.subr.bf16.mxu1 %v9095_v44 }
 0xf2d   :  { %5853 = vmatpush1.bf16.msra.mxu1 %v9071_v3 }
 0xf2e   :  { %5855 = vmatprep.subr.bf16.mxu1 %v9072_v53 }
 0xf31   :  { %5857 = vmatpush1.bf16.msra.mxu1 %v9073_v28 }
 0xf32   :  { %5859 = vmatprep.subr.bf16.mxu1 %v9074_v22 }
 0xf35   :  { %5861 = vmatpush1.bf16.msra.mxu1 %v9096_v24 }
 0xf36   :  { %5887 = vmatprep.subr.bf16.mxu1 %v9076_v40 }
 0xfcb   :  { %v2972_v54 = vpop.f32.mrb[30].mxu1 }
 0xfcc   :  { %v2973_v20 = vadd.f32 %v8229_v23, %v2972_v54  ;;  %v4374_v7 = vpop.f32.mrb[31].mxu1  ;;  %v9162_v54 = vld [vmem:[#allocation6_spill] sm:$0xff] }
 0xfcd   :  { %v9164_v7 = vld [vmem:[#allocation15_spill] sm:$0xff] }
 0xfce   :  { %2976 = vst [vmem:[#allocation3 + $0x6] sm:$0x3] %v2973_v20  ;;  %3042 = vmatmul.mubr.f32.vlgmr.msra.gmra.mrb[32].mxu0 %v2973_v20  ;;  %3113 = vmatmul.mubr.f32.vlgmr.msra.gmra.mrb[32].mxu1 %v2973_v20  ;;  %v9163_v20 = vld [vmem:[#allocation14_spill] sm:$0xff] }
 0xfcf   :  { %5864 = vmatpush3.bf16.msra.mxu0 %v8089_v35  ;;  %4407 = vmatprep.mubr.msk.f32.mxu0 %vm6636_vm0, %v9045_v9 }
 0xfd0   :  { %5865 = vmatprep.subr.bf16.mxu0 %v9077_v21  ;;  %5889 = vmatpush1.bf16.msra.mxu1 %v7489_v31 }
 0xfd1   :  { %5891 = vmatprep.subr.bf16.mxu1 %v7491_v58 }
 0xfd3   :  { %5867 = vmatpush3.bf16.msra.mxu0 %v8101_v4 }
 0xfd4   :  { %5868 = vmatprep.subr.bf16.mxu0 %v9077_v21  ;;  %5893 = vmatpush1.bf16.msra.mxu1 %v7506_v39 }
 0xfd5   :  { %5895 = vmatprep.subr.bf16.mxu1 %v7509_v48 }
 0xfd7   :  { %5870 = vmatpush3.bf16.msra.mxu0 %v8111_v46 }
 0xfd8   :  { %5871 = vmatprep.subr.bf16.mxu0 %v9077_v21  ;;  %5897 = vmatpush1.bf16.msra.mxu1 %v7518_v57 }
 0xfd9   :  { %5899 = vmatprep.subr.bf16.mxu1 %v7528_v0 }
 0xfdb   :  { %5873 = vmatpush3.bf16.msra.mxu0 %v9149_v27 }
 0xfdc   :  { %5874 = vmatprep.subr.bf16.mxu0 %v9077_v21  ;;  %5901 = vmatpush1.bf16.msra.mxu1 %v9150_v25 }
 0xfdd   :  { %5903 = vmatprep.subr.bf16.mxu1 %v9151_v55 }
 0xfdf   :  { %5876 = vmatpush3.bf16.msra.mxu0 %v9152_v47 }
 0xfe0   :  { %5877 = vmatprep.subr.bf16.mxu0 %v9077_v21  ;;  %5905 = vmatpush1.bf16.msra.mxu1 %v9153_v8 }
 0xfe1   :  { %5907 = vmatprep.subr.bf16.mxu1 %v9154_v42  ;;  %v9169_v42 = vld [vmem:[#allocation24_spill] sm:$0xff] }
 0xfe3   :  { %5879 = vmatpush3.bf16.msra.mxu0 %v9155_v41  ;;  %v9165_v41 = vld [vmem:[#allocation16_spill] sm:$0xff] }
 0xfe4   :  { %5880 = vmatprep.subr.bf16.mxu0 %v9077_v21  ;;  %5909 = vmatpush1.bf16.msra.mxu1 %v9156_v17  ;;  %v9166_v17 = vld [vmem:[#allocation19_spill] sm:$0xff] }
 0xfe5   :  { %5911 = vmatprep.subr.bf16.mxu1 %v9157_v29  ;;  %v9167_v29 = vld [vmem:[#allocation20_spill] sm:$0xff] }
 0xfe7   :  { %5882 = vmatpush3.bf16.msra.mxu0 %v9158_v59  ;;  %v9168_v59 = vld [vmem:[#allocation23_spill] sm:$0xff] }
 0xfe8   :  { %5883 = vmatprep.subr.bf16.mxu0 %v9077_v21  ;;  %5913 = vmatpush1.bf16.msra.mxu1 %v9159_v5  ;;  %v9170_v5 = vld [vmem:[#allocation27_spill] sm:$0xff] }
 0xfe9   :  { %5915 = vmatprep.subr.bf16.mxu1 %v9160_v60  ;;  %v9171_v60 = vld [vmem:[#allocation28_spill] sm:$0xff] }
 0xfeb   :  { %5885 = vmatpush3.bf16.msra.mxu0 %v9161_v6  ;;  %v9172_v6 = vld [vmem:[#allocation31_spill] sm:$0xff] }
 0xfec   :  { %5951 = vmatprep.subr.bf16.mxu0 %v9162_v54  ;;  %5917 = vmatpush1.bf16.msra.mxu1 %v9163_v20  ;;  %v9173_v54 = vld [vmem:[#allocation32_spill] sm:$0xff]  ;;  %v9174_v20 = vld [vmem:[#allocation35_spill] sm:$0xff] }
 0xfed   :  { %5919 = vmatprep.subr.bf16.mxu1 %v9164_v7  ;;  %v9175_v7 = vld [vmem:[#allocation36_spill] sm:$0xff] }
 0xff0   :  { %5921 = vmatpush1.bf16.msra.mxu1 %v9165_v41  ;;  %v9176_v41 = vld [vmem:[#allocation38_spill] sm:$0xff] }
 0xff1   :  { %5923 = vmatprep.subr.bf16.mxu1 %v9166_v17  ;;  %v9177_v17 = vld [vmem:[#allocation41_spill] sm:$0xff] }
 0xff4   :  { %5925 = vmatpush1.bf16.msra.mxu1 %v9167_v29  ;;  %v9178_v29 = vld [vmem:[#allocation42_spill] sm:$0xff] }
 0xff5   :  { %5927 = vmatprep.subr.bf16.mxu1 %v9168_v59  ;;  %v9179_v59 = vld [vmem:[#allocation45_spill] sm:$0xff] }
 0xff8   :  { %5929 = vmatpush1.bf16.msra.mxu1 %v9169_v42  ;;  %v9180_v42 = vld [vmem:[#allocation58_spill] sm:$0xff] }
 0xff9   :  { %5931 = vmatprep.subr.bf16.mxu1 %v9170_v5 }
 0xffc   :  { %5933 = vmatpush1.bf16.msra.mxu1 %v9171_v60 }
 0xffd   :  { %5935 = vmatprep.subr.bf16.mxu1 %v9172_v6 }
0x1000   :  { %5937 = vmatpush1.bf16.msra.mxu1 %v9173_v54 }
0x1001   :  { %5939 = vmatprep.subr.bf16.mxu1 %v9174_v20 }
0x1004   :  { %5941 = vmatpush1.bf16.msra.mxu1 %v9175_v7 }
0x1005   :  { %5943 = vmatprep.subr.bf16.mxu1 %v9176_v41 }
0x1008   :  { %5945 = vmatpush1.bf16.msra.mxu1 %v9177_v17 }
0x1009   :  { %5947 = vmatprep.subr.bf16.mxu1 %v9178_v29 }
0x100c   :  { %5949 = vmatpush1.bf16.msra.mxu1 %v9179_v59 }
0x100d   :  { %6014 = vmatprep.subr.bf16.mxu1 %v9077_v21 }
0x10a1   :  { %v3043_v5 = vpop.f32.mrb[32].mxu0  ;;  %v3114_v60 = vpop.f32.mrb[32].mxu1 }
0x10a2   :  { %v3044_v6 = vadd.f32 %v3043_v5, %v9180_v42  ;;  %v3045_v8 = vpop.f32.mrb[33].mxu0  ;;  %v3116_v54 = vpop.f32.mrb[33].mxu1  ;;  %v3115_v29 = vadd.f32 %v3114_v60, %v8187_v30  ;;  %v9185_v60 = vld [vmem:[#allocation8_spill] sm:$0xff] }
0x10a3   :  { %v3046_v20 = vadd.f32 %v3045_v8, %v9084_v37  ;;  %v3117_v17 = vadd.f32 %v3116_v54, %v8182_v11 }
0x10a4   :  { %v4068_v47 = vmul.f32 -1.442695, %v3044_v6 }
0x10a5   :  { %v4069_v7 = vmul.f32 -1.442695, %v3046_v20  ;;  %v4070_v41 = vmul.f32 -1.442695, %v3117_v17 }
0x10a6   :  { %6569 = vpow2.f32 %v4068_v47 }
0x10a7   :  { %6571 = vpow2.f32 %v4069_v7 }
0x10a8   :  { %6573 = vpow2.f32 %v4070_v41 }
0x10a9   :  { %6575 = vtanh.f32 %v3115_v29  ;;  %v9184_v29 = vld [vmem:[#allocation54_spill] sm:$0xff] }
0x10b0   :  { %v6570_v59 = vpop.eup %6569 }
0x10b1   :  { %v6572_v55 = vpop.eup %6571  ;;  %v3122_v25 = vadd.f32 1.0, %v6570_v59 }
0x10b2   :  { %v3128_v27 = vadd.f32 1.0, %v6572_v55  ;;  %v6574_v5 = vpop.eup %6573  ;;  %v9182_v55 = vld [vmem:[#allocation5_spill] sm:$0xff] }
0x10b3   :  { %6577 = vrcp.f32 %v3122_v25  ;;  %v6576_v42 = vpop.eup %6575  ;;  %v3135_v47 = vadd.f32 1.0, %v6574_v5  ;;  %v9186_v5 = vld [vmem:[#allocation9_spill] sm:$0xff] }
0x10b4   :  { %6579 = vrcp.f32 %v3128_v27 }
0x10b5   :  { %6581 = vrcp.f32 %v3135_v47  ;;  %v9190_v47 = vld [vmem:[#allocation56_spill] sm:$0xff] }
0x10bd   :  { %v6578_v8 = vpop.eup %6577 }
0x10be   :  { %v6580_v6 = vpop.eup %6579  ;;  %v3139_v20 = vmul.f32 %v6578_v8, %v6576_v42  ;;  %v9183_v42 = vld [vmem:[#allocation7_spill] sm:$0xff] }
0x10bf   :  { %v3138_v7 = vmul.f32 %v6580_v6, %v8469_v50  ;;  %v6582_v17 = vpop.eup %6581  ;;  %v9187_v8 = vld [vmem:[#allocation55_spill] sm:$0xff]  ;;  %v9188_v6 = vld [vmem:[#allocation10_spill] sm:$0xff] }
0x10c1   :  { %v8560_v54 = vadd.f32 %v3139_v20, %v3138_v7  ;;  %v9189_v20 = vld [vmem:[#allocation11_spill] sm:$0xff]  ;;  %v9191_v7 = vld [vmem:[#allocation12_spill] sm:$0xff] }
0x10c3   :  { %6583 = vtanh.f32 %v8560_v54 }
0x10cd   :  { %v6584_v59 = vpop.eup %6583 }
0x10ce   :  { %v3142_v41 = vmul.f32 %v6584_v59, %v6582_v17  ;;  %v9192_v17 = vld [vmem:[#allocation13_spill] sm:$0xff] }
0x10cf   :  { %v9193_v59 = vld [vmem:[#allocation57_spill] sm:$0xff] }
0x10d0   :  { %4408 = vmatmul.mubr.f32.vlgmr.msra.gmra.mrb[34].mxu0 %v3142_v41  ;;  %3278 = vmatprep.mubr.f32.mxu1 %v3142_v41 }
0x10d1   :  { %3349 = vmatprep.mubr.f32.mxu0 %v3142_v41  ;;  %5953 = vmatpush1.bf16.msra.mxu0 %v7554_v10  ;;  %v9194_v41 = vld [vmem:[#allocation6_spill] sm:$0xff] }
0x10d2   :  { %5955 = vmatprep.subr.bf16.mxu0 %v7581_v36 }
0x10d5   :  { %5957 = vmatpush1.bf16.msra.mxu0 %v7590_v52 }
0x10d6   :  { %5959 = vmatprep.subr.bf16.mxu0 %v7617_v19 }
0x10d9   :  { %5961 = vmatpush1.bf16.msra.mxu0 %v7626_v32 }
0x10da   :  { %5963 = vmatprep.subr.bf16.mxu0 %v7653_v26 }
0x10dd   :  { %5965 = vmatpush1.bf16.msra.mxu0 %v7662_v34 }
0x10de   :  { %5967 = vmatprep.subr.bf16.mxu0 %v7689_v61 }
0x10e1   :  { %5969 = vmatpush1.bf16.msra.mxu0 %v7698_v12 }
0x10e2   :  { %5971 = vmatprep.subr.bf16.mxu0 %v9054_v16 }
0x10e5   :  { %5973 = vmatpush1.bf16.msra.mxu0 %v9055_v45 }
0x10e6   :  { %5975 = vmatprep.subr.bf16.mxu0 %v9056_v14 }
0x10e9   :  { %5977 = vmatpush1.bf16.msra.mxu0 %v9057_v15 }
0x10ea   :  { %5979 = vmatprep.subr.bf16.mxu0 %v9058_v49 }
0x10ed   :  { %5981 = vmatpush1.bf16.msra.mxu0 %v9085_v62 }
0x10ee   :  { %5983 = vmatprep.subr.bf16.mxu0 %v9086_v1 }
0x10f1   :  { %5985 = vmatpush1.bf16.msra.mxu0 %v9087_v38 }
0x10f2   :  { %5987 = vmatprep.subr.bf16.mxu0 %v9088_v63 }
0x10f5   :  { %5989 = vmatpush1.bf16.msra.mxu0 %v9089_v33 }
0x10f6   :  { %5991 = vmatprep.subr.bf16.mxu0 %v9090_v43 }
0x10f9   :  { %5993 = vmatpush1.bf16.msra.mxu0 %v9091_v51 }
0x10fa   :  { %5995 = vmatprep.subr.bf16.mxu0 %v9066_v56 }
0x10fd   :  { %5997 = vmatpush1.bf16.msra.mxu0 %v9092_v18 }
0x10fe   :  { %5999 = vmatprep.subr.bf16.mxu0 %v9093_v2 }
0x1101   :  { %6001 = vmatpush1.bf16.msra.mxu0 %v9094_v13 }
0x1102   :  { %6003 = vmatprep.subr.bf16.mxu0 %v9095_v44 }
0x1105   :  { %6005 = vmatpush1.bf16.msra.mxu0 %v9071_v3 }
0x1106   :  { %6007 = vmatprep.subr.bf16.mxu0 %v9072_v53 }
0x1109   :  { %6009 = vmatpush1.bf16.msra.mxu0 %v9073_v28 }
0x110a   :  { %6011 = vmatprep.subr.bf16.mxu0 %v9074_v22 }
0x110d   :  { %6013 = vmatpush1.bf16.msra.mxu0 %v9096_v24 }
0x110e   :  { %6039 = vmatprep.subr.bf16.mxu0 %v9076_v40 }
0x11a3   :  { %v3209_v50 = vpop.f32.mrb[34].mxu0 }
0x11a4   :  { %v3210_v27 = vadd.f32 %v8229_v23, %v3209_v50  ;;  %v4409_v25 = vpop.f32.mrb[35].mxu0  ;;  %v9181_v23 = vld [vmem:[#allocation53_spill] sm:$0xff]  ;;  %v9195_v50 = vld [vmem:[#allocation14_spill] sm:$0xff] }
0x11a5   :  { %v9197_v25 = vld [vmem:[#allocation16_spill] sm:$0xff] }
0x11a6   :  { %3213 = vst [vmem:[#allocation3 + $0x8] sm:$0x3] %v3210_v27  ;;  %3279 = vmatmul.mubr.f32.vlgmr.msra.gmra.mrb[34].mxu1 %v3210_v27  ;;  %3350 = vmatmul.mubr.f32.vlgmr.msra.gmra.mrb[36].mxu0 %v3210_v27  ;;  %v9196_v27 = vld [vmem:[#allocation15_spill] sm:$0xff] }
0x11a7   :  { %6016 = vmatpush3.bf16.msra.mxu1 %v8089_v35  ;;  %4442 = vmatprep.mubr.msk.f32.mxu1 %vm6636_vm0, %v9045_v9 }
0x11a8   :  { %6017 = vmatprep.subr.bf16.mxu1 %v9077_v21  ;;  %6041 = vmatpush1.bf16.msra.mxu0 %v7489_v31 }
0x11a9   :  { %6043 = vmatprep.subr.bf16.mxu0 %v7491_v58 }
0x11ab   :  { %6019 = vmatpush3.bf16.msra.mxu1 %v8101_v4 }
0x11ac   :  { %6020 = vmatprep.subr.bf16.mxu1 %v9077_v21  ;;  %6045 = vmatpush1.bf16.msra.mxu0 %v7506_v39 }
0x11ad   :  { %6047 = vmatprep.subr.bf16.mxu0 %v7509_v48 }
0x11af   :  { %6022 = vmatpush3.bf16.msra.mxu1 %v8111_v46 }
0x11b0   :  { %6023 = vmatprep.subr.bf16.mxu1 %v9077_v21  ;;  %6049 = vmatpush1.bf16.msra.mxu0 %v7518_v57 }
0x11b1   :  { %6051 = vmatprep.subr.bf16.mxu0 %v7528_v0 }
0x11b3   :  { %6025 = vmatpush3.bf16.msra.mxu1 %v9181_v23 }
0x11b4   :  { %6026 = vmatprep.subr.bf16.mxu1 %v9077_v21  ;;  %6053 = vmatpush1.bf16.msra.mxu0 %v9182_v55 }
0x11b5   :  { %6055 = vmatprep.subr.bf16.mxu0 %v9183_v42 }
0x11b7   :  { %6028 = vmatpush3.bf16.msra.mxu1 %v9184_v29 }
0x11b8   :  { %6029 = vmatprep.subr.bf16.mxu1 %v9077_v21  ;;  %6057 = vmatpush1.bf16.msra.mxu0 %v9185_v60 }
0x11b9   :  { %6059 = vmatprep.subr.bf16.mxu0 %v9186_v5 }
0x11bb   :  { %6031 = vmatpush3.bf16.msra.mxu1 %v9187_v8  ;;  %v9201_v8 = vld [vmem:[#allocation24_spill] sm:$0xff] }
0x11bc   :  { %6032 = vmatprep.subr.bf16.mxu1 %v9077_v21  ;;  %6061 = vmatpush1.bf16.msra.mxu0 %v9188_v6  ;;  %v9198_v6 = vld [vmem:[#allocation19_spill] sm:$0xff] }
0x11bd   :  { %6063 = vmatprep.subr.bf16.mxu0 %v9189_v20  ;;  %v9199_v20 = vld [vmem:[#allocation20_spill] sm:$0xff] }
0x11bf   :  { %6034 = vmatpush3.bf16.msra.mxu1 %v9190_v47  ;;  %v9200_v47 = vld [vmem:[#allocation23_spill] sm:$0xff] }
0x11c0   :  { %6035 = vmatprep.subr.bf16.mxu1 %v9077_v21  ;;  %6065 = vmatpush1.bf16.msra.mxu0 %v9191_v7  ;;  %v9202_v7 = vld [vmem:[#allocation27_spill] sm:$0xff] }
0x11c1   :  { %6067 = vmatprep.subr.bf16.mxu0 %v9192_v17  ;;  %v9203_v17 = vld [vmem:[#allocation28_spill] sm:$0xff] }
0x11c3   :  { %6037 = vmatpush3.bf16.msra.mxu1 %v9193_v59  ;;  %v9204_v59 = vld [vmem:[#allocation31_spill] sm:$0xff] }
0x11c4   :  { %6103 = vmatprep.subr.bf16.mxu1 %v9194_v41  ;;  %6069 = vmatpush1.bf16.msra.mxu0 %v9195_v50  ;;  %v9205_v41 = vld [vmem:[#allocation32_spill] sm:$0xff]  ;;  %v9206_v50 = vld [vmem:[#allocation35_spill] sm:$0xff] }
0x11c5   :  { %6071 = vmatprep.subr.bf16.mxu0 %v9196_v27  ;;  %v9207_v27 = vld [vmem:[#allocation36_spill] sm:$0xff] }
0x11c8   :  { %6073 = vmatpush1.bf16.msra.mxu0 %v9197_v25  ;;  %v9208_v25 = vld [vmem:[#allocation38_spill] sm:$0xff] }
0x11c9   :  { %6075 = vmatprep.subr.bf16.mxu0 %v9198_v6  ;;  %v9209_v6 = vld [vmem:[#allocation41_spill] sm:$0xff] }
0x11cc   :  { %6077 = vmatpush1.bf16.msra.mxu0 %v9199_v20  ;;  %v9210_v20 = vld [vmem:[#allocation42_spill] sm:$0xff] }
0x11cd   :  { %6079 = vmatprep.subr.bf16.mxu0 %v9200_v47  ;;  %v9211_v47 = vld [vmem:[#allocation45_spill] sm:$0xff] }
0x11d0   :  { %6081 = vmatpush1.bf16.msra.mxu0 %v9201_v8  ;;  %v9212_v8 = vld [vmem:[#allocation58_spill] sm:$0xff] }
0x11d1   :  { %6083 = vmatprep.subr.bf16.mxu0 %v9202_v7 }
0x11d4   :  { %6085 = vmatpush1.bf16.msra.mxu0 %v9203_v17 }
0x11d5   :  { %6087 = vmatprep.subr.bf16.mxu0 %v9204_v59 }
0x11d8   :  { %6089 = vmatpush1.bf16.msra.mxu0 %v9205_v41 }
0x11d9   :  { %6091 = vmatprep.subr.bf16.mxu0 %v9206_v50 }
0x11dc   :  { %6093 = vmatpush1.bf16.msra.mxu0 %v9207_v27 }
0x11dd   :  { %6095 = vmatprep.subr.bf16.mxu0 %v9208_v25 }
0x11e0   :  { %6097 = vmatpush1.bf16.msra.mxu0 %v9209_v6 }
0x11e1   :  { %6099 = vmatprep.subr.bf16.mxu0 %v9210_v20 }
0x11e4   :  { %6101 = vmatpush1.bf16.msra.mxu0 %v9211_v47 }
0x11e5   :  { %6166 = vmatprep.subr.bf16.mxu0 %v9077_v21 }
0x1279   :  { %v3280_v7 = vpop.f32.mrb[34].mxu1  ;;  %v3351_v17 = vpop.f32.mrb[36].mxu0 }
0x127a   :  { %v3281_v59 = vadd.f32 %v3280_v7, %v9212_v8  ;;  %v3282_v5 = vpop.f32.mrb[35].mxu1  ;;  %v3353_v41 = vpop.f32.mrb[37].mxu0  ;;  %v3352_v20 = vadd.f32 %v3351_v17, %v8187_v30 }
0x127b   :  { %v3283_v50 = vadd.f32 %v3282_v5, %v9084_v37  ;;  %v3354_v6 = vadd.f32 %v3353_v41, %v8182_v11 }
0x127c   :  { %v4071_v60 = vmul.f32 -1.442695, %v3281_v59 }
0x127d   :  { %v4072_v27 = vmul.f32 -1.442695, %v3283_v50  ;;  %v4073_v25 = vmul.f32 -1.442695, %v3354_v6 }
0x127e   :  { %6585 = vpow2.f32 %v4071_v60 }
0x127f   :  { %6587 = vpow2.f32 %v4072_v27 }
0x1280   :  { %6589 = vpow2.f32 %v4073_v25  ;;  %v9222_v25 = vld [vmem:[#allocation12_spill] sm:$0xff] }
0x1281   :  { %6591 = vtanh.f32 %v3352_v20  ;;  %v9221_v20 = vld [vmem:[#allocation56_spill] sm:$0xff] }
0x1288   :  { %v6586_v47 = vpop.eup %6585 }
0x1289   :  { %v6588_v29 = vpop.eup %6587  ;;  %v3359_v42 = vadd.f32 1.0, %v6586_v47 }
0x128a   :  { %v3365_v55 = vadd.f32 1.0, %v6588_v29  ;;  %v6590_v7 = vpop.eup %6589 }
0x128b   :  { %6593 = vrcp.f32 %v3359_v42  ;;  %v6592_v8 = vpop.eup %6591  ;;  %v3372_v60 = vadd.f32 1.0, %v6590_v7  ;;  %v9223_v7 = vld [vmem:[#allocation13_spill] sm:$0xff] }
0x128c   :  { %6595 = vrcp.f32 %v3365_v55  ;;  %v8689_v55 = vld [vmem:[%s8869_s7] ss:$0 sm:$0xff] }
0x128d   :  { %6597 = vrcp.f32 %v3372_v60  ;;  %v9227_v60 = vld [vmem:[#allocation15_spill] sm:$0xff] }
0x1295   :  { %v6594_v5 = vpop.eup %6593 }
0x1296   :  { %v6596_v59 = vpop.eup %6595  ;;  %v3376_v50 = vmul.f32 %v6594_v5, %v6592_v8  ;;  %v9218_v8 = vld [vmem:[#allocation55_spill] sm:$0xff]  ;;  %v9224_v5 = vld [vmem:[#allocation57_spill] sm:$0xff] }
0x1297   :  { %v3375_v27 = vmul.f32 %v6596_v59, %v8560_v54  ;;  %v6598_v6 = vpop.eup %6597  ;;  %v9225_v59 = vld [vmem:[#allocation6_spill] sm:$0xff] }
0x1299   :  { %v8651_v41 = vadd.f32 %v3376_v50, %v3375_v27  ;;  %v9226_v50 = vld [vmem:[#allocation14_spill] sm:$0xff]  ;;  %v9228_v27 = vld [vmem:[#allocation16_spill] sm:$0xff] }
0x129b   :  { %6599 = vtanh.f32 %v8651_v41 }
0x12a5   :  { %v6600_v47 = vpop.eup %6599 }
0x12a6   :  { %v3379_v17 = vmul.f32 %v6600_v47, %v6598_v6  ;;  %v9229_v6 = vld [vmem:[#allocation19_spill] sm:$0xff]  ;;  %v9230_v47 = vld [vmem:[#allocation20_spill] sm:$0xff] }
0x12a8   :  { %4443 = vmatmul.mubr.f32.vlgmr.msra.gmra.mrb[36].mxu1 %v3379_v17  ;;  %3515 = vmatprep.mubr.f32.mxu0 %v3379_v17 }
0x12a9   :  { %3586 = vmatprep.mubr.f32.mxu1 %v3379_v17  ;;  %6105 = vmatpush1.bf16.msra.mxu1 %v7554_v10  ;;  %v9231_v17 = vld [vmem:[#allocation23_spill] sm:$0xff] }
0x12aa   :  { %6107 = vmatprep.subr.bf16.mxu1 %v7581_v36 }
0x12ad   :  { %6109 = vmatpush1.bf16.msra.mxu1 %v7590_v52 }
0x12ae   :  { %6111 = vmatprep.subr.bf16.mxu1 %v7617_v19 }
0x12b1   :  { %6113 = vmatpush1.bf16.msra.mxu1 %v7626_v32 }
0x12b2   :  { %6115 = vmatprep.subr.bf16.mxu1 %v7653_v26 }
0x12b5   :  { %6117 = vmatpush1.bf16.msra.mxu1 %v7662_v34 }
0x12b6   :  { %6119 = vmatprep.subr.bf16.mxu1 %v7689_v61 }
0x12b9   :  { %6121 = vmatpush1.bf16.msra.mxu1 %v7698_v12 }
0x12ba   :  { %6123 = vmatprep.subr.bf16.mxu1 %v9054_v16 }
0x12bd   :  { %6125 = vmatpush1.bf16.msra.mxu1 %v9055_v45 }
0x12be   :  { %6127 = vmatprep.subr.bf16.mxu1 %v9056_v14 }
0x12c1   :  { %6129 = vmatpush1.bf16.msra.mxu1 %v9057_v15 }
0x12c2   :  { %6131 = vmatprep.subr.bf16.mxu1 %v9058_v49 }
0x12c5   :  { %6133 = vmatpush1.bf16.msra.mxu1 %v9085_v62 }
0x12c6   :  { %6135 = vmatprep.subr.bf16.mxu1 %v9086_v1 }
0x12c9   :  { %6137 = vmatpush1.bf16.msra.mxu1 %v9087_v38 }
0x12ca   :  { %6139 = vmatprep.subr.bf16.mxu1 %v9088_v63 }
0x12cd   :  { %6141 = vmatpush1.bf16.msra.mxu1 %v9089_v33 }
0x12ce   :  { %6143 = vmatprep.subr.bf16.mxu1 %v9090_v43 }
0x12d1   :  { %6145 = vmatpush1.bf16.msra.mxu1 %v9091_v51 }
0x12d2   :  { %6147 = vmatprep.subr.bf16.mxu1 %v9066_v56 }
0x12d5   :  { %6149 = vmatpush1.bf16.msra.mxu1 %v9092_v18 }
0x12d6   :  { %6151 = vmatprep.subr.bf16.mxu1 %v9093_v2 }
0x12d9   :  { %6153 = vmatpush1.bf16.msra.mxu1 %v9094_v13 }
0x12da   :  { %6155 = vmatprep.subr.bf16.mxu1 %v9095_v44 }
0x12dd   :  { %6157 = vmatpush1.bf16.msra.mxu1 %v9071_v3 }
0x12de   :  { %6159 = vmatprep.subr.bf16.mxu1 %v9072_v53 }
0x12e1   :  { %6161 = vmatpush1.bf16.msra.mxu1 %v9073_v28 }
0x12e2   :  { %6163 = vmatprep.subr.bf16.mxu1 %v9074_v22 }
0x12e5   :  { %6165 = vmatpush1.bf16.msra.mxu1 %v9096_v24 }
0x12e6   :  { %6191 = vmatprep.subr.bf16.mxu1 %v9076_v40  ;;  %v9215_v40 = vld [vmem:[#allocation54_spill] sm:$0xff] }
0x137b   :  { %v3446_v54 = vpop.f32.mrb[36].mxu1 }
0x137c   :  { %v3447_v42 = vadd.f32 %v8689_v55, %v3446_v54  ;;  %v4444_v29 = vpop.f32.mrb[37].mxu1  ;;  %v9232_v54 = vld [vmem:[#allocation24_spill] sm:$0xff] }
0x137d   :  { %v9234_v29 = vld [vmem:[#allocation28_spill] sm:$0xff] }
0x137e   :  { %3450 = vst [vmem:[#allocation3 + $0xa] sm:$0x3] %v3447_v42  ;;  %3516 = vmatmul.mubr.f32.vlgmr.msra.gmra.mrb[38].mxu0 %v3447_v42  ;;  %3587 = vmatmul.mubr.f32.vlgmr.msra.gmra.mrb[38].mxu1 %v3447_v42  ;;  %v9233_v42 = vld [vmem:[#allocation27_spill] sm:$0xff] }
0x137f   :  { %6168 = vmatpush3.bf16.msra.mxu0 %v8089_v35  ;;  %4477 = vmatprep.mubr.msk.f32.mxu0 %vm6636_vm0, %v9045_v9 }
0x1380   :  { %6169 = vmatprep.subr.bf16.mxu0 %v9077_v21  ;;  %6193 = vmatpush1.bf16.msra.mxu1 %v7489_v31  ;;  %v9213_v31 = vld [vmem:[#allocation5_spill] sm:$0xff] }
0x1381   :  { %6195 = vmatprep.subr.bf16.mxu1 %v7491_v58  ;;  %v9214_v58 = vld [vmem:[#allocation7_spill] sm:$0xff] }
0x1383   :  { %6171 = vmatpush3.bf16.msra.mxu0 %v8101_v4 }
0x1384   :  { %6172 = vmatprep.subr.bf16.mxu0 %v9077_v21  ;;  %6197 = vmatpush1.bf16.msra.mxu1 %v7506_v39  ;;  %v9216_v39 = vld [vmem:[#allocation8_spill] sm:$0xff] }
0x1385   :  { %6199 = vmatprep.subr.bf16.mxu1 %v7509_v48  ;;  %v9217_v48 = vld [vmem:[#allocation9_spill] sm:$0xff] }
0x1387   :  { %6174 = vmatpush3.bf16.msra.mxu0 %v8111_v46 }
0x1388   :  { %6175 = vmatprep.subr.bf16.mxu0 %v9077_v21  ;;  %6201 = vmatpush1.bf16.msra.mxu1 %v7518_v57  ;;  %v9219_v57 = vld [vmem:[#allocation10_spill] sm:$0xff] }
0x1389   :  { %6203 = vmatprep.subr.bf16.mxu1 %v7528_v0  ;;  %v9220_v0 = vld [vmem:[#allocation11_spill] sm:$0xff] }
0x138b   :  { %6177 = vmatpush3.bf16.msra.mxu0 %v9181_v23 }
0x138c   :  { %6178 = vmatprep.subr.bf16.mxu0 %v9077_v21  ;;  %6205 = vmatpush1.bf16.msra.mxu1 %v9213_v31  ;;  %v9235_v31 = vld [vmem:[#allocation31_spill] sm:$0xff] }
0x138d   :  { %6207 = vmatprep.subr.bf16.mxu1 %v9214_v58  ;;  %v9236_v58 = vld [vmem:[#allocation32_spill] sm:$0xff] }
0x138f   :  { %6180 = vmatpush3.bf16.msra.mxu0 %v9215_v40 }
0x1390   :  { %6181 = vmatprep.subr.bf16.mxu0 %v9077_v21  ;;  %6209 = vmatpush1.bf16.msra.mxu1 %v9216_v39  ;;  %v9237_v39 = vld [vmem:[#allocation35_spill] sm:$0xff] }
0x1391   :  { %6211 = vmatprep.subr.bf16.mxu1 %v9217_v48  ;;  %v9238_v48 = vld [vmem:[#allocation36_spill] sm:$0xff] }
0x1393   :  { %6183 = vmatpush3.bf16.msra.mxu0 %v9218_v8 }
0x1394   :  { %6184 = vmatprep.subr.bf16.mxu0 %v9077_v21  ;;  %6213 = vmatpush1.bf16.msra.mxu1 %v9219_v57  ;;  %v9239_v57 = vld [vmem:[#allocation38_spill] sm:$0xff] }
0x1395   :  { %6215 = vmatprep.subr.bf16.mxu1 %v9220_v0  ;;  %v9240_v0 = vld [vmem:[#allocation41_spill] sm:$0xff] }
0x1397   :  { %6186 = vmatpush3.bf16.msra.mxu0 %v9221_v20 }
0x1398   :  { %6187 = vmatprep.subr.bf16.mxu0 %v9077_v21  ;;  %6217 = vmatpush1.bf16.msra.mxu1 %v9222_v25  ;;  %v9241_v25 = vld [vmem:[#allocation42_spill] sm:$0xff] }
0x1399   :  { %6219 = vmatprep.subr.bf16.mxu1 %v9223_v7  ;;  %v9242_v7 = vld [vmem:[#allocation45_spill] sm:$0xff] }
0x139b   :  { %6189 = vmatpush3.bf16.msra.mxu0 %v9224_v5 }
0x139c   :  { %6255 = vmatprep.subr.bf16.mxu0 %v9225_v59  ;;  %6221 = vmatpush1.bf16.msra.mxu1 %v9226_v50 }
0x139d   :  { %6223 = vmatprep.subr.bf16.mxu1 %v9227_v60  ;;  %v9243_v60 = vld [vmem:[#allocation58_spill] sm:$0xff] }
0x13a0   :  { %6225 = vmatpush1.bf16.msra.mxu1 %v9228_v27 }
0x13a1   :  { %6227 = vmatprep.subr.bf16.mxu1 %v9229_v6 }
0x13a4   :  { %6229 = vmatpush1.bf16.msra.mxu1 %v9230_v47 }
0x13a5   :  { %6231 = vmatprep.subr.bf16.mxu1 %v9231_v17 }
0x13a8   :  { %6233 = vmatpush1.bf16.msra.mxu1 %v9232_v54 }
0x13a9   :  { %6235 = vmatprep.subr.bf16.mxu1 %v9233_v42 }
0x13ac   :  { %6237 = vmatpush1.bf16.msra.mxu1 %v9234_v29 }
0x13ad   :  { %6239 = vmatprep.subr.bf16.mxu1 %v9235_v31 }
0x13b0   :  { %6241 = vmatpush1.bf16.msra.mxu1 %v9236_v58 }
0x13b1   :  { %6243 = vmatprep.subr.bf16.mxu1 %v9237_v39 }
0x13b4   :  { %6245 = vmatpush1.bf16.msra.mxu1 %v9238_v48 }
0x13b5   :  { %6247 = vmatprep.subr.bf16.mxu1 %v9239_v57 }
0x13b8   :  { %6249 = vmatpush1.bf16.msra.mxu1 %v9240_v0 }
0x13b9   :  { %6251 = vmatprep.subr.bf16.mxu1 %v9241_v25 }
0x13bc   :  { %6253 = vmatpush1.bf16.msra.mxu1 %v9242_v7 }
0x13bd   :  { %6318 = vmatprep.subr.bf16.mxu1 %v9077_v21 }
0x1451   :  { %v3517_v59 = vpop.f32.mrb[38].mxu0  ;;  %v3588_v50 = vpop.f32.mrb[38].mxu1 }
0x1452   :  { %v3518_v27 = vadd.f32 %v3517_v59, %v9243_v60  ;;  %v3519_v6 = vpop.f32.mrb[39].mxu0  ;;  %v3590_v47 = vpop.f32.mrb[39].mxu1  ;;  %v3589_v58 = vadd.f32 %v3588_v50, %v8187_v30 }
0x1453   :  { %v3520_v17 = vadd.f32 %v3519_v6, %v9084_v37  ;;  %v3591_v29 = vadd.f32 %v3590_v47, %v8182_v11 }
0x1454   :  { %v4074_v54 = vmul.f32 -1.442695, %v3518_v27 }
0x1455   :  { %v4075_v42 = vmul.f32 -1.442695, %v3520_v17  ;;  %v4076_v31 = vmul.f32 -1.442695, %v3591_v29 }
0x1456   :  { %6601 = vpow2.f32 %v4074_v54 }
0x1457   :  { %6603 = vpow2.f32 %v4075_v42 }
0x1458   :  { %6605 = vpow2.f32 %v4076_v31 }
0x1459   :  { %6607 = vtanh.f32 %v3589_v58 }
0x1460   :  { %v6602_v39 = vpop.eup %6601 }
0x1461   :  { %v6604_v48 = vpop.eup %6603  ;;  %v3596_v57 = vadd.f32 1.0, %v6602_v39  ;;  %v3939_v39 = vld [vmem:[%s8870_s8 + $0x60] sm:$0xff] }
0x1462   :  { %v3602_v0 = vadd.f32 1.0, %v6604_v48  ;;  %v6606_v25 = vpop.eup %6605  ;;  %v3940_v48 = vld [vmem:[%s8870_s8 + $0x68] sm:$0xff] }
0x1463   :  { %6609 = vrcp.f32 %v3596_v57  ;;  %v6608_v7 = vpop.eup %6607  ;;  %v3609_v17 = vadd.f32 1.0, %v6606_v25  ;;  %v3941_v57 = vld [vmem:[%s8870_s8 + $0x70] sm:$0xff]  ;;  %v3942_v25 = vld [vmem:[%s8870_s8 + $0x78] sm:$0xff] }
0x1464   :  { %6611 = vrcp.f32 %v3602_v0  ;;  %v6366_v0 = vpack.c.bf16 %v3940_v48, %v3939_v39 }
0x1465   :  { %6613 = vrcp.f32 %v3609_v17 }
0x146d   :  { %v6610_v59 = vpop.eup %6609 }
0x146e   :  { %v6612_v27 = vpop.eup %6611  ;;  %v3613_v6 = vmul.f32 %v6610_v59, %v6608_v7  ;;  %v6370_v7 = vpack.c.bf16 %v3942_v25, %v3941_v57 }
0x146f   :  { %v3612_v54 = vmul.f32 %v6612_v27, %v8651_v41  ;;  %v6614_v50 = vpop.eup %6613 }
0x1471   :  { %v8747_v47 = vadd.f32 %v3613_v6, %v3612_v54  ;;  %v4080_v54 = vld [vmem:[%s8871_s9] ss:$0 sm:$0xff] }
0x1473   :  { %6615 = vtanh.f32 %v8747_v47 }
0x147d   :  { %v6616_v42 = vpop.eup %6615 }
0x147e   :  { %v3616_v29 = vmul.f32 %v6616_v42, %v6614_v50 }
0x1480   :  { %4478 = vmatmul.mubr.f32.vlgmr.msra.gmra.mrb[40].mxu0 %v3616_v29  ;;  %3752 = vmatprep.mubr.f32.mxu1 %v3616_v29 }
0x1481   :  { %3823 = vmatprep.mubr.f32.mxu0 %v3616_v29  ;;  %6257 = vmatpush1.bf16.msra.mxu0 %v7554_v10 }
0x1482   :  { %6259 = vmatprep.subr.bf16.mxu0 %v7581_v36 }
0x1485   :  { %6261 = vmatpush1.bf16.msra.mxu0 %v7590_v52 }
0x1486   :  { %6263 = vmatprep.subr.bf16.mxu0 %v7617_v19  ;;  %v3925_v19 = vld [vmem:[#allocation3] sm:$0xff] }
0x1489   :  { %6265 = vmatpush1.bf16.msra.mxu0 %v7626_v32  ;;  %v3927_v32 = vld [vmem:[%s8870_s8] sm:$0xff] }
0x148a   :  { %6267 = vmatprep.subr.bf16.mxu0 %v7653_v26  ;;  %v3928_v26 = vld [vmem:[%s8870_s8 + $0x8] sm:$0xff] }
0x148d   :  { %6269 = vmatpush1.bf16.msra.mxu0 %v7662_v34  ;;  %v3929_v34 = vld [vmem:[%s8870_s8 + $0x10] sm:$0xff] }
0x148e   :  { %6271 = vmatprep.subr.bf16.mxu0 %v7689_v61  ;;  %v6342_v61 = vpack.c.bf16 %v3928_v26, %v3927_v32 }
0x1491   :  { %6273 = vmatpush1.bf16.msra.mxu0 %v7698_v12  ;;  %v3930_v12 = vld [vmem:[%s8870_s8 + $0x18] sm:$0xff] }
0x1492   :  { %6275 = vmatprep.subr.bf16.mxu0 %v9054_v16  ;;  %v3933_v16 = vld [vmem:[%s8870_s8 + $0x30] sm:$0xff] }
0x1495   :  { %6277 = vmatpush1.bf16.msra.mxu0 %v9055_v45  ;;  %v3934_v45 = vld [vmem:[%s8870_s8 + $0x38] sm:$0xff] }
0x1496   :  { %6279 = vmatprep.subr.bf16.mxu0 %v9056_v14  ;;  %v6354_v14 = vpack.c.bf16 %v3934_v45, %v3933_v16 }
0x1499   :  { %6281 = vmatpush1.bf16.msra.mxu0 %v9057_v15  ;;  %v3935_v15 = vld [vmem:[%s8870_s8 + $0x40] sm:$0xff] }
0x149a   :  { %6283 = vmatprep.subr.bf16.mxu0 %v9058_v49  ;;  %v3936_v49 = vld [vmem:[%s8870_s8 + $0x48] sm:$0xff] }
0x149d   :  { %6285 = vmatpush1.bf16.msra.mxu0 %v9085_v62 }
0x149e   :  { %6287 = vmatprep.subr.bf16.mxu0 %v9086_v1 }
0x14a1   :  { %6289 = vmatpush1.bf16.msra.mxu0 %v9087_v38 }
0x14a2   :  { %6291 = vmatprep.subr.bf16.mxu0 %v9088_v63 }
0x14a5   :  { %6293 = vmatpush1.bf16.msra.mxu0 %v9089_v33 }
0x14a6   :  { %6295 = vmatprep.subr.bf16.mxu0 %v9090_v43 }
0x14a9   :  { %6297 = vmatpush1.bf16.msra.mxu0 %v9091_v51 }
0x14aa   :  { %6299 = vmatprep.subr.bf16.mxu0 %v9066_v56 }
0x14ad   :  { %6301 = vmatpush1.bf16.msra.mxu0 %v9092_v18 }
0x14ae   :  { %6303 = vmatprep.subr.bf16.mxu0 %v9093_v2 }
0x14b1   :  { %6305 = vmatpush1.bf16.msra.mxu0 %v9094_v13 }
0x14b2   :  { %6307 = vmatprep.subr.bf16.mxu0 %v9095_v44 }
0x14b5   :  { %6309 = vmatpush1.bf16.msra.mxu0 %v9071_v3  ;;  %v6358_v3 = vpack.c.bf16 %v3936_v49, %v3935_v15 }
0x14b6   :  { %6311 = vmatprep.subr.bf16.mxu0 %v9072_v53  ;;  %v3937_v53 = vld [vmem:[%s8870_s8 + $0x50] sm:$0xff] }
0x14b9   :  { %6313 = vmatpush1.bf16.msra.mxu0 %v9073_v28  ;;  %v3938_v28 = vld [vmem:[%s8870_s8 + $0x58] sm:$0xff] }
0x14ba   :  { %6315 = vmatprep.subr.bf16.mxu0 %v9074_v22  ;;  %v6362_v22 = vpack.c.bf16 %v3938_v28, %v3937_v53 }
0x14bd   :  { %6317 = vmatpush1.bf16.msra.mxu0 %v9096_v24 }
0x14be   :  { %6343 = vmatprep.subr.bf16.mxu0 %v6342_v61 }
0x1553   :  { %v3683_v10 = vpop.f32.mrb[40].mxu0 }
0x1554   :  { %v3684_v36 = vadd.f32 %v8689_v55, %v3683_v10  ;;  %v4479_v52 = vpop.f32.mrb[41].mxu0 }
0x1556   :  { %3687 = vst [vmem:[#allocation3 + $0xc] sm:$0x3] %v3684_v36  ;;  %3753 = vmatmul.mubr.f32.vlgmr.msra.gmra.mrb[40].mxu1 %v3684_v36  ;;  %3824 = vmatmul.mubr.f32.vlgmr.msra.gmra.mrb[42].mxu0 %v3684_v36 }
0x1557   :  { %4547 = vmatprep.mubr.f32.mxu0 %v3925_v19  ;;  %6320 = vmatpush3.bf16.msra.mxu1 %v8089_v35  ;;  %v6346_v35 = vpack.c.bf16 %v3930_v12, %v3929_v34 }
0x1558   :  { %6321 = vmatprep.subr.bf16.mxu1 %v9077_v21  ;;  %4512 = vmatprep.mubr.msk.f32.mxu1 %vm6636_vm0, %v9045_v9 }
0x1559   :  { %6345 = vmatpush3.bf16.msra.mxu0 %v6342_v61 }
0x155a   :  { %6347 = vmatprep.subr.bf16.mxu0 %v6346_v35 }
0x155b   :  { %6323 = vmatpush3.bf16.msra.mxu1 %v8101_v4  ;;  %v3931_v4 = vld [vmem:[%s8870_s8 + $0x20] sm:$0xff] }
0x155c   :  { %6324 = vmatprep.subr.bf16.mxu1 %v9077_v21 }
0x155d   :  { %6349 = vmatpush3.bf16.msra.mxu0 %v6346_v35 }
0x155f   :  { %6326 = vmatpush3.bf16.msra.mxu1 %v8111_v46  ;;  %v3932_v46 = vld [vmem:[%s8870_s8 + $0x28] sm:$0xff] }
0x1560   :  { %6327 = vmatprep.subr.bf16.mxu1 %v9077_v21  ;;  %v6350_v9 = vpack.c.bf16 %v3932_v46, %v3931_v4 }
0x1562   :  { %6351 = vmatprep.subr.bf16.mxu0 %v6350_v9 }
0x1563   :  { %6329 = vmatpush3.bf16.msra.mxu1 %v9181_v23  ;;  %6353 = vmatpush3.bf16.msra.mxu0 %v6350_v9 }
0x1564   :  { %6330 = vmatprep.subr.bf16.mxu1 %v9077_v21  ;;  %6355 = vmatprep.subr.bf16.mxu0 %v6354_v14 }
0x1567   :  { %6332 = vmatpush3.bf16.msra.mxu1 %v9215_v40  ;;  %6357 = vmatpush3.bf16.msra.mxu0 %v6354_v14 }
0x1568   :  { %6333 = vmatprep.subr.bf16.mxu1 %v9077_v21  ;;  %6359 = vmatprep.subr.bf16.mxu0 %v6358_v3 }
0x156b   :  { %6335 = vmatpush3.bf16.msra.mxu1 %v9218_v8  ;;  %6361 = vmatpush3.bf16.msra.mxu0 %v6358_v3 }
0x156c   :  { %6336 = vmatprep.subr.bf16.mxu1 %v9077_v21  ;;  %6363 = vmatprep.subr.bf16.mxu0 %v6362_v22 }
0x156f   :  { %6338 = vmatpush3.bf16.msra.mxu1 %v9221_v20  ;;  %6365 = vmatpush3.bf16.msra.mxu0 %v6362_v22 }
0x1570   :  { %6339 = vmatprep.subr.bf16.mxu1 %v9077_v21  ;;  %6367 = vmatprep.subr.bf16.mxu0 %v6366_v0 }
0x1573   :  { %6341 = vmatpush3.bf16.msra.mxu1 %v9224_v5  ;;  %6369 = vmatpush3.bf16.msra.mxu0 %v6366_v0 }
0x1574   :  { %6371 = vmatprep.subr.bf16.mxu0 %v6370_v7 }
0x1577   :  { %6373 = vmatpush3.bf16.msra.mxu0 %v6370_v7 }
0x1629   :  { %v3754_v21 = vpop.f32.mrb[40].mxu1  ;;  %v3825_v56 = vpop.f32.mrb[42].mxu0 }
0x162a   :  { %v3755_v62 = vadd.f32 %v3754_v21, %v9243_v60  ;;  %v3756_v1 = vpop.f32.mrb[41].mxu1  ;;  %v3827_v38 = vpop.f32.mrb[43].mxu0  ;;  %v3826_v2 = vadd.f32 %v3825_v56, %v8187_v30 }
0x162b   :  { %v3757_v63 = vadd.f32 %v3756_v1, %v9084_v37  ;;  %v3828_v51 = vadd.f32 %v3827_v38, %v8182_v11 }
0x162c   :  { %v4077_v33 = vmul.f32 -1.442695, %v3755_v62 }
0x162d   :  { %v4078_v43 = vmul.f32 -1.442695, %v3757_v63  ;;  %v4079_v18 = vmul.f32 -1.442695, %v3828_v51 }
0x162e   :  { %6617 = vpow2.f32 %v4077_v33 }
0x162f   :  { %6619 = vpow2.f32 %v4078_v43 }
0x1630   :  { %6621 = vpow2.f32 %v4079_v18 }
0x1631   :  { %6623 = vtanh.f32 %v3826_v2 }
0x1638   :  { %v6618_v13 = vpop.eup %6617 }
0x1639   :  { %v6620_v44 = vpop.eup %6619  ;;  %v3833_v24 = vadd.f32 1.0, %v6618_v13 }
0x163a   :  { %v3839_v23 = vadd.f32 1.0, %v6620_v44  ;;  %v6622_v41 = vpop.eup %6621 }
0x163b   :  { %6625 = vrcp.f32 %v3833_v24  ;;  %v6624_v40 = vpop.eup %6623  ;;  %v3846_v5 = vadd.f32 1.0, %v6622_v41 }
0x163c   :  { %6627 = vrcp.f32 %v3839_v23 }
0x163d   :  { %6629 = vrcp.f32 %v3846_v5 }
0x1645   :  { %v6626_v37 = vpop.eup %6625 }
0x1646   :  { %v6628_v8 = vpop.eup %6627  ;;  %v3850_v20 = vmul.f32 %v6626_v37, %v6624_v40 }
0x1647   :  { %v3849_v60 = vmul.f32 %v6628_v8, %v8747_v47  ;;  %v6630_v30 = vpop.eup %6629 }
0x1649   :  { %v3851_v11 = vadd.f32 %v3850_v20, %v3849_v60 }
0x164b   :  { %6631 = vtanh.f32 %v3851_v11 }
0x1655   :  { %v6632_v31 = vpop.eup %6631 }
0x1656   :  { %v3853_v58 = vmul.f32 %v6632_v31, %v6630_v30 }
0x1658   :  { %4513 = vmatmul.mubr.f32.vlgmr.msra.gmra.mrb[42].mxu1 %v3853_v58 }
0x172b   :  { %v3920_v59 = vpop.f32.mrb[42].mxu1 }
0x172c   :  { %v3921_v27 = vadd.f32 %v8689_v55, %v3920_v59  ;;  %v4514_v6 = vpop.f32.mrb[43].mxu1 }
0x172e   :  { %3924 = vst [vmem:[#allocation3 + $0xe] sm:$0x3] %v3921_v27 }
0x1735   :  { %v3926_v17 = vld [vmem:[#allocation3 + $0x8] sm:$0xff] }
0x1736   :  { %4548 = vmatmul.mubr.f32.vlgmr.msra.gmra.mrb[44].mxu0 %v3926_v17 }
0x1809   :  { %v4549_v47 = vpop.f32.mrb[44].mxu0 }
0x180a   :  { %v4022_v50 = vadd.f32 %v4549_v47, %v4080_v54  ;;  %v4016_v42 = vpop.f32.mrb[45].mxu0 }
0x180b   :  { %v4017_v29 = vadd.f32 %v4080_v54, %v4016_v42 }
0x180c   :  { %4026 = vst [vmem:[%s8872_s10 + $0x8] sm:$0xff] %v4022_v50 }
0x180d   :  { %4025 = vst [vmem:[%s8872_s10] sm:$0xff] %v4017_v29 }

</bundles_post_ra>
